<compile_context>
chip_gen: v7x
topology: tpu7x:2x2x1
jax: 0.10.0
libtpu: 0.0.40
codegen_flags: <defaults>
</compile_context>

<pallas_src>
import math

import jax
import jax.numpy as jnp
from jax import lax
from jax.experimental import pallas as pl
from jax.experimental.pallas import tpu as pltpu

# ---------------------------------------------------------------------------
# Config (DWNConfig defaults that matter for the forward pass)
# ---------------------------------------------------------------------------
D_MODEL = 10          # config.d_model
DIM_AMP = 4           # config.dim_amp
HIDDEN = DIM_AMP * D_MODEL
BATCH = 2
SEQ = 8

_INV_SQRT2 = 1.0 / math.sqrt(2.0)   # hoisted GELU constant
_H_OFFSET = 128                     # lane-aligned offset of the folded-MLP
                                    # block inside the packed weight buffer


# ---------------------------------------------------------------------------
# LRU_Robust.set_param : tiny (10x10) dense linear algebra (inv / eig /
# cholesky / pinv).  One-time parameter construction, not the hot path, and
# with no clean Pallas equivalent -> kept in plain JAX.
# TODO(synk): set_param's inv/eig/cholesky/pinv stay outside the Pallas kernel.
# ---------------------------------------------------------------------------
def lru_robust_set_param(p):
    n = p["Skew"].shape[0]
    I = jnp.eye(n, dtype=jnp.float32)
    gamma = p["gamma"]                              # (1, 1)
    g2 = gamma ** 2
    eps = g2 * jax.nn.sigmoid(p["alpha"])
    Sk = p["Skew"] - p["Skew"].T
    Q = (I - Sk) @ jnp.linalg.inv(I + Sk)
    X11, X12, X21, X22 = p["X11"], p["X12"], p["X21"], p["X22"]
    Cp, Dp = p["C"], p["D"]
    HHt_22 = X21 @ X21.T + X22 @ X22.T + Dp.T @ Dp
    # HHt_22 is symmetric PSD, so eigvalsh == real part of general eigvals.
    lmax = jnp.max(jnp.linalg.eigvalsh(HHt_22))
    normfactor = (g2 - eps) / lmax
    tnorm = jnp.sqrt(normfactor)
    X21n = X21 * tnorm
    X22n = X22 * tnorm
    Dn = Dp * tnorm
    HHt_22n = HHt_22 * normfactor
    HHt_11 = X11 @ X11.T + X12 @ X12.T + Cp.T @ Cp
    HHt_12 = X11 @ X21n.T + X12 @ X22n.T + Cp.T @ Dn
    V = HHt_22n - g2 * I
    R = HHt_12 @ jnp.linalg.inv(V).T @ HHt_12.T
    CR = jnp.linalg.cholesky(-R)
    CRH = jnp.linalg.cholesky(-R + HHt_11)
    Atilde = CRH @ Q @ jnp.linalg.inv(CR)
    A = jnp.linalg.inv(Atilde).T
    B = jnp.linalg.pinv(HHt_12.T @ Atilde.T) @ V.T
    return A, B, Cp, Dn


# ---------------------------------------------------------------------------
# Wrapper-side weight packing: Toeplitz recurrence operator + folded MLP.
#
# Flattened layout (row-major): x_flat[b, t*D + d] = x[b, t, d]
#   states_flat = x_flat @ T                       T      : (L*D, L*D)
#   h_flat      = x_flat @ W_h + tile(b_fc)        W_h    : (L*D, L*H)
#   y_flat      = gelu(h_flat) @ BDp + tile(b_proj) + x_flat
# where W_h = T @ blockdiag(C^T W_fc) + blockdiag(D^T W_fc),
#       BDp = blockdiag(W_proj)  (L identical diagonal blocks).
# ---------------------------------------------------------------------------
def _build_packed_weights(A, Bm, C, Dn, W_fc, b_fc, W_proj, b_proj, L):
    D = A.shape[0]
    H = W_fc.shape[1]
    LD, LH = L * D, L * H
    At, Bt = A.T, Bm.T

    # M_j = B^T (A^T)^j,  j = 0..L-1
    Ms = [Bt]
    for _ in range(L - 1):
        Ms.append(Ms[-1] @ At)
    Ms = jnp.stack(Ms)                                        # (L, D, D)

    # T block (k, t) = M_{t-k} for t >= k, 0 otherwise.
    idx = jnp.arange(L)
    delta = idx[None, :] - idx[:, None]                       # t - k
    blocks = jnp.where((delta >= 0)[:, :, None, None],
                       Ms[jnp.clip(delta, 0, L - 1)], 0.0)    # (L, L, D, D)
    T = blocks.transpose(0, 2, 1, 3).reshape(LD, LD)

    # Fold LRU output map into the first MLP layer, then through T.
    Wc = C.T @ W_fc                                           # (D, H)
    Wd = Dn.T @ W_fc                                          # (D, H)
    eyeL = jnp.eye(L, dtype=jnp.float32)
    W_h = T @ jnp.kron(eyeL, Wc) + jnp.kron(eyeL, Wd)         # (LD, LH)
    BDp = jnp.kron(eyeL, W_proj)                              # (LH, LD)

    # Packed buffer 1: rows 0:LD = [T | pad | W_h], row LD = [0 | pad | b_fc].
    W_pack = jnp.zeros((LD + 1, _H_OFFSET + LH), jnp.float32)
    W_pack = W_pack.at[:LD, :LD].set(T)
    W_pack = W_pack.at[:LD, _H_OFFSET:].set(W_h)
    W_pack = W_pack.at[LD, _H_OFFSET:].set(jnp.tile(b_fc, L))

    # Packed buffer 2: rows 0:LH = blockdiag(W_proj), row LH = tiled b_proj.
    Wp_pack = jnp.zeros((LH + 1, LD), jnp.float32)
    Wp_pack = Wp_pack.at[:LH, :].set(BDp)
    Wp_pack = Wp_pack.at[LH, :].set(jnp.tile(b_proj, L))
    return W_pack, Wp_pack


# ---------------------------------------------------------------------------
# Pallas kernel: two MXU matmuls + one EUP GELU, no loops, no reshapes.
# ---------------------------------------------------------------------------
def dwn_block_kernel(x_ref, wpack_ref, wproj_ref, y_ref, st_ref):
    Bsz, LD = x_ref.shape               # (2, 80)
    LH = wproj_ref.shape[0] - 1         # 320

    x = x_ref[...]                                        # (B, L*D)
    W = wpack_ref[pl.ds(0, LD), :]                        # (LD, 128+LH)
    brow = wpack_ref[pl.ds(LD, 1), :]                     # (1,  128+LH)

    # One matmul yields both the full state trajectory and the pre-GELU
    # hidden activations (bias row is zero over the state columns).
    r = jnp.dot(x, W, preferred_element_type=jnp.float32) + brow

    st_ref[...] = r[:, 0:LD]                              # all states at once
    h = r[:, _H_OFFSET:_H_OFFSET + LH]                    # (B, L*H), bias added

    # Exact erf-based GELU (matches nn.GELU() default); dropout(p=0) == id.
    g = 0.5 * h * (1.0 + lax.erf(h * _INV_SQRT2))

    Wp = wproj_ref[pl.ds(0, LH), :]                       # (LH, LD)
    bp = wproj_ref[pl.ds(LH, 1), :]                       # (1,  LD)
    y_ref[...] = jnp.dot(g, Wp, preferred_element_type=jnp.float32) + bp + x


# ---------------------------------------------------------------------------
# Wrapper
# ---------------------------------------------------------------------------
@jax.jit
def dwn_block_forward(x, params):
    """x: (B, L, D) float32  ->  (y: (B, L, D), states: (B, L, D))"""
    B_, L, D = x.shape
    A, Bm, C, Dn = lru_robust_set_param(params["lru"])
    mlp = params["mlp"]
    W_pack, Wp_pack = _build_packed_weights(
        A, Bm, C, Dn, mlp["W_fc"], mlp["b_fc"], mlp["W_proj"], mlp["b_proj"], L)

    x_flat = x.reshape(B_, L * D)                         # lane-dense 2-D

    vmem = pl.BlockSpec(memory_space=pltpu.MemorySpace.VMEM)
    y_flat, st_flat = pl.pallas_call(
        dwn_block_kernel,
        out_shape=(jax.ShapeDtypeStruct((B_, L * D), jnp.float32),
                   jax.ShapeDtypeStruct((B_, L * D), jnp.float32)),
        in_specs=[vmem, vmem, vmem],
        out_specs=(vmem, vmem),
    )(x_flat, W_pack, Wp_pack)

    return y_flat.reshape(B_, L, D), st_flat.reshape(B_, L, D)


# ---------------------------------------------------------------------------
# Pure-JAX reference (recursive form, same math) for correctness check
# ---------------------------------------------------------------------------
def ref_forward(x, params):
    A, Bm, C, Dn = lru_robust_set_param(params["lru"])
    B_, L, D = x.shape

    def step(state, u):
        state = state @ A.T + u @ Bm.T
        return state, state

    _, st = lax.scan(step, jnp.zeros((B_, D), jnp.float32),
                     jnp.transpose(x, (1, 0, 2)))
    st = jnp.transpose(st, (1, 0, 2))
    z = st @ C.T + x @ Dn.T
    h = jax.nn.gelu(z @ params["mlp"]["W_fc"] + params["mlp"]["b_fc"],
                    approximate=False)
    z2 = h @ params["mlp"]["W_proj"] + params["mlp"]["b_proj"]
    return z2 + x, st


if __name__ == "__main__":
    key = jax.random.PRNGKey(0)
    k_x, k_skew, k_gamma, k_wfc, k_bfc, k_wpj, k_bpj = jax.random.split(key, 7)

    n = D_MODEL
    params = {
        # LRU_Robust.__init__ shapes (identity X/C/D, randn Skew, 10*randn gamma)
        "lru": {
            "alpha": jnp.float32(-1.8),
            "gamma": 10.0 * jax.random.normal(k_gamma, (1, 1), jnp.float32),
            "Skew": jax.random.normal(k_skew, (n, n), jnp.float32),
            "X11": jnp.eye(n, dtype=jnp.float32),
            "X12": jnp.eye(n, dtype=jnp.float32),
            "X21": jnp.eye(n, dtype=jnp.float32),
            "X22": jnp.eye(n, dtype=jnp.float32),
            "C": jnp.eye(n, dtype=jnp.float32),
            "D": jnp.eye(n, dtype=jnp.float32),
        },
        # MLP weights stored as (in, out) so the kernel does `x @ W` directly
        "mlp": {
            "W_fc": jax.random.normal(k_wfc, (D_MODEL, HIDDEN), jnp.float32)
                    / math.sqrt(D_MODEL),
            "b_fc": 0.01 * jax.random.normal(k_bfc, (HIDDEN,), jnp.float32),
            "W_proj": jax.random.normal(k_wpj, (HIDDEN, D_MODEL), jnp.float32)
                      / math.sqrt(HIDDEN),
            "b_proj": 0.01 * jax.random.normal(k_bpj, (D_MODEL,), jnp.float32),
        },
    }

    x = jax.random.normal(k_x, (BATCH, SEQ, D_MODEL), jnp.float32)

    y, states = dwn_block_forward(x, params)
    jax.block_until_ready((y, states))

    y_ref, st_ref = ref_forward(x, params)
    assert y.shape == (BATCH, SEQ, D_MODEL) and states.shape == (BATCH, SEQ, D_MODEL)
    assert jnp.allclose(y, y_ref, rtol=2e-2, atol=2e-2), "output mismatch"
    assert jnp.allclose(states, st_ref, rtol=2e-2, atol=2e-2), "state mismatch"

    print("KERNEL_OK")
</pallas_src>

<mosaic_0001>
module attributes {stable_mosaic.version = 11 : i64} {
  func.func @dwn_block_kernel(%arg0: memref<2x80xf32, #tpu.memory_space<vmem>>, %arg1: memref<81x448xf32, #tpu.memory_space<vmem>>, %arg2: memref<321x80xf32, #tpu.memory_space<vmem>>, %arg3: memref<2x80xf32, #tpu.memory_space<vmem>>, %arg4: memref<2x80xf32, #tpu.memory_space<vmem>>) attributes {dimension_semantics = [], scalar_prefetch = 0 : i64, scratch_operands = 0 : i64, tpu.core_type = #tpu.core_type<tc>} {
    %c0 = arith.constant 0 : index
    %c0_0 = arith.constant 0 : index
    %0 = vector.load %arg0[%c0, %c0_0] : memref<2x80xf32, #tpu.memory_space<vmem>>, vector<2x80xf32>
    %c0_1 = arith.constant 0 : index
    %c0_2 = arith.constant 0 : index
    %1 = vector.load %arg1[%c0_1, %c0_2] : memref<81x448xf32, #tpu.memory_space<vmem>>, vector<80x448xf32>
    %c80 = arith.constant 80 : index
    %c0_3 = arith.constant 0 : index
    %2 = vector.load %arg1[%c80, %c0_3] : memref<81x448xf32, #tpu.memory_space<vmem>>, vector<1x448xf32>
    %cst = arith.constant dense<0.000000e+00> : vector<2x448xf32>
    %3 = tpu.matmul %0, %1, %cst {dimension_numbers = #tpu.dot_dimension_numbers<[1], [0], [0], [1], [0, 0, 1, 1], [], []>} : vector<2x80xf32>, vector<80x448xf32>, vector<2x448xf32> -> vector<2x448xf32>
    %4 = vector.broadcast %2 : vector<1x448xf32> to vector<2x448xf32>
    %5 = arith.addf %3, %4 : vector<2x448xf32>
    %6 = vector.extract_strided_slice %5 {offsets = [0, 0], sizes = [2, 80], strides = [1, 1]} : vector<2x448xf32> to vector<2x80xf32>
    %c0_4 = arith.constant 0 : index
    %c0_5 = arith.constant 0 : index
    %7 = vector.load %arg4[%c0_4, %c0_5] : memref<2x80xf32, #tpu.memory_space<vmem>>, vector<2x80xf32>
    tpu.vector_store %arg4[%c0_4, %c0_5], %6 {strides = array<i32>} : memref<2x80xf32, #tpu.memory_space<vmem>>, vector<2x80xf32>,
    %8 = vector.extract_strided_slice %5 {offsets = [0, 128], sizes = [2, 320], strides = [1, 1]} : vector<2x448xf32> to vector<2x320xf32>
    %cst_6 = arith.constant 5.000000e-01 : f32
    %9 = vector.broadcast %cst_6 : f32 to vector<2x320xf32>
    %10 = arith.mulf %9, %8 : vector<2x320xf32>
    %cst_7 = arith.constant 0.707106769 : f32
    %11 = vector.broadcast %cst_7 : f32 to vector<2x320xf32>
    %12 = arith.mulf %8, %11 : vector<2x320xf32>
    %13 = math.erf %12 : vector<2x320xf32>
    %cst_8 = arith.constant 1.000000e+00 : f32
    %14 = vector.broadcast %cst_8 : f32 to vector<2x320xf32>
    %15 = arith.addf %14, %13 : vector<2x320xf32>
    %16 = arith.mulf %10, %15 : vector<2x320xf32>
    %c0_9 = arith.constant 0 : index
    %c0_10 = arith.constant 0 : index
    %17 = vector.load %arg2[%c0_9, %c0_10] : memref<321x80xf32, #tpu.memory_space<vmem>>, vector<320x80xf32>
    %c320 = arith.constant 320 : index
    %c0_11 = arith.constant 0 : index
    %18 = vector.load %arg2[%c320, %c0_11] : memref<321x80xf32, #tpu.memory_space<vmem>>, vector<1x80xf32>
    %cst_12 = arith.constant dense<0.000000e+00> : vector<2x80xf32>
    %19 = tpu.matmul %16, %17, %cst_12 {dimension_numbers = #tpu.dot_dimension_numbers<[1], [0], [0], [1], [0, 0, 1, 1], [], []>} : vector<2x320xf32>, vector<320x80xf32>, vector<2x80xf32> -> vector<2x80xf32>
    %20 = vector.broadcast %18 : vector<1x80xf32> to vector<2x80xf32>
    %21 = arith.addf %19, %20 : vector<2x80xf32>
    %22 = arith.addf %21, %0 : vector<2x80xf32>
    %c0_13 = arith.constant 0 : index
    %c0_14 = arith.constant 0 : index
    %23 = vector.load %arg3[%c0_13, %c0_14] : memref<2x80xf32, #tpu.memory_space<vmem>>, vector<2x80xf32>
    tpu.vector_store %arg3[%c0_13, %c0_14], %22 {strides = array<i32>} : memref<2x80xf32, #tpu.memory_space<vmem>>, vector<2x80xf32>,
    return
  }
}

</mosaic_0001>

<bundles_post_ra>
// kernel: custom-call.65
= control target key start
LH: loop header
LB: loop body
LE: loop exit
PB: predicated region body
PF: predicated region fallthrough
CT: control target
= control target key end

     0   :  { %11 = vsyncpa [#allocation9], 0  ;;  %s2191_s0 = inlined_call_operand.vmem [shape: f32[5,5], index: 0, kind: input, shape index: {}]   ;;  %s2192_s1 = inlined_call_operand.vmem [shape: f32[5,5], index: 1, kind: input, shape index: {}]   ;;  %s2193_s2 = inlined_call_operand.vmem [shape: f32[5,5], index: 2, kind: input, shape index: {}]   ;;  %s2194_s3 = inlined_call_operand.vmem [shape: f32[5,5], index: 3, kind: input, shape index: {}]   ;;  %s2195_s4 = inlined_call_operand.vmem [shape: f32[5], index: 4, kind: output, shape index: {0}]   ;;  %s2196_s5 = inlined_call_operand.vmem [shape: f32[5], index: 5, kind: output, shape index: {1}]   ;;  %s2197_s6 = inlined_call_operand.hbm [shape: f32[5,5], index: 6, kind: output, shape index: {2}]   ;;  %s2198_s7 = inlined_call_operand.hbm [shape: f32[5,5], index: 7, kind: output, shape index: {3}]   ;;  %s2199_s8 = inlined_call_operand.hbm [shape: f32[5,5], index: 8, kind: output, shape index: {4}]   ;;  %s2200_s9 = inlined_call_operand.hbm [shape: f32[5,5], index: 9, kind: output, shape index: {5}]  }
   0x1   :  { %12 = vsyncpa [#allocation11], 0 }
   0x2   :  { %13 = vsyncpa [#allocation14], 0  ;;  %s1815_s30 = smov [#allocation0]   ;;  %s1819_s12 = smov %s2191_s0  }
   0x3 LB: > { %v61_v0 = vld [vmem:[%s1821_s12] sm:$0xff]  ;;  %s63_s12 = scalar_lea.vmem %s1821_s12, 8   ;;  %s1821_s12 = sphi %s1819_s12, %s63_s12   ;;  %s1817_s30 = sphi %s1815_s30, %s64_s30  }
   0x4   : > { %62 = vst [vmem:[%s1817_s30] sm:$0xff] %v61_v0  ;;  %s64_s30 = scalar_lea.vmem %s1817_s30, 8   ;;  %p58_p0 = scmp.gt.s32.totalorder %s63_s12, %s2191_s0 }
   0x5   :  { %s1823_s15 = smov (%p58_p0), [#allocation1]   ;;  %s1827_s18 = smov (%p58_p0), %s2192_s1  }
   0x6   :  { %60 = sbr.rel (!%p58_p0) target bundleno = 3 (0x3), region = 242 }
   0xd LB: > { %v123_v1 = vld [vmem:[%s1829_s18] sm:$0xff]  ;;  %s125_s18 = scalar_lea.vmem %s1829_s18, 8   ;;  %s1829_s18 = sphi %s1827_s18, %s125_s18   ;;  %s1825_s15 = sphi %s1823_s15, %s126_s15  }
   0xe   : > { %124 = vst [vmem:[%s1825_s15] sm:$0xff] %v123_v1  ;;  %s126_s15 = scalar_lea.vmem %s1825_s15, 8   ;;  %p120_p1 = scmp.gt.s32.totalorder %s125_s18, %s2192_s1 }
   0xf   :  { %s1831_s0 = smov (%p120_p1), [#allocation2]   ;;  %s1835_s23 = smov (%p120_p1), %s2193_s2  }
  0x10   :  { %122 = sbr.rel (!%p120_p1) target bundleno = 13 (0xd), region = 264 }
  0x17 LB: > { %v185_v2 = vld [vmem:[%s1837_s23] sm:$0xff]  ;;  %s187_s23 = scalar_lea.vmem %s1837_s23, 8   ;;  %s1837_s23 = sphi %s1835_s23, %s187_s23   ;;  %s1833_s0 = sphi %s1831_s0, %s188_s0  }
  0x18   : > { %186 = vst [vmem:[%s1833_s0] sm:$0xff] %v185_v2  ;;  %s188_s0 = scalar_lea.vmem %s1833_s0, 8   ;;  %p182_p2 = scmp.gt.s32.totalorder %s187_s23, %s2193_s2 }
  0x19   :  { %s1839_s1 = smov (%p182_p2), [#allocation3]   ;;  %s1843_s28 = smov (%p182_p2), %s2194_s3  }
  0x1a   :  { %184 = sbr.rel (!%p182_p2) target bundleno = 23 (0x17), region = 286 }
  0x21 LB: > { %v247_v3 = vld [vmem:[%s1845_s28] sm:$0xff]  ;;  %s249_s28 = scalar_lea.vmem %s1845_s28, 8   ;;  %s1845_s28 = sphi %s1843_s28, %s249_s28   ;;  %s1841_s1 = sphi %s1839_s1, %s250_s1  }
  0x22   : > { %248 = vst [vmem:[%s1841_s1] sm:$0xff] %v247_v3  ;;  %s250_s1 = scalar_lea.vmem %s1841_s1, 8   ;;  %p244_p3 = scmp.gt.s32.totalorder %s249_s28, %s2194_s3 }
  0x23   :  { %s262_s2 = smov (%p244_p3), [#allocation15]  ;;  %v263_v4 = vld [vmem:[#allocation0] sm:$0xff] (%p244_p3)  ;;  %s265_s10 = smov (%p244_p3), [#allocation16]  ;;  %v266_v5 = vld [vmem:[#allocation1] sm:$0xff] (%p244_p3)  ;;  %v269_v6 = vld [vmem:[#allocation2] sm:$0xff] (%p244_p3)  ;;  %v279_v7 = vlaneseq (%p244_p3)  ;;  %v1855_v9 = vmov (%p244_p3), 0.0  }
  0x24   :  { %246 = sbr.rel (!%p244_p3) target bundleno = 33 (0x21), region = 308  ;;  %264 = vst [vmem:[%s262_s2] sm:$0xff] (%p244_p3), %v263_v4  ;;  %267 = vst [vmem:[%s265_s10] sm:$0xff] (%p244_p3), %v266_v5  ;;  %s268_s11 = smov (%p244_p3), [#allocation17] }
  0x25   :  { %s271_s12 = smov (%p244_p3), [#allocation18]  ;;  %274 = vst [vmem:[#allocation8] sm:$0xff] (%p244_p3), %v1855_v9  ;;  %275 = vst [vmem:[#allocation10] sm:$0xff] (%p244_p3), %v1855_v9  ;;  %v1936_v10 = vand.u32 (%p244_p3), 127, %v279_v7  ;;  %v1938_v11 = vshrl.u32 (%p244_p3), %v279_v7, 7  ;;  %s278_s3 = smov (%p244_p3), [#allocation8] }
  0x26   :  { %276 = vst [vmem:[#allocation12] sm:$0xff] (%p244_p3), %v1855_v9  ;;  %277 = vst [vmem:[#allocation13] sm:$0xff] (%p244_p3), %v1855_v9  ;;  %s291_s13 = smov (%p244_p3), [#allocation13]  ;;  %s1179_s14 = smov (%p244_p3), [#allocation15] }
  0x27   :  { %270 = vst [vmem:[%s268_s11] sm:$0xff] (%p244_p3), %v269_v6  ;;  %v281_v10 = vmov (%p244_p3), %v1936_v10  ;;  %v284_v11 = vmov (%p244_p3), %v1938_v11  ;;  %vm1183_vm2 = vcmp.lt.s32.totalorder (%p244_p3), %v1936_v10, 5  ;;  %s1196_s15 = smov (%p244_p3), [#allocation16]  ;;  %s1213_s16 = smov (%p244_p3), [#allocation17] }
  0x28   :  { %v294_v10 = vmov (%p244_p3), %v1936_v10  ;;  %v297_v11 = vmov (%p244_p3), %v1938_v11  ;;  %vm288_vm0 = vcmp.eq.s32.totalorder (%p244_p3), %v284_v11, %v281_v10  ;;  %s1230_s17 = smov (%p244_p3), [#allocation18] }
  0x29   :  { %v272_v8 = vld [vmem:[#allocation3] sm:$0xff] (%p244_p3)  ;;  %vm301_vm1 = vcmp.eq.s32.totalorder (%p244_p3), %v297_v11, %v294_v10  ;;  %v1175_v10 = vmov (%p244_p3), %v1936_v10  ;;  %v1178_v11 = vmov (%p244_p3), %v1938_v11 }
  0x2a   :  { %273 = vst [vmem:[%s271_s12] sm:$0xff] (%p244_p3), %v272_v8  ;;  %vm1188_vm3 = vcmp.eq.s32.totalorder (%p244_p3), %v1178_v11, %v1175_v10  ;;  %v1226_v10 = vmov (%p244_p3), %v1936_v10  ;;  %v1195_v11 = vmov (%p244_p3), %v1938_v11 }
  0x2b   :  { %v1185_v16 = vld [vmem:[%s1179_s14] sm:$0x1f]  ;;  %v1192_v10 = vmov %v1936_v10  ;;  %v1229_v11 = vmov %v1938_v11 }
  0x2c   :  { %v285_v12 = vld [vmem:[%s278_s3] sm:$0x1f]  ;;  %v1186_v18 = vsel %vm1183_vm2, %v1185_v16, 0.0  ;;  %v1209_v10 = vmov %v1936_v10  ;;  %v1212_v11 = vmov %v1938_v11  ;;  %vm1239_vm4 = vcmp.eq.s32.totalorder %v1229_v11, %v1226_v10 }
  0x2d   :  { %v298_v13 = vld [vmem:[%s291_s13] sm:$0x1f]  ;;  %v289_v14 = vsel %vm288_vm0, 1.0, %v285_v12  ;;  %v1187_v22 = vmul.f32 %v1186_v18, %v1186_v18 }
  0x2e   :  { %v302_v15 = vsel %vm301_vm1, 1.0, %v298_v13  ;;  %290 = vst [vmem:[%s278_s3] sm:$0x1f] %v289_v14  ;;  %v1202_v17 = vld [vmem:[%s1196_s15] sm:$0x1f] }
  0x2f   :  { %303 = vst [vmem:[%s291_s13] sm:$0x1f] %v302_v15  ;;  %v1203_v19 = vsel %vm1183_vm2, %v1202_v17, 0.0  ;;  %v1219_v20 = vld [vmem:[%s1213_s16] sm:$0x1f]  ;;  %v1189_v29 = vsel %vm1188_vm3, 0.0, %v1187_v22 }
  0x30   :  { %v1204_v23 = vmul.f32 %v1203_v19, %v1203_v19  ;;  %v1220_v24 = vsel %vm1183_vm2, %v1219_v20, 0.0 }
  0x31   :  { %v1236_v21 = vld [vmem:[%s1230_s17] sm:$0x1f]  ;;  %v1221_v26 = vmul.f32 %v1220_v24, %v1220_v24 }
  0x32   :  { %v1237_v25 = vsel %vm1183_vm2, %v1236_v21, 0.0  ;;  %v1206_v27 = vadd.f32 %v1204_v23, %v1187_v22  ;;  %v1205_v30 = vadd.f32 %v1204_v23, %v1189_v29 }
  0x33   :  { %v1238_v28 = vmul.f32 %v1237_v25, %v1237_v25 }
  0x34   :  { %v1223_v31 = vadd.f32 %v1221_v26, %v1206_v27  ;;  %v1222_v32 = vadd.f32 %v1221_v26, %v1205_v30 }
  0x35   :  { %v1240_v33 = vsel %vm1239_vm4, 0.0, %v1238_v28 }
  0x36   :  { %v1242_v34 = vadd.f32 %v1238_v28, %v1223_v31  ;;  %v1241_v35 = vadd.f32 %v1240_v33, %v1222_v32 }
  0x38   :  { %1243 = vadd.xlane.f32.xlu0 %v1242_v34 }
  0x3c   :  { %1251 = vadd.xlane.f32.xlu0 %v1241_v35 }
  0xc5   :  { %v1244_v36 = vpop.xlane.xlu0 %1243 }
  0xc6   :  { %v1245_v37 = vrot.slane %v1244_v36, 4 }
  0xc8   :  { %v1246_v38 = vadd.f32 %v1245_v37, %v1244_v36 }
  0xc9   :  { %v1252_v39 = vpop.xlane.xlu0 %1251 }
  0xca   :  { %v1247_v40 = vrot.slane %v1246_v38, 2  ;;  %v1253_v41 = vrot.slane %v1252_v39, 4 }
  0xcc   :  { %v1254_v42 = vadd.f32 %v1253_v41, %v1252_v39  ;;  %v1248_v43 = vadd.f32 %v1247_v40, %v1246_v38 }
  0xce   :  { %v1255_v44 = vrot.slane %v1254_v42, 2  ;;  %v1249_v46 = vrot.slane %v1248_v43, 1 }
  0xd0   :  { %v1256_v45 = vadd.f32 %v1255_v44, %v1254_v42  ;;  %v1250_v49 = vadd.f32 %v1249_v46, %v1248_v43 }
  0xd2   :  { %v1257_v47 = vrot.slane %v1256_v45, 1 }
  0xd4   :  { %v1258_v48 = vadd.f32 %v1257_v47, %v1256_v45 }
  0xd6   :  { %1338 = vpush %v1258_v48 }
  0xd7   :  { %1340 = vpush %v1250_v49 }
 0x107   :  { %s1339_s18 = spop %1338 }
 0x108   :  { %s1341_s19 = spop %1340 }
 0x109   :  { %s1261_s20 = smul.f32 1e-10, %s1341_s19 }
 0x10b   :  { %p1262_p4 = scmp.le.f32.partialorder %s1339_s18, %s1261_s20 }
 0x10c   :  { %s1962_s0 = smov (!%p1262_p4), 0  }
 0x10d   :  { %1265 = sbr.rel (%p1262_p4) target bundleno = 951 (0x3b7), region = 324 }
 0x114 LB: > { %s1967_s21 = smov 0   ;;  %s1849_s0 = sphi %s1962_s0, %s2201_s0  }
 0x115 LB: >> { %s408_s22 = smov [#allocation15]  ;;  %v412_v10 = vmov %v1936_v10  ;;  %v415_v11 = vmov %v1938_v11  ;;  %s428_s23 = smov [#allocation16]  ;;  %vm731_vm14 = vcmp.eq.s32.totalorder %v1938_v11, 0  ;;  %vm743_vm15 = vcmp.eq.s32.totalorder %v1938_v11, 4  ;;  %s1853_s21 = sphi %s1967_s21, %s407_s21  }
 0x116   : >> { %v432_v10 = vmov %v1936_v10  ;;  %v435_v11 = vmov %v1938_v11  ;;  %v416_v50 = vld [vmem:[%s408_s22] sm:$0x1f]  ;;  %vm419_vm5 = vcmp.eq.s32.totalorder %v415_v11, %v412_v10  ;;  %s448_s24 = smov [#allocation18]  ;;  %s409_s25 = smov [#allocation19] }
 0x117   : >> { %vm439_vm6 = vcmp.eq.s32.totalorder %v435_v11, %v432_v10  ;;  %v452_v10 = vmov %v1936_v10  ;;  %v455_v11 = vmov %v1938_v11  ;;  %v420_v51 = vsel %vm419_vm5, %v416_v50, 0.0  ;;  %v436_v52 = vld [vmem:[%s428_s23] sm:$0x1f]  ;;  %s429_s1 = smov [#allocation20]  ;;  %s449_s26 = smov [#allocation21] }
 0x118   : >> { %vm459_vm7 = vcmp.eq.s32.totalorder %v455_v11, %v452_v10  ;;  %v421_v53 = vrot.slane %v420_v51, 4  ;;  %v440_v54 = vsel %vm439_vm6, %v436_v52, 0.0  ;;  %v456_v55 = vld [vmem:[%s448_s24] sm:$0x1f]  ;;  %s472_s27 = smov [#allocation20]  ;;  %s470_s28 = smov [#allocation19]  ;;  %v521_v10 = vmov %v1936_v10 }
 0x119   : >> { %v441_v56 = vrot.slane %v440_v54, 4  ;;  %v460_v57 = vsel %vm459_vm7, %v456_v55, 0.0  ;;  %s474_s29 = smov [#allocation21]  ;;  %s509_s30 = smov [#allocation22]  ;;  %v524_v11 = vmov %v1938_v11  ;;  %v536_v10 = vmov %v1936_v10 }
 0x11a   : >> { %v422_v58 = vadd.f32 %v421_v53, %v420_v51  ;;  %v461_v59 = vrot.slane %v460_v57, 4  ;;  %s511_s2 = smov [#allocation23]  ;;  %s468_s10 = smov [#allocation24]  ;;  %v539_v11 = vmov %v1938_v11  ;;  %vm526_vm12 = vcmp.eq.s32.totalorder %v524_v11, %v521_v10 }
 0x11b   : >> { %v442_v60 = vadd.f32 %v441_v56, %v440_v54  ;;  %s469_s11 = smov [#allocation25]  ;;  %s513_s10 = smov %s468_s10  ;;  %vm541_vm13 = vcmp.eq.s32.totalorder %v539_v11, %v536_v10  ;;  %v634_v10 = vmov %v1936_v10  ;;  %v637_v11 = vmov %v1938_v11 }
 0x11c   : >> { %v423_v61 = vrot.slane %v422_v58, 2  ;;  %v462_v62 = vadd.f32 %v461_v59, %v460_v57  ;;  %s515_s11 = smov %s469_s11  ;;  %s517_s12 = smov [#allocation24]  ;;  %v648_v10 = vmov %v1936_v10  ;;  %v651_v11 = vmov %v1938_v11 }
 0x11d   : >> { %v443_v63 = vrot.slane %v442_v60, 2  ;;  %s532_s3 = smov [#allocation25]  ;;  %s530_s13 = smov [#allocation26]  ;;  %vm641_vm0 = vcmp.eq.s32.totalorder %v637_v11, %v634_v10  ;;  %v607_v10 = vmov %v1936_v10  ;;  %v610_v11 = vmov %v1938_v11 }
 0x11e   : >> { %v424_v0 = vadd.f32 %v423_v61, %v422_v58  ;;  %v463_v1 = vrot.slane %v462_v62, 2  ;;  %s547_s14 = smov [#allocation26]  ;;  %s1982_s15 = smov [#allocation15]  ;;  %v621_v10 = vmov %v1936_v10  ;;  %v624_v11 = vmov %v1938_v11 }
 0x11f   : >> { %v444_v2 = vadd.f32 %v443_v63, %v442_v60  ;;  %s545_s16 = smov [#allocation27]  ;;  %s1984_s17 = smov [#allocation16]  ;;  %v555_v49 = vld [vmem:[%s1982_s15] sm:$0x1f]  ;;  %vm656_vm1 = vcmp.eq.s32.totalorder %v651_v11, %v648_v10  ;;  %vm615_vm3 = vcmp.eq.s32.totalorder %v610_v11, %v607_v10  ;;  %vm628_vm4 = vcmp.eq.s32.totalorder %v624_v11, %v621_v10 }
 0x120   : >> { %v425_v3 = vrot.slane %v424_v0, 1  ;;  %v464_v4 = vadd.f32 %v463_v1, %v462_v62  ;;  %s1986_s18 = smov [#allocation17]  ;;  %s1988_s19 = smov [#allocation18]  ;;  %v556_v50 = vld [vmem:[%s1984_s17] sm:$0x1f]  ;;  %vm670_vm5 = vcmp.eq.s32.totalorder %v1936_v10, 0 }
 0x121   : >> { %v445_v5 = vrot.slane %v444_v2, 1  ;;  %s1990_s20 = smov [#allocation8]  ;;  %s1992_s22 = smov [#allocation10]  ;;  %v557_v51 = vld [vmem:[%s1986_s18] sm:$0x1f]  ;;  %vm674_vm6 = vcmp.eq.s32.totalorder %v1936_v10, 1 }
 0x122   : >> { %v426_v6 = vadd.f32 %v425_v3, %v424_v0  ;;  %v465_v7 = vrot.slane %v464_v4, 1  ;;  %s1994_s23 = smov [#allocation12]  ;;  %s771_s24 = smov [#allocation26]  ;;  %v558_v52 = vld [vmem:[%s1988_s19] sm:$0x1f]  ;;  %vm687_vm7 = vcmp.eq.s32.totalorder %v1936_v10, 4 }
 0x123   : >> { %v446_v8 = vadd.f32 %v445_v5, %v444_v2  ;;  %v779_v53 = vld [vmem:[%s1990_s20] sm:$0x1f]  ;;  %s407_s21 = sadd.s32 1, %s1853_s21  }
 0x124   : >> { %427 = vst [vmem:[%s409_s25] sm:$0x1] %v426_v6  ;;  %v466_v9 = vadd.f32 %v465_v7, %v464_v4  ;;  %s1998_s25 = smov [#allocation13]  ;;  %v780_v54 = vld [vmem:[%s1992_s22] sm:$0x1f]  ;;  %p404_p5 = scmp.ge.s32.totalorder %s407_s21, 9  }
 0x125   : >> { %447 = vst [vmem:[%s429_s1] sm:$0x1] %v446_v8  ;;  %v781_v55 = vld [vmem:[%s1994_s23] sm:$0x1f]  ;;  %s549_s1 = smov [#allocation27]  ;;  %v308_v10 = vmov (%p404_p5), %v1936_v10  ;;  %v311_v11 = vmov (%p404_p5), %v1938_v11 }
 0x126   : >> { %467 = vst [vmem:[%s449_s26] sm:$0x1] %v466_v9  ;;  %v782_v57 = vld [vmem:[%s1998_s25] sm:$0x1f]  ;;  %s773_s26 = smov [#allocation27]  ;;  %v361_v10 = vmov (%p404_p5), %v1936_v10 }
 0x12b   : >> { %v471_v14 = vld [vmem:[%s470_s28] sm:$0xff]  ;;  %s577_s28 = smov [#allocation25] }
 0x12c   : >> { %v473_v12 = vld [vmem:[%s472_s27] sm:$0xff]  ;;  %v494_v27 = vand.u32 2147483647, %v471_v14  ;;  %s575_s27 = smov [#allocation24] }
 0x12d   : >> { %v477_v13 = vmul.f32 2.0, %v473_v12  ;;  %v475_v15 = vld [vmem:[%s474_s29] sm:$0xff]  ;;  %v495_v32 = vand.u32 2147483647, %v473_v12  ;;  %s2014_s29 = smov [#allocation8] }
 0x12e   : >> { %v476_v16 = vsub.f32 %v475_v15, %v471_v14  ;;  %v496_v28 = vand.u32 2147483647, %v475_v15 }
 0x12f   : >> { %1593 = vrcp.f32 %v477_v13 }
 0x130   : >> { %v497_v31 = vmin.f32 %v494_v27, %v496_v28 }
 0x132   : >> { %v498_v33 = vmul.f32 1.1920929e-08, %v497_v31 }
 0x134   : >> { %vm499_vm11 = vcmp.le.f32.partialorder %v495_v32, %v498_v33 }
 0x139   : >> { %v1594_v17 = vpop.eup %1593 }
 0x13a   : >> { %v479_v18 = vmul.f32 %v1594_v17, %v476_v16 }
 0x13c   : >> { %v481_v19 = vmul.f32 %v479_v18, %v479_v18  ;;  %vm480_vm10 = vcmp.ge.f32.partialorder %v479_v18, 0.0 }
 0x13e   : >> { %v482_v20 = vadd.f32 1.0, %v481_v19 }
 0x140   : >> { %1595 = vrsqrt.f32 %v482_v20  ;;  %vm485_vm8 = vcmp.eq.f32.partialorder %v482_v20, inf  ;;  %v488_v22 = vand.u32 2147483648, %v482_v20  ;;  %vm487_vm9 = vcmp.eq.f32.partialorder %v482_v20, 0.0 }
 0x14a   : >> { %v1596_v21 = vpop.eup %1595 }
 0x14b   : >> { %v484_v23 = vmul.f32 %v1596_v21, %v482_v20 }
 0x14d   : >> { %v486_v24 = vsel %vm485_vm8, %v482_v20, %v484_v23  ;;  %vm323_vm8 = vcmp.eq.s32.totalorder (%p404_p5), %v311_v11, %v308_v10  ;;  %v364_v11 = vmov (%p404_p5), %v1938_v11  ;;  %v327_v10 = vmov (%p404_p5), %v1936_v10 }
 0x14e   : >> { %v489_v25 = vsel %vm487_vm9, %v488_v22, %v486_v24  ;;  %v330_v11 = vmov (%p404_p5), %v1938_v11  ;;  %v344_v10 = vmov (%p404_p5), %v1936_v10  ;;  %vm376_vm9 = vcmp.eq.s32.totalorder (%p404_p5), %v364_v11, %v361_v10 }
 0x14f   : >> { %v490_v26 = vxor.u32 2147483648, %v489_v25  ;;  %v347_v11 = vmov (%p404_p5), %v1938_v11 }
 0x151   : >> { %v491_v29 = vsel %vm480_vm10, %v489_v25, %v490_v26 }
 0x152   : >> { %v492_v30 = vadd.f32 %v491_v29, %v479_v18 }
 0x154   : >> { %1597 = vrcp.f32 %v492_v30 }
 0x15e   : >> { %v1598_v34 = vpop.eup %1597 }
 0x15f   : >> { %v500_v35 = vsel %vm499_vm11, 0.0, %v1598_v34 }
 0x160   : >> { %v501_v36 = vmul.f32 %v500_v35, %v500_v35  ;;  %v505_v37 = vmul.f32 %v500_v35, %v473_v12 }
 0x162   : >> { %v502_v38 = vadd.f32 1.0, %v501_v36  ;;  %v506_v39 = vsub.f32 %v471_v14, %v505_v37  ;;  %v508_v40 = vadd.f32 %v505_v37, %v475_v15 }
 0x164   : >> { %1599 = vrsqrt.f32 %v502_v38  ;;  %510 = vst [vmem:[%s509_s30] sm:$0xff] %v506_v39  ;;  %512 = vst [vmem:[%s511_s2] sm:$0xff] %v508_v40  ;;  %s2016_s30 = smov [#allocation17]  ;;  %s2018_s2 = smov [#allocation18] }
 0x16e   : >> { %v1600_v41 = vpop.eup %1599 }
 0x16f   : >> { %514 = vst [vmem:[%s513_s10] sm:$0xff] %v1600_v41  ;;  %v504_v42 = vmul.f32 %v1600_v41, %v500_v35  ;;  %s2020_s10 = smov [#allocation15] }
 0x171   : >> { %516 = vst [vmem:[%s515_s11] sm:$0xff] %v504_v42  ;;  %s2022_s11 = smov [#allocation12] }
 0x176   : >> { %v518_v43 = vld [vmem:[%s517_s12] ss:$0 sm:$0xff]  ;;  %s2024_s12 = smov [#allocation10] }
 0x177   : >> { %v527_v44 = vsel %vm526_vm12, %v518_v43, 0.0  ;;  %v576_v23 = vld [vmem:[%s575_s27] ss:$0 sm:$0xff]  ;;  %s747_s27 = smov [#allocation16] }
 0x178   : >> { %528 = vadd.xlane.f32.xlu0 %v527_v44  ;;  %v533_v45 = vld [vmem:[%s532_s3] ss:$0 sm:$0xff]  ;;  %s2028_s3 = smov [#allocation13] }
 0x179   : >> { %v542_v46 = vsel %vm541_vm13, %v533_v45, 0.0  ;;  %v578_v24 = vld [vmem:[%s577_s28] ss:$0 sm:$0xff]  ;;  %s724_s28 = smov [#allocation17] }
 0x17c   : >> { %543 = vadd.xlane.f32.xlu0 %v542_v46 }
 0x205   : >> { %v529_v47 = vpop.xlane.xlu0 %528 }
 0x206   : >> { %531 = vst [vmem:[%s530_s13] sm:$0xff] %v529_v47  ;;  %s2030_s13 = smov [#allocation16] }
 0x209   : >> { %v544_v48 = vpop.xlane.xlu0 %543 }
 0x20a   : >> { %546 = vst [vmem:[%s545_s16] sm:$0xff] %v544_v48  ;;  %s644_s16 = smov [#allocation18] }
 0x20d   : >> { %v548_v56 = vld [vmem:[%s547_s14] sm:$0xff]  ;;  %s645_s14 = smov [#allocation23] }
 0x20e   : >> { %v772_v58 = vld [vmem:[%s771_s24] sm:$0xff]  ;;  %v559_v59 = vmul.f32 %v555_v49, %v548_v56  ;;  %v562_v60 = vmul.f32 %v556_v50, %v548_v56  ;;  %v566_v61 = vmul.f32 %v557_v51, %v548_v56  ;;  %v569_v62 = vmul.f32 %v558_v52, %v548_v56  ;;  %s660_s24 = smov [#allocation16] }
 0x20f   : >> { %v783_v63 = vmul.f32 %v779_v53, %v772_v58  ;;  %v786_v0 = vmul.f32 %v780_v54, %v772_v58  ;;  %v790_v1 = vmul.f32 %v781_v55, %v772_v58  ;;  %v793_v2 = vmul.f32 %v782_v57, %v772_v58 }
 0x211   : >> { %v550_v3 = vld [vmem:[%s549_s1] sm:$0xff]  ;;  %s2075_s1 = smov [#allocation18] }
 0x212   : >> { %v774_v4 = vld [vmem:[%s773_s26] sm:$0xff]  ;;  %v560_v5 = vmul.f32 %v557_v51, %v550_v3  ;;  %v563_v6 = vmul.f32 %v558_v52, %v550_v3  ;;  %v565_v7 = vmul.f32 %v555_v49, %v550_v3  ;;  %v568_v8 = vmul.f32 %v556_v50, %v550_v3  ;;  %s723_s26 = smov [#allocation15] }
 0x213   : >> { %v784_v9 = vmul.f32 %v781_v55, %v774_v4  ;;  %v787_v12 = vmul.f32 %v782_v57, %v774_v4  ;;  %v789_v13 = vmul.f32 %v779_v53, %v774_v4  ;;  %v792_v14 = vmul.f32 %v780_v54, %v774_v4  ;;  %v652_v55 = vld [vmem:[%s645_s14] ss:$0 sm:$0xff] }
 0x214   : >> { %v561_v15 = vsub.f32 %v559_v59, %v560_v5  ;;  %v564_v16 = vsub.f32 %v562_v60, %v563_v6  ;;  %v567_v17 = vadd.f32 %v566_v61, %v565_v7  ;;  %v570_v18 = vadd.f32 %v569_v62, %v568_v8 }
 0x215   : >> { %v785_v19 = vsub.f32 %v783_v63, %v784_v9  ;;  %v788_v20 = vsub.f32 %v786_v0, %v787_v12  ;;  %v791_v21 = vadd.f32 %v790_v1, %v789_v13  ;;  %v794_v22 = vadd.f32 %v793_v2, %v792_v14 }
 0x216   : >> { %572 = vst [vmem:[%s1984_s17] sm:$0x1f] %v564_v16  ;;  %574 = vst [vmem:[%s1988_s19] sm:$0x1f] %v570_v18  ;;  %s604_s17 = smov [#allocation22]  ;;  %s618_s19 = smov [#allocation16] }
 0x217   : >> { %571 = vst [vmem:[%s1982_s15] sm:$0x1f] %v561_v15  ;;  %573 = vst [vmem:[%s1986_s18] sm:$0x1f] %v567_v17  ;;  %s631_s15 = smov [#allocation17]  ;;  %s603_s18 = smov [#allocation15]  ;;  %v611_v59 = vld [vmem:[%s604_s17] ss:$0 sm:$0xff] }
 0x218   : >> { %795 = vst [vmem:[%s1990_s20] sm:$0x1f] %v785_v19  ;;  %796 = vst [vmem:[%s1992_s22] sm:$0x1f] %v788_v20  ;;  %s2072_s20 = smov [#allocation17]  ;;  %s1856_s22 = smov 1  }
 0x219   : >> { %797 = vst [vmem:[%s1994_s23] sm:$0x1f] %v791_v21  ;;  %798 = vst [vmem:[%s1998_s25] sm:$0x1f] %v794_v22  ;;  %s659_s23 = smov [#allocation15]  ;;  %s1857_s25 = smov 127  }
 0x21d   : >> { %v586_v26 = vld [vmem:[%s2018_s2] sm:$0x1f] }
 0x21e   : >> { %v585_v25 = vld [vmem:[%s2016_s30] sm:$0x1f]  ;;  %v594_v32 = vmul.f32 %v586_v26, %v578_v24  ;;  %v597_v38 = vmul.f32 %v586_v26, %v576_v23 }
 0x21f   : >> { %v583_v27 = vld [vmem:[%s2020_s10] sm:$0x1f]  ;;  %v593_v31 = vmul.f32 %v585_v25, %v576_v23  ;;  %v596_v33 = vmul.f32 %v585_v25, %v578_v24 }
 0x220   : >> { %v801_v28 = vld [vmem:[%s2014_s29] ss:$0 sm:$0xff]  ;;  %v1325_v30 = vld [vmem:[%s2014_s29 + $0x4] ss:$0 sm:$0xff]  ;;  %v587_v44 = vmul.f32 %v583_v27, %v576_v23  ;;  %v590_v45 = vmul.f32 %v583_v27, %v578_v24 }
 0x221   : >> { %v1324_v29 = vld [vmem:[%s2014_s29 - $0x1] sm:$0x1e]  ;;  %v1329_v41 = vld [vmem:[%s2024_s12 + $0x4] ss:$0 sm:$0xff]  ;;  %v595_v43 = vsub.f32 %v593_v31, %v594_v32  ;;  %v598_v49 = vadd.f32 %v597_v38, %v596_v33 }
 0x222   : >> { %v808_v34 = vsel %vm731_vm14, %v801_v28, %v1324_v29  ;;  %v812_v35 = vld [vmem:[%s2022_s11] ss:$0 sm:$0xff]  ;;  %v1327_v36 = vld [vmem:[%s2022_s11 + $0x1] sm:$0xf] }
 0x223   : >> { %v825_v37 = vld [vmem:[%s2024_s12] ss:$0 sm:$0xff]  ;;  %811 = vst [vmem:[%s2014_s29] sm:$0x1f] %v808_v34  ;;  %v820_v39 = vsel %vm743_vm15, %v1325_v30, %v1327_v36  ;;  %v1331_v47 = vld [vmem:[%s2028_s3 + $0x1] sm:$0xf]  ;;  %601 = vst [vmem:[%s2016_s30] sm:$0x1f] %v595_v43 }
 0x224   : >> { %v1328_v40 = vld [vmem:[%s2024_s12 - $0x1] sm:$0x1e]  ;;  %1326 = vst [vmem:[%s2014_s29 + $0x1] sm:$0x1] %v812_v35  ;;  %822 = vst [vmem:[%s2022_s11] sm:$0x1f] %v820_v39  ;;  %v844_v50 = vsel %vm743_vm15, %v1329_v41, %v1331_v47  ;;  %s748_s29 = smov [#allocation18] }
 0x225   : >> { %v836_v42 = vld [vmem:[%s2028_s3] ss:$0 sm:$0xff]  ;;  %v832_v46 = vsel %vm731_vm14, %v825_v37, %v1328_v40  ;;  %602 = vst [vmem:[%s2018_s2] sm:$0x1f] %v598_v49  ;;  %s847_s30 = sadd.s32 (%p404_p5), 1, %s1849_s0   ;;  %s312_s2 = smov (%p404_p5), [#allocation15] }
 0x226   : >> { %v584_v48 = vld [vmem:[%s2030_s13] sm:$0x1f]  ;;  %835 = vst [vmem:[%s2024_s12] sm:$0x1f] %v832_v46  ;;  %846 = vst [vmem:[%s2028_s3] sm:$0x1f] %v844_v50  ;;  %s348_s11 = smov (%p404_p5), [#allocation17]  ;;  %p400_p6 = scmp.ge.s32.totalorder (%p404_p5), %s847_s30, 15 }
 0x227   : >> { %v588_v51 = vmul.f32 %v584_v48, %v578_v24  ;;  %v591_v52 = vmul.f32 %v584_v48, %v576_v23  ;;  %1330 = vst [vmem:[%s2024_s12 + $0x1] sm:$0x1] %v836_v42  ;;  %s365_s12 = smov (%p404_p5), [#allocation18]  ;;  %s2201_s0 = smov (%p404_p5), %s847_s30 }
 0x229   : >> { %v589_v53 = vsub.f32 %v587_v44, %v588_v51  ;;  %v592_v54 = vadd.f32 %v591_v52, %v590_v45 }
 0x22a   : >> { %v638_v56 = vld [vmem:[%s631_s15] sm:$0x1f] }
 0x22b   : >> { %599 = vst [vmem:[%s2020_s10] sm:$0x1f] %v589_v53  ;;  %600 = vst [vmem:[%s2030_s13] sm:$0x1f] %v592_v54  ;;  %v642_v57 = vsel %vm641_vm0, 0.0, %v638_v56  ;;  %s331_s10 = smov (%p404_p5), [#allocation16] }
 0x22c   : >> { %v653_v58 = vld [vmem:[%s644_s16] sm:$0x1f]  ;;  %643 = vst [vmem:[%s631_s15] sm:$0x1f] %v642_v57 }
 0x22d   : >> { %v657_v60 = vsel %vm656_vm1, %v652_v55, %v653_v58 }
 0x22e   : >> { %658 = vst [vmem:[%s644_s16] sm:$0x1f] %v657_v60 }
 0x232   : >> { %v612_v61 = vld [vmem:[%s603_s18] sm:$0x1f] }
 0x233   : >> { %v625_v62 = vld [vmem:[%s618_s19] sm:$0x1f]  ;;  %v616_v63 = vsel %vm615_vm3, %v611_v59, %v612_v61 }
 0x234   : >> { %v629_v0 = vsel %vm628_vm4, 0.0, %v625_v62  ;;  %617 = vst [vmem:[%s603_s18] sm:$0x1f] %v616_v63  ;;  %v697_v1 = vld [vmem:[%s2072_s20] sm:$0x1f] }
 0x235   : >> { %630 = vst [vmem:[%s618_s19] sm:$0x1f] %v629_v0  ;;  %698 = vrot.lane.b32.xlu0 %v697_v1, %s1856_s22  ;;  %v693_v5 = vld [vmem:[%s2075_s1] sm:$0x1f] }
 0x236   : >> { %v714_v6 = vld [vmem:[%s2075_s1] sm:$0x1f] }
 0x237   : >> { %v696_v26 = vld [vmem:[%s2072_s20] sm:$0x1f] }
 0x23b   : >> { %v665_v2 = vld [vmem:[%s659_s23] sm:$0x1f] }
 0x23c   : >> { %666 = vrot.lane.b32.xlu1 %v665_v2, %s1856_s22  ;;  %v661_v3 = vld [vmem:[%s660_s24] sm:$0x1f] }
 0x23d   : >> { %v682_v4 = vld [vmem:[%s660_s24] sm:$0x1f] }
 0x23e   : >> { %v664_v14 = vld [vmem:[%s659_s23] sm:$0x1f] }
 0x240   : >> { %662 = vrot.lane.b32.xlu1 %v661_v3, %s1856_s22 }
 0x244   : >> { %683 = vrot.lane.b32.xlu1 %v682_v4, %s1857_s25 }
 0x248   : >> { %694 = vrot.lane.b32.xlu1 %v693_v5, %s1856_s22 }
 0x24c   : >> { %715 = vrot.lane.b32.xlu1 %v714_v6, %s1857_s25 }
 0x2a7   : >> { %v699_v16 = vpop.permute.xlu0 %698 }
 0x2a8   : >> { %v703_v18 = vsel %vm670_vm5, %v697_v1, %v699_v16 }
 0x2ae   : >> { %v667_v7 = vpop.permute.xlu1 %666 }
 0x2af   : >> { %v671_v8 = vsel %vm670_vm5, %v665_v2, %v667_v7 }
 0x2b2   : >> { %v663_v9 = vpop.permute.xlu1 %662 }
 0x2b3   : >> { %v675_v12 = vsel %vm674_vm6, %v663_v9, %v671_v8 }
 0x2b4   : >> { %v681_v13 = vsel %vm1183_vm2, %v675_v12, 0.0 }
 0x2b5   : >> { %689 = vst [vmem:[%s659_s23] sm:$0x1f] %v681_v13 }
 0x2b6   : >> { %v684_v15 = vpop.permute.xlu1 %683 }
 0x2b7   : >> { %v688_v17 = vsel %vm687_vm7, %v664_v14, %v684_v15 }
 0x2b8   : >> { %690 = vst [vmem:[%s660_s24] sm:$0x1f] %v688_v17 }
 0x2ba   : >> { %v695_v19 = vpop.permute.xlu1 %694 }
 0x2bb   : >> { %v707_v20 = vsel %vm674_vm6, %v695_v19, %v703_v18 }
 0x2bc   : >> { %v725_v21 = vld [vmem:[%s723_s26] ss:$0 sm:$0xff]  ;;  %v1317_v23 = vld [vmem:[%s723_s26 + $0x4] ss:$0 sm:$0xff]  ;;  %v713_v25 = vsel %vm1183_vm2, %v707_v20, 0.0 }
 0x2bd   : >> { %v1316_v22 = vld [vmem:[%s723_s26 - $0x1] sm:$0x1e]  ;;  %721 = vst [vmem:[%s2072_s20] sm:$0x1f] %v713_v25 }
 0x2be   : >> { %v732_v24 = vsel %vm731_vm14, %v725_v21, %v1316_v22  ;;  %v716_v27 = vpop.permute.xlu1 %715 }
 0x2bf   : >> { %735 = vst [vmem:[%s723_s26] sm:$0x1f] %v732_v24  ;;  %v749_v28 = vld [vmem:[%s747_s27] ss:$0 sm:$0xff]  ;;  %v1321_v30 = vld [vmem:[%s747_s27 + $0x4] ss:$0 sm:$0xff]  ;;  %v720_v31 = vsel %vm687_vm7, %v696_v26, %v716_v27 }
 0x2c0   : >> { %v1320_v29 = vld [vmem:[%s747_s27 - $0x1] sm:$0x1e]  ;;  %722 = vst [vmem:[%s2075_s1] sm:$0x1f] %v720_v31 }
 0x2c1   : >> { %v756_v32 = vsel %vm731_vm14, %v749_v28, %v1320_v29 }
 0x2c2   : >> { %759 = vst [vmem:[%s747_s27] sm:$0x1f] %v756_v32 }
 0x2c4   : >> { %v736_v33 = vld [vmem:[%s724_s28] ss:$0 sm:$0xff]  ;;  %v1319_v34 = vld [vmem:[%s724_s28 + $0x1] sm:$0xf] }
 0x2c5   : >> { %1318 = vst [vmem:[%s723_s26 + $0x1] sm:$0x1] %v736_v33  ;;  %v744_v35 = vsel %vm743_vm15, %v1317_v23, %v1319_v34  ;;  %406 = sbr.rel (!%p404_p5) target bundleno = 277 (0x115), region = 319 }
 0x2c6   : >> { %746 = vst [vmem:[%s724_s28] sm:$0x1f] %v744_v35 }
 0x2c7   : >> { %v760_v36 = vld [vmem:[%s748_s29] ss:$0 sm:$0xff]  ;;  %v1323_v37 = vld [vmem:[%s748_s29 + $0x1] sm:$0xf] }
 0x2c8   : >> { %1322 = vst [vmem:[%s747_s27 + $0x1] sm:$0x1] %v760_v36  ;;  %v768_v38 = vsel %vm743_vm15, %v1321_v30, %v1323_v37 }
 0x2c9   : >> { %770 = vst [vmem:[%s748_s29] sm:$0x1f] %v768_v38 }
 0x2cc   : > { %v318_v39 = vld [vmem:[%s312_s2] sm:$0x1f] }
 0x2cd   : > { %v319_v41 = vsel %vm1183_vm2, %v318_v39, 0.0  ;;  %v354_v43 = vld [vmem:[%s348_s11] sm:$0x1f] }
 0x2ce   : > { %v320_v45 = vmul.f32 %v319_v41, %v319_v41  ;;  %v355_v47 = vsel %vm1183_vm2, %v354_v43, 0.0 }
 0x2cf   : > { %v337_v40 = vld [vmem:[%s331_s10] sm:$0x1f]  ;;  %v356_v49 = vmul.f32 %v355_v47, %v355_v47 }
 0x2d0   : > { %v338_v42 = vsel %vm1183_vm2, %v337_v40, 0.0  ;;  %v371_v44 = vld [vmem:[%s365_s12] sm:$0x1f]  ;;  %v324_v52 = vsel %vm323_vm8, 0.0, %v320_v45 }
 0x2d1   : > { %v339_v46 = vmul.f32 %v338_v42, %v338_v42  ;;  %v372_v48 = vsel %vm1183_vm2, %v371_v44, 0.0 }
 0x2d2   : > { %v373_v51 = vmul.f32 %v372_v48, %v372_v48 }
 0x2d3   : > { %v341_v50 = vadd.f32 %v339_v46, %v320_v45  ;;  %v340_v53 = vadd.f32 %v339_v46, %v324_v52 }
 0x2d4   : > { %v377_v56 = vsel %vm376_vm9, 0.0, %v373_v51 }
 0x2d5   : > { %v358_v54 = vadd.f32 %v356_v49, %v341_v50  ;;  %v357_v55 = vadd.f32 %v356_v49, %v340_v53 }
 0x2d7   : > { %v379_v57 = vadd.f32 %v373_v51, %v358_v54  ;;  %v378_v58 = vadd.f32 %v377_v56, %v357_v55 }
 0x2d9   : > { %380 = vadd.xlane.f32.xlu0 %v379_v57 }
 0x2dd   : > { %388 = vadd.xlane.f32.xlu0 %v378_v58 }
 0x366   : > { %v381_v59 = vpop.xlane.xlu0 %380 }
 0x367   : > { %v382_v60 = vrot.slane %v381_v59, 4 }
 0x369   : > { %v383_v61 = vadd.f32 %v382_v60, %v381_v59 }
 0x36a   : > { %v389_v62 = vpop.xlane.xlu0 %388 }
 0x36b   : > { %v384_v63 = vrot.slane %v383_v61, 2  ;;  %v390_v0 = vrot.slane %v389_v62, 4 }
 0x36d   : > { %v391_v1 = vadd.f32 %v390_v0, %v389_v62  ;;  %v385_v2 = vadd.f32 %v384_v63, %v383_v61 }
 0x36f   : > { %v392_v3 = vrot.slane %v391_v1, 2  ;;  %v386_v5 = vrot.slane %v385_v2, 1 }
 0x371   : > { %v393_v4 = vadd.f32 %v392_v3, %v391_v1  ;;  %v387_v8 = vadd.f32 %v386_v5, %v385_v2 }
 0x373   : > { %v394_v6 = vrot.slane %v393_v4, 1 }
 0x375   : > { %v395_v7 = vadd.f32 %v394_v6, %v393_v4 }
 0x377   : > { %1342 = vpush %v395_v7 }
 0x378   : > { %1344 = vpush %v387_v8 }
 0x3a8   : > { %s1343_s21 = spop %1342 }
 0x3a9   : > { %s1345_s3 = spop %1344 }
 0x3aa   : > { %s398_s13 = smul.f32 1e-10, %s1345_s3 }
 0x3ac   : > { %p399_p7 = scmp.le.f32.partialorder %s1343_s21, %s398_s13 }
 0x3ae   : > { %p401_p8 = por %p400_p6, %p399_p7 }
 0x3b0   :  { %849 = sbr.rel (!%p401_p8) target bundleno = 276 (0x114), region = 330 }
 0x3b7 PF:  { %s850_s14 = smov [#allocation15]  ;;  %v854_v10 = vmov %v1936_v10  ;;  %v857_v11 = vmov %v1938_v11  ;;  %s1858_s15 = smov [#allocation10]  }
 0x3b8   :  { %v874_v10 = vmov %v1936_v10  ;;  %v877_v11 = vmov %v1938_v11  ;;  %s1040_s16 = sshll.u32 %s1858_s15, 4  ;;  %v858_v9 = vld [vmem:[%s850_s14] sm:$0x1f]  ;;  %vm861_vm10 = vcmp.eq.s32.totalorder %v857_v11, %v854_v10  ;;  %s870_s0 = smov [#allocation18]  ;;  %s1041_s16 = int_to_ptr.vmem [resolvable:$true] %s1040_s16 }
 0x3b9   :  { %vm881_vm11 = vcmp.eq.s32.totalorder %v877_v11, %v874_v10  ;;  %v862_v12 = vsel %vm861_vm10, %v858_v9, 0.0  ;;  %s1601_s17 = scalar_lea.vmem %s1041_s16, 128  ;;  %p1606_p10 = scmp.lt.s32.totalorder %s1041_s16, %s1041_s16 }
 0x3ba   :  { %p1602_p9 = scmp.ne.s32.totalorder %s1041_s16, %s1601_s17  ;;  %p1607_p11 = scmp.lt.s32.totalorder %s1601_s17, %s1601_s17 }
 0x3bc   :  { %p1608_p12 = por %p1607_p11, %p1606_p10 }
 0x3be   :  { %p1609_p13 = pnand %p1608_p12, %p1602_p9 }
 0x3c0   :  { %1612 = shalt.err (!%p1609_p13)
}
 0x3c1   :  { %s1613_s20 = scalar_lea.hbm %s2198_s7, 128 }
 0x3c2   :  { %p1614_p0 = scmp.ne.s32.totalorder %s2198_s7, %s1613_s20  ;;  %p1617_p1 = scmp.lt.u32.totalorder %s1613_s20, %s2198_s7 }
 0x3c4   :  { %p1619_p2 = pnand %p1617_p1, %p1614_p0 }
 0x3c6   :  { %1622 = shalt.err (!%p1619_p2)
}
 0x3c7   :  { %1043 = dma.vmem_to_hbm [thread:$0]  %s1041_s16, 128, %s2198_s7, [#allocation11]   ;;  %v863_v13 = vrot.slane %v862_v12, 4  ;;  %v878_v14 = vld [vmem:[%s870_s0] sm:$0x1f] }
 0x3c8   :  { %v882_v15 = vsel %vm881_vm11, %v878_v14, 0.0  ;;  %s1859_s27 = smov [#allocation8]   ;;  %s1860_s29 = smov [#allocation12]  }
 0x3c9   :  { %v864_v16 = vadd.f32 %v863_v13, %v862_v12  ;;  %v883_v17 = vrot.slane %v882_v15, 4  ;;  %s1033_s28 = sshll.u32 %s1859_s27, 4  ;;  %s1047_s30 = sshll.u32 %s1860_s29, 4  ;;  %s1034_s28 = int_to_ptr.vmem [resolvable:$true] %s1033_s28  ;;  %s1048_s30 = int_to_ptr.vmem [resolvable:$true] %s1047_s30 }
 0x3ca   :  { %s1623_s2 = scalar_lea.vmem %s1034_s28, 128  ;;  %p1628_p4 = scmp.lt.s32.totalorder %s1034_s28, %s1034_s28 }
 0x3cb   :  { %v865_v18 = vrot.slane %v864_v16, 2  ;;  %v884_v19 = vadd.f32 %v883_v17, %v882_v15  ;;  %p1624_p3 = scmp.ne.s32.totalorder %s1034_s28, %s1623_s2  ;;  %p1629_p5 = scmp.lt.s32.totalorder %s1623_s2, %s1623_s2 }
 0x3cd   :  { %p1630_p6 = por %p1629_p5, %p1628_p4 }
 0x3cf   :  { %p1631_p7 = pnand %p1630_p6, %p1624_p3 }
 0x3d1   :  { %1634 = shalt.err (!%p1631_p7)
}
 0x3d2   :  { %s1635_s11 = scalar_lea.hbm %s2197_s6, 128 }
 0x3d3   :  { %p1636_p8 = scmp.ne.s32.totalorder %s2197_s6, %s1635_s11  ;;  %p1639_p9 = scmp.lt.u32.totalorder %s1635_s11, %s2197_s6 }
 0x3d5   :  { %p1641_p10 = pnand %p1639_p9, %p1636_p8 }
 0x3d7   :  { %1644 = shalt.err (!%p1641_p10)
}
 0x3d8   :  { %1036 = dma.vmem_to_hbm [thread:$0]  %s1034_s28, 128, %s2197_s6, [#allocation9]   ;;  %v866_v10 = vadd.f32 %v865_v18, %v864_v16  ;;  %v885_v11 = vrot.slane %v884_v19, 2 }
 0x3d9   :  { %s1645_s16 = scalar_lea.vmem %s1048_s30, 128  ;;  %p1650_p12 = scmp.lt.s32.totalorder %s1048_s30, %s1048_s30 }
 0x3da   :  { %p1646_p11 = scmp.ne.s32.totalorder %s1048_s30, %s1645_s16  ;;  %p1651_p13 = scmp.lt.s32.totalorder %s1645_s16, %s1645_s16 }
 0x3dc   :  { %p1652_p0 = por %p1651_p13, %p1650_p12 }
 0x3de   :  { %p1653_p1 = pnand %p1652_p0, %p1646_p11 }
 0x3e0   :  { %1656 = shalt.err (!%p1653_p1)
}
 0x3e1   :  { %s1657_s18 = scalar_lea.hbm %s2199_s8, 128 }
 0x3e2   :  { %p1658_p2 = scmp.ne.s32.totalorder %s2199_s8, %s1657_s18  ;;  %p1661_p3 = scmp.lt.u32.totalorder %s1657_s18, %s2199_s8 }
 0x3e4   :  { %p1663_p4 = pnand %p1661_p3, %p1658_p2 }
 0x3e6   :  { %1666 = shalt.err (!%p1663_p4)
}
 0x3e7   :  { %1050 = dma.vmem_to_hbm [thread:$0]  %s1048_s30, 128, %s2199_s8, [#allocation11]   ;;  %v867_v20 = vrot.slane %v866_v10, 1  ;;  %v886_v21 = vadd.f32 %v885_v11, %v884_v19 }
 0x3e8   :  { %s1861_s25 = smov [#allocation13]   ;;  %s851_s26 = smov [#allocation4] }
 0x3e9   :  { %s1054_s1 = sshll.u32 %s1861_s25, 4  ;;  %s1055_s1 = int_to_ptr.vmem [resolvable:$true] %s1054_s1 }
 0x3ea   :  { %s1667_s27 = scalar_lea.vmem %s1055_s1, 128  ;;  %p1672_p6 = scmp.lt.s32.totalorder %s1055_s1, %s1055_s1 }
 0x3eb   :  { %p1668_p5 = scmp.ne.s32.totalorder %s1055_s1, %s1667_s27  ;;  %p1673_p7 = scmp.lt.s32.totalorder %s1667_s27, %s1667_s27 }
 0x3ed   :  { %p1674_p8 = por %p1673_p7, %p1672_p6 }
 0x3ef   :  { %p1675_p9 = pnand %p1674_p8, %p1668_p5 }
 0x3f1   :  { %1678 = shalt.err (!%p1675_p9)
}
 0x3f2   :  { %s1679_s2 = scalar_lea.hbm %s2200_s9, 128 }
 0x3f3   :  { %p1680_p10 = scmp.ne.s32.totalorder %s2200_s9, %s1679_s2  ;;  %p1683_p11 = scmp.lt.u32.totalorder %s1679_s2, %s2200_s9 }
 0x3f5   :  { %p1685_p12 = pnand %p1683_p11, %p1680_p10 }
 0x3f7   :  { %1688 = shalt.err (!%p1685_p12)
}
 0x3f8   :  { %1057 = dma.vmem_to_hbm [thread:$0]  %s1055_s1, 128, %s2200_s9, [#allocation14]   ;;  %v868_v22 = vadd.f32 %v867_v20, %v866_v10  ;;  %v887_v23 = vrot.slane %v886_v21, 1 }
 0x3f9   :  { %s871_s21 = smov [#allocation6] }
 0x3fa   :  { %869 = vst [vmem:[%s851_s26] sm:$0x1] %v868_v22  ;;  %v888_v24 = vadd.f32 %v887_v23, %v886_v21 }
 0x3fc   :  { %889 = vst [vmem:[%s871_s21] sm:$0x1] %v888_v24 }
 0x401   :  { %v893_v25 = vld [vmem:[#allocation4] sm:$0x1] }
 0x402   :  { %895 = vst [vmem:[#allocation5] sm:$0x1] %v893_v25 }
 0x403   :  { %v899_v26 = vld [vmem:[#allocation6] sm:$0x1] }
 0x404   :  { %901 = vst [vmem:[#allocation7] sm:$0x1] %v899_v26 }
 0x409   :  { %v964_v27 = vld [vmem:[#allocation5] sm:$0x1] }
 0x40a   :  { %965 = vst [vmem:[%s2195_s4] sm:$0x1] %v964_v27 }
 0x40b   :  { %v1028_v28 = vld [vmem:[#allocation7] sm:$0x1] }
 0x40c   :  { %1029 = vst [vmem:[%s2196_s5] sm:$0x1] %v1028_v28 }
 0x40d   :  { %1809 = dma.done.wait [#allocation9], 128  }
 0x40e   :  { %1810 = vsyncadd [#allocation9], 4294967168 }
 0x40f   :  { %1811 = dma.done.wait [#allocation11], 256  }
 0x410   :  { %1812 = vsyncadd [#allocation11], 4294967040 }
 0x411   :  { %1813 = dma.done.wait [#allocation14], 128  }
 0x412   :  { %1814 = vsyncadd [#allocation14], 4294967168 }
 0x413   :  { %1066 = vsyncpa [#allocation9], 1 }
 0x414   :  { %1067 = vsyncpa [#allocation11], 1 }
 0x415   :  { %1068 = vsyncpa [#allocation14], 1 }

// kernel: custom-call.66
= control target key start
LH: loop header
LB: loop body
LE: loop exit
PB: predicated region body
PF: predicated region fallthrough
CT: control target
= control target key end

     0   :  { %5 = vsyncpa [#allocation4], 0  ;;  %s878_s0 = inlined_call_operand.vmem [shape: f32[10,10], index: 0, kind: input, shape index: {}]   ;;  %s879_s1 = inlined_call_operand.vmem [shape: f32[10,10], index: 1, kind: output, shape index: {0}]   ;;  %s880_s2 = inlined_call_operand.hbm [shape: s32[10], index: 2, kind: output, shape index: {1}]   ;;  %s881_s3 = inlined_call_operand.vmem [shape: s32[10], index: 3, kind: output, shape index: {2}]  }
   0x1   :  { %s19_s14 = scalar_lea.vmem %s878_s0, 8 }
   0x2   :  { %p454_p0 = scmp.gt.s32.totalorder %s878_s0, %s19_s14 }
   0x3   :  { %s747_s17 = smov (!%p454_p0), [#allocation0]   ;;  %s751_s20 = smov (!%p454_p0), %s878_s0  }
   0x4   :  { %455 = sbr.rel (%p454_p0) target bundleno = 21 (0x15), region = 157 }
   0xb LB: > { %v53_v0 = vld [vmem:[%s753_s20] sm:$0xff]  ;;  %s55_s20 = scalar_lea.vmem %s753_s20, 8   ;;  %s753_s20 = sphi %s751_s20, %s55_s20   ;;  %s749_s17 = sphi %s747_s17, %s56_s17  }
   0xc   : > { %54 = vst [vmem:[%s749_s17] sm:$0xff] %v53_v0  ;;  %s56_s17 = scalar_lea.vmem %s749_s17, 8   ;;  %p50_p1 = scmp.gt.s32.totalorder %s55_s20, %s19_s14 }
   0xe   :  { %52 = sbr.rel (!%p50_p1) target bundleno = 11 (0xb), region = 163 }
  0x15 PF:  { %v68_v1 = vld [vmem:[#allocation0] sm:$0xff]  ;;  %v72_v2 = vld [vmem:[#allocation0 + $0x8] sm:$0xff]  ;;  %v75_v3 = vlaneseq  ;;  %v771_v4 = vmov 0   ;;  %s755_s0 = smov 0  }
  0x16   :  { %69 = vst [vmem:[#allocation1] sm:$0xff] %v68_v1  ;;  %73 = vst [vmem:[#allocation1 + $0x8] sm:$0xff] %v72_v2 }
  0x17   :  { %74 = vst [vmem:[#allocation2] sm:$0x1] %v771_v4  ;;  %v803_v5 = vshrl.u32 %v75_v3, 7 }
  0x18 LB: > { %s512_s21 = sshll.u32 %s757_s0, 3  ;;  %s83_s0 = sadd.s32 1, %s757_s0   ;;  %s757_s0 = sphi %s755_s0, %s83_s0  }
  0x19   : > { %v87_v6 = vstv %s512_s21  ;;  %s85_s22 = scalar_lea.vmem [#allocation7], %s512_s21  ;;  %p80_p2 = scmp.ge.s32.totalorder %s83_s0, 2  }
  0x1a   : > { %v88_v7 = vadd.s32 %v87_v6, %v803_v5  ;;  %s806_s23 = smov (%p80_p2), 0  }
  0x1b   :  { %82 = sbr.rel (!%p80_p2) target bundleno = 24 (0x18), region = 174 }
  0x1c   : > { %89 = vst [vmem:[%s85_s22] sm:$0xff] %v88_v7 }
  0x22 LB: > { %v100_v8 = vld [vmem:[#allocation1] sm:$0xff]  ;;  %v112_v9 = vld [vmem:[#allocation1 + $0x8] sm:$0xff]  ;;  %v812_v10 = vadd.s32 8, %v803_v5  ;;  %v815_v12 = vstv %s761_s23  ;;  %s158_s24 = ssub.s32 128, %s761_s23  ;;  %v164_v45 = vand.u32 127, %v75_v3  ;;  %s170_s25 = scalar_lea.vmem [#allocation1], %s761_s23  ;;  %s761_s23 = sphi %s806_s23, %s95_s23  }
  0x23   : > { %v101_v11 = vand.u32 2147483647, %v100_v8  ;;  %v113_v13 = vand.u32 2147483647, %v112_v9  ;;  %vm104_vm1 = vcmp.ge.s32.totalorder %v803_v5, %v815_v12  ;;  %v167_v48 = vld [vmem:[#allocation2] ss:$0 sm:$0xff] }
  0x24   : > { %vm117_vm0 = vcmp.lt.s32.totalorder %v812_v10, 10  ;;  %vm116_vm3 = vcmp.ge.s32.totalorder %v812_v10, %v815_v12  ;;  %vm188_vm15 = vcmp.gt.s32.totalorder %v164_v45, %v815_v12  ;;  %v172_v49 = vld [vmem:[%s170_s25] ss:$0 sm:$0xff]  ;;  %s176_s27 = scalar_lea.vmem [#allocation7], %s761_s23  ;;  %s95_s23 = sadd.s32 1, %s761_s23  }
  0x25   : > { %vm514_vm2 = vcmp.gt.f32.partialorder %v101_v11, -inf  ;;  %vm118_vm5 = vmand %vm116_vm3, %vm117_vm0  ;;  %vm211_vm0 = vcmp.gt.s32.totalorder %v812_v10, %v815_v12  ;;  %v178_v50 = vld [vmem:[%s176_s27] ss:$0 sm:$0xff]  ;;  %p92_p3 = scmp.ge.s32.totalorder %s95_s23, 10  }
  0x26   : > { %vm108_vm4 = vmand %vm104_vm1, %vm514_vm2  ;;  %vm165_vm1 = vcmp.eq.s32.totalorder %v164_v45, %v815_v12  ;;  %s763_s5 = smov (%p92_p3), %s879_s1   ;;  %s767_s6 = smov (%p92_p3), [#allocation1]  }
  0x27   : > { %v109_v14 = vsel %vm108_vm4, %v803_v5, %v815_v12  ;;  %v110_v15 = vsel %vm108_vm4, %v101_v11, -inf  ;;  %vm836_vm2 = vmand %vm211_vm0, %vm165_vm1  ;;  %vm196_vm4 = vcmp.gt.s32.totalorder %v803_v5, %v815_v12 }
  0x28   : > { %vm119_vm6 = vcmp.lt.f32.partialorder %v110_v15, %v113_v13 }
  0x29   : > { %vm120_vm7 = vmand %vm118_vm5, %vm119_vm6 }
  0x2a   : > { %v121_v16 = vsel %vm120_vm7, %v812_v10, %v109_v14  ;;  %v122_v17 = vsel %vm120_vm7, %v113_v13, %v110_v15  ;;  %vm200_vm6 = vmand %vm196_vm4, %vm165_vm1 }
  0x2b   : > { %v123_v18 = vrot.slane %v122_v17, 1  ;;  %v124_v19 = vrot.slane %v121_v16, 1 }
  0x2d   : > { %vm125_vm8 = vcmp.ge.f32.partialorder %v123_v18, %v122_v17  ;;  %v128_v20 = vrot.slane %v123_v18, 1  ;;  %v129_v21 = vrot.slane %v124_v19, 1 }
  0x2e   : > { %v126_v22 = vsel %vm125_vm8, %v123_v18, %v122_v17  ;;  %v127_v23 = vsel %vm125_vm8, %v124_v19, %v121_v16 }
  0x2f   : > { %vm130_vm9 = vcmp.ge.f32.partialorder %v128_v20, %v126_v22  ;;  %v133_v24 = vrot.slane %v128_v20, 1  ;;  %v134_v25 = vrot.slane %v129_v21, 1 }
  0x30   : > { %v131_v26 = vsel %vm130_vm9, %v128_v20, %v126_v22  ;;  %v132_v27 = vsel %vm130_vm9, %v129_v21, %v127_v23 }
  0x31   : > { %vm135_vm10 = vcmp.ge.f32.partialorder %v133_v24, %v131_v26  ;;  %v138_v28 = vrot.slane %v133_v24, 1  ;;  %v139_v29 = vrot.slane %v134_v25, 1 }
  0x32   : > { %v136_v30 = vsel %vm135_vm10, %v133_v24, %v131_v26  ;;  %v137_v31 = vsel %vm135_vm10, %v134_v25, %v132_v27 }
  0x33   : > { %vm140_vm11 = vcmp.ge.f32.partialorder %v138_v28, %v136_v30  ;;  %v143_v32 = vrot.slane %v138_v28, 1  ;;  %v144_v33 = vrot.slane %v139_v29, 1 }
  0x34   : > { %v141_v34 = vsel %vm140_vm11, %v138_v28, %v136_v30  ;;  %v142_v35 = vsel %vm140_vm11, %v139_v29, %v137_v31 }
  0x35   : > { %vm145_vm12 = vcmp.ge.f32.partialorder %v143_v32, %v141_v34  ;;  %v148_v36 = vrot.slane %v143_v32, 1  ;;  %v149_v37 = vrot.slane %v144_v33, 1 }
  0x36   : > { %v146_v38 = vsel %vm145_vm12, %v143_v32, %v141_v34  ;;  %v147_v39 = vsel %vm145_vm12, %v144_v33, %v142_v35 }
  0x37   : > { %vm150_vm13 = vcmp.ge.f32.partialorder %v148_v36, %v146_v38  ;;  %v153_v40 = vrot.slane %v148_v36, 1  ;;  %v154_v41 = vrot.slane %v149_v37, 1 }
  0x38   : > { %v151_v42 = vsel %vm150_vm13, %v148_v36, %v146_v38  ;;  %v152_v43 = vsel %vm150_vm13, %v149_v37, %v147_v39 }
  0x39   : > { %vm155_vm14 = vcmp.ge.f32.partialorder %v153_v40, %v151_v42 }
  0x3a   : > { %v157_v44 = vsel %vm155_vm14, %v154_v41, %v152_v43 }
  0x3b   : > { %159 = vrot.lane.b32.xlu0 %v157_v44, %s158_s24 }
  0xad   : > { %v160_v47 = vpop.permute.xlu0 %159 }
  0xae   : > { %522 = vpush %v160_v47 }
  0xdf   : > { %s523_s26 = spop %522 }
  0xe0   : > { %v166_v51 = vstv %s523_s26  ;;  %s171_s28 = scalar_lea.vmem [#allocation1], %s523_s26  ;;  %s177_s29 = scalar_lea.vmem [#allocation7], %s523_s26 }
  0xe1   : > { %v168_v52 = vsel %vm165_vm1, %v166_v51, %v167_v48  ;;  %v173_v53 = vld [vmem:[%s171_s28] ss:$0 sm:$0xff] }
  0xe2   : > { %v179_v54 = vld [vmem:[%s177_s29] ss:$0 sm:$0xff]  ;;  %169 = vst [vmem:[#allocation2] sm:$0x1] %v168_v52  ;;  %174 = vst [vmem:[%s171_s28] sm:$0x1] %v172_v49  ;;  %vm182_vm3 = vcmp.ne.f32.partialorder %v173_v53, 0.0 }
  0xe3   : > { %180 = vst [vmem:[%s177_s29] sm:$0x1] %v178_v50  ;;  %175 = vst [vmem:[%s170_s25] sm:$0x1] %v173_v53  ;;  %v189_v2 = vsel %vm188_vm15, %v173_v53, 0.0 }
  0xe4   : > { %181 = vst [vmem:[%s176_s27] sm:$0x1] %v179_v54  ;;  %vm183_vm5 = vmand %vm165_vm1, %vm182_vm3 }
  0xe5   : > { %v184_v55 = vsel %vm183_vm5, %v173_v53, 1.0 }
  0xe6   : > { %v212_v56 = vsel %vm211_vm0, %v184_v55, 1.0  ;;  %v197_v57 = vsel %vm196_vm4, %v184_v55, 1.0 }
  0xe7   : > { %655 = vrcp.f32 %v212_v56 }
  0xe8   : > { %657 = vrcp.f32 %v197_v57 }
  0xe9   :  { %v275_v12 = vld [vmem:[#allocation2] sm:$0x1] (%p92_p3) }
  0xea   : > { %v208_v59 = vld [vmem:[#allocation1 + $0x8] sm:$0xff]  ;;  %v193_v62 = vld [vmem:[#allocation1] sm:$0xff]  ;;  %277 = vst [vmem:[#allocation3] sm:$0x1] (%p92_p3), %v275_v12 }
  0xeb   :  { %v222_v11 = vld [vmem:[#allocation7] sm:$0xff] (%p92_p3)  ;;  %v224_v13 = vld [vmem:[#allocation7 + $0x8] sm:$0xff] (%p92_p3) }
  0xf1   : > { %v656_v58 = vpop.eup %655 }
  0xf2   : > { %v658_v60 = vpop.eup %657  ;;  %v214_v61 = vmul.f32 %v656_v58, %v208_v59 }
  0xf3   : > { %v199_v63 = vmul.f32 %v658_v60, %v193_v62 }
  0xf4   : > { %v216_v0 = vsel %vm836_vm2, %v214_v61, 0.0 }
  0xf5   : > { %217 = vadd.xlane.f32.xlu1 %v216_v0  ;;  %v201_v1 = vsel %vm200_vm6, %v199_v63, 0.0 }
  0xf6   : > { %202 = vadd.xlane.f32.xlu0 %v201_v1 }
 0x123   :  { %239 = vxpose.xlu0.b32.start [1/2] (short) (narrow) (%p92_p3), %v222_v11, 8 }
 0x127   :  { %240 = vxpose.xlu0.b32.end [2/2] (short) (narrow) (%p92_p3), %v224_v13, 8 }
 0x182   : > { %v218_v4 = vpop.xlane.xlu1 %217  ;;  %94 = sbr.rel (!%p92_p3) target bundleno = 34 (0x22), region = 185 }
 0x183   : > { %v219_v6 = vmul.f32 %v218_v4, %v189_v2  ;;  %v203_v7 = vpop.xlane.xlu0 %202 }
 0x184   : > { %v204_v8 = vmul.f32 %v203_v7, %v189_v2 }
 0x185   : > { %v220_v9 = vsub.f32 %v214_v61, %v219_v6 }
 0x186   : > { %v205_v10 = vsub.f32 %v199_v63, %v204_v8 }
 0x187   : > { %221 = vst [vmem:[#allocation1 + $0x8] sm:$0xff] %v220_v9 }
 0x188   : > { %206 = vst [vmem:[#allocation1] sm:$0xff] %v205_v10 }
 0x1a3   :  { %v255_v14 = vpop.trf.xlu0 }
 0x1a4   :  { %271 = vst [vmem:[#allocation5] sm:$0x1] %v255_v14 }
 0x1ab   :  { %v281_v15 = vld [vmem:[#allocation5] sm:$0x1] }
 0x1ac   :  { %283 = vst [vmem:[#allocation6] sm:$0x1] %v281_v15 }
 0x1ad LB: > { %v331_v16 = vld [vmem:[%s769_s6] sm:$0xff]  ;;  %s333_s6 = scalar_lea.vmem %s769_s6, 8   ;;  %s769_s6 = sphi %s767_s6, %s333_s6   ;;  %s765_s5 = sphi %s763_s5, %s334_s5  }
 0x1ae   : > { %332 = vst [vmem:[%s765_s5] sm:$0xff] %v331_v16  ;;  %s334_s5 = scalar_lea.vmem %s765_s5, 8   ;;  %p328_p4 = scmp.gt.s32.totalorder %s333_s6, [#allocation1 + $0x8] }
 0x1af   :  { %s772_s7 = smov (%p328_p4), [#allocation3]  }
 0x1b0   :  { %330 = sbr.rel (!%p328_p4) target bundleno = 429 (0x1ad), region = 207  ;;  %s351_s8 = sshll.u32 (%p328_p4), %s772_s7, 4  ;;  %s352_s8 = int_to_ptr.vmem [resolvable:$true] %s351_s8 }
 0x1b1   :  { %s659_s1 = scalar_lea.vmem (%p328_p4), %s352_s8, 16  ;;  %s663_s11 = scalar_lea.vmem (%p328_p4), %s352_s8, 32 }
 0x1b2   :  { %p660_p5 = scmp.ne.s32.totalorder (%p328_p4), %s352_s8, %s659_s1  ;;  %p664_p6 = scmp.lt.s32.totalorder (%p328_p4), %s352_s8, %s352_s8 }
 0x1b3   :  { %v417_v3 = vld [vmem:[#allocation6] sm:$0x1] (%p328_p4)  ;;  %p665_p7 = scmp.lt.s32.totalorder (%p328_p4), %s663_s11, %s659_s1 }
 0x1b4   :  { %418 = vst [vmem:[%s881_s3] sm:$0x1] (%p328_p4), %v417_v3 }
 0x1b5   :  { %p666_p8 = por (%p328_p4), %p665_p7, %p664_p6 }
 0x1b7   :  { %p667_p9 = pnand %p666_p8, %p660_p5 }
 0x1b9   :  { %670 = shalt.err (!%p667_p9)
}
 0x1ba   :  { %s671_s14 = scalar_lea.hbm %s880_s2, 16 }
 0x1bb   :  { %p672_p10 = scmp.ne.s32.totalorder %s880_s2, %s671_s14  ;;  %p675_p11 = scmp.lt.u32.totalorder %s671_s14, %s880_s2 }
 0x1bd   :  { %p677_p12 = pnand %p675_p11, %p672_p10 }
 0x1bf   :  { %680 = shalt.err (!%p677_p12)
}
 0x1c0   :  { %354 = dma.vmem_to_hbm [thread:$0]  %s352_s8, 16, %s880_s2, [#allocation4]  }
 0x1c1   :  { %745 = dma.done.wait [#allocation4], 16  }
 0x1c2   :  { %746 = vsyncadd [#allocation4], 4294967280 }
 0x1c3   :  { %424 = vsyncpa [#allocation4], 1 }

// kernel: custom-call.68
= control target key start
LH: loop header
LB: loop body
LE: loop exit
PB: predicated region body
PF: predicated region fallthrough
CT: control target
= control target key end

     0   :  { %v38_v0 = vlaneseq  ;;  %v248_v9 = vmov -1.0   ;;  %v249_v53 = vmov 0.0   ;;  %s303_s0 = inlined_call_operand.vmem [shape: f32[1,10,10], index: 0, kind: input, shape index: {}]   ;;  %s304_s1 = inlined_call_operand.vmem [shape: f32[1,10,10], index: 1, kind: output, shape index: {}]  }
   0x1   :  { %v31_v1 = vld [vmem:[%s303_s0] sm:$0xff]  ;;  %v33_v36 = vld [vmem:[%s303_s0 + $0x8] sm:$0xff] }
   0x2   :  { %v263_v2 = vand.u32 127, %v38_v0  ;;  %v42_v3 = vshrl.u32 %v38_v0, 7 }
   0x4   :  { %vm44_vm0 = vcmp.eq.s32.totalorder %v42_v3, %v263_v2  ;;  %vm40_vm1 = vcmp.lt.s32.totalorder %v263_v2, 10  ;;  %vm49_vm2 = vcmp.ge.s32.totalorder %v42_v3, %v263_v2  ;;  %vm79_vm4 = vcmp.eq.s32.totalorder %v263_v2, 0 }
   0x5   :  { %v46_v4 = vsel %vm44_vm0, %v31_v1, 0.0  ;;  %vm50_vm3 = vmand %vm49_vm2, %vm40_vm1  ;;  %vm76_vm5 = vcmp.eq.s32.totalorder %v263_v2, %v42_v3  ;;  %v80_v10 = vsel %vm79_vm4, 1.0, %v248_v9  ;;  %vm94_vm6 = vcmp.eq.s32.totalorder %v263_v2, 1 }
   0x6   :  { %47 = vadd.xlane.f32.xlu0 %v46_v4  ;;  %v51_v6 = vsel %vm50_vm3, %v31_v1, 0.0  ;;  %v81_v11 = vsel %vm76_vm5, %v80_v10, 0.0  ;;  %vm104_vm7 = vcmp.eq.s32.totalorder %v263_v2, 2  ;;  %vm114_vm8 = vcmp.eq.s32.totalorder %v263_v2, 3 }
   0x7   :  { %vm124_vm9 = vcmp.eq.s32.totalorder %v263_v2, 4  ;;  %v59_v31 = vadd.s32 8, %v42_v3  ;;  %vm134_vm11 = vcmp.eq.s32.totalorder %v263_v2, 5  ;;  %vm144_vm14 = vcmp.eq.s32.totalorder %v263_v2, 6 }
   0x8   :  { %vm154_vm0 = vcmp.eq.s32.totalorder %v263_v2, 7  ;;  %vm178_vm2 = vcmp.eq.s32.totalorder %v263_v2, 9 }
   0x9   :  { %vm60_vm10 = vcmp.eq.s32.totalorder %v59_v31, %v263_v2  ;;  %vm65_vm12 = vcmp.ge.s32.totalorder %v59_v31, %v263_v2  ;;  %vm87_vm15 = vcmp.eq.s32.totalorder %v263_v2, %v59_v31 }
   0xa   :  { %v62_v37 = vsel %vm60_vm10, %v33_v36, 0.0  ;;  %vm66_vm13 = vmand %vm65_vm12, %vm40_vm1  ;;  %v88_v54 = vsel %vm87_vm15, -1.0, %v249_v53  ;;  %vm164_vm1 = vcmp.eq.s32.totalorder %v263_v2, 8 }
   0xb   :  { %v67_v44 = vsel %vm66_vm13, %v33_v36, 0.0 }
  0x93   :  { %v266_v5 = vpop.xlane.xlu0 %47 }
  0x94   :  { %244 = vrcp.f32 %v266_v5  ;;  %vm189_vm4 = vweird.f32 %v266_v5 }
  0x9e   :  { %v273_v7 = vpop.eup %244 }
  0x9f   :  { %v53_v8 = vmul.f32 %v273_v7, %v51_v6 }
  0xa1   :  { %54 = vst [vmem:[#allocation2] sm:$0xff] %v53_v8 }
  0xa8   :  { %v90_v12 = vld [vmem:[#allocation2 + $0x1] ss:$0 sm:$0xff]  ;;  %v100_v15 = vld [vmem:[#allocation2 + $0x2] ss:$0 sm:$0xff]  ;;  %v110_v20 = vld [vmem:[#allocation2 + $0x3] ss:$0 sm:$0xff] }
  0xa9   :  { %v91_v13 = vxor.u32 2147483648, %v90_v12  ;;  %v101_v17 = vxor.u32 2147483648, %v100_v15  ;;  %v111_v22 = vxor.u32 2147483648, %v110_v20  ;;  %v120_v25 = vld [vmem:[#allocation2 + $0x4] ss:$0 sm:$0xff] }
  0xaa   :  { %v121_v27 = vxor.u32 2147483648, %v120_v25  ;;  %v130_v30 = vld [vmem:[#allocation2 + $0x5] ss:$0 sm:$0xff]  ;;  %v140_v38 = vld [vmem:[#allocation2 + $0x6] ss:$0 sm:$0xff] }
  0xab   :  { %v95_v14 = vmul.f32 %v91_v13, %v81_v11  ;;  %v131_v33 = vxor.u32 2147483648, %v130_v30  ;;  %v141_v40 = vxor.u32 2147483648, %v140_v38  ;;  %v150_v47 = vld [vmem:[#allocation2 + $0x7] ss:$0 sm:$0xff] }
  0xac   :  { %v151_v50 = vxor.u32 2147483648, %v150_v47 }
  0xad   :  { %96 = vadd.xlane.f32.xlu0 %v95_v14 }
 0x13a   :  { %v97_v16 = vpop.xlane.xlu0 %96 }
 0x13b   :  { %v98_v18 = vsel %vm94_vm6, %v97_v16, %v81_v11 }
 0x13c   :  { %v105_v19 = vmul.f32 %v101_v17, %v98_v18 }
 0x13e   :  { %106 = vadd.xlane.f32.xlu1 %v105_v19 }
 0x1cb   :  { %v107_v21 = vpop.xlane.xlu1 %106 }
 0x1cc   :  { %v108_v23 = vsel %vm104_vm7, %v107_v21, %v98_v18 }
 0x1cd   :  { %v115_v24 = vmul.f32 %v111_v22, %v108_v23 }
 0x1cf   :  { %116 = vadd.xlane.f32.xlu1 %v115_v24 }
 0x25c   :  { %v117_v26 = vpop.xlane.xlu1 %116 }
 0x25d   :  { %v118_v28 = vsel %vm114_vm8, %v117_v26, %v108_v23 }
 0x25e   :  { %v125_v29 = vmul.f32 %v121_v27, %v118_v28 }
 0x260   :  { %126 = vadd.xlane.f32.xlu0 %v125_v29 }
 0x2ed   :  { %v127_v32 = vpop.xlane.xlu0 %126 }
 0x2ee   :  { %v128_v34 = vsel %vm124_vm9, %v127_v32, %v118_v28 }
 0x2ef   :  { %v135_v35 = vmul.f32 %v131_v33, %v128_v34 }
 0x2f1   :  { %136 = vadd.xlane.f32.xlu1 %v135_v35 }
 0x2f5   :  { %63 = vadd.xlane.f32.xlu1 %v62_v37 }
 0x37e   :  { %v137_v39 = vpop.xlane.xlu1 %136 }
 0x37f   :  { %v138_v41 = vsel %vm134_vm11, %v137_v39, %v128_v34 }
 0x380   :  { %v145_v42 = vmul.f32 %v141_v40, %v138_v41 }
 0x382   :  { %146 = vadd.xlane.f32.xlu0 %v145_v42  ;;  %v64_v43 = vpop.xlane.xlu1 %63 }
 0x383   :  { %246 = vrcp.f32 %v64_v43  ;;  %vm194_vm3 = vweird.f32 %v64_v43 }
 0x38d   :  { %v247_v45 = vpop.eup %246 }
 0x38e   :  { %v69_v46 = vmul.f32 %v247_v45, %v67_v44 }
 0x390   :  { %70 = vst [vmem:[#allocation2 + $0x8] sm:$0xff] %v69_v46 }
 0x397   :  { %v160_v48 = vld [vmem:[#allocation2 + $0x8] ss:$0 sm:$0xff]  ;;  %v174_v59 = vld [vmem:[#allocation2 + $0x9] ss:$0 sm:$0xff] }
 0x398   :  { %v161_v51 = vxor.u32 2147483648, %v160_v48  ;;  %v175_v62 = vxor.u32 2147483648, %v174_v59 }
 0x39a   :  { %v169_v56 = vmul.f32 %v161_v51, %v88_v54 }
 0x40f   :  { %v147_v49 = vpop.xlane.xlu0 %146 }
 0x410   :  { %v148_v52 = vsel %vm144_vm14, %v147_v49, %v138_v41 }
 0x411   :  { %v155_v55 = vmul.f32 %v151_v50, %v148_v52 }
 0x413   :  { %156 = vadd.xlane.f32.xlu0 %v155_v55 }
 0x417   :  { %170 = vadd.xlane.f32.xlu0 %v169_v56 }
 0x4a0   :  { %v157_v57 = vpop.xlane.xlu0 %156 }
 0x4a1   :  { %v158_v58 = vsel %vm154_vm0, %v157_v57, %v148_v52 }
 0x4a2   :  { %v165_v60 = vmul.f32 %v161_v51, %v158_v58 }
 0x4a4   :  { %v171_v61 = vpop.xlane.xlu0 %170  ;;  %166 = vadd.xlane.f32.xlu1 %v165_v60 }
 0x4a5   :  { %v172_v63 = vsel %vm164_vm1, %v171_v61, %v88_v54 }
 0x4a6   :  { %v183_v0 = vmul.f32 %v175_v62, %v172_v63 }
 0x4a8   :  { %184 = vadd.xlane.f32.xlu0 %v183_v0 }
 0x531   :  { %v167_v1 = vpop.xlane.xlu1 %166 }
 0x532   :  { %v168_v3 = vsel %vm164_vm1, %v167_v1, %v158_v58 }
 0x533   :  { %v179_v4 = vmul.f32 %v175_v62, %v168_v3 }
 0x535   :  { %v185_v6 = vpop.xlane.xlu0 %184  ;;  %180 = vadd.xlane.f32.xlu1 %v179_v4 }
 0x536   :  { %v186_v8 = vsel %vm178_vm2, %v185_v6, %v172_v63 }
 0x537   :  { %v193_v9 = vmul.f32 %v247_v45, %v186_v8 }
 0x539   :  { %v195_v10 = vsel %vm194_vm3, %v186_v8, %v193_v9 }
 0x53a   :  { %230 = vst [vmem:[%s304_s1 + $0x8] sm:$0xff] %v195_v10 }
 0x5c2   :  { %v181_v11 = vpop.xlane.xlu1 %180 }
 0x5c3   :  { %v182_v12 = vsel %vm178_vm2, %v181_v11, %v168_v3 }
 0x5c4   :  { %v188_v13 = vmul.f32 %v273_v7, %v182_v12 }
 0x5c6   :  { %v190_v14 = vsel %vm189_vm4, %v182_v12, %v188_v13 }
 0x5c7   :  { %228 = vst [vmem:[%s304_s1] sm:$0xff] %v190_v14 }

// kernel: custom-call.67
= control target key start
LH: loop header
LB: loop body
LE: loop exit
PB: predicated region body
PF: predicated region fallthrough
CT: control target
= control target key end

     0   :  { %v38_v0 = vlaneseq  ;;  %v271_v17 = vmov -1.0   ;;  %v272_v23 = vmov 0.0   ;;  %s336_s0 = inlined_call_operand.vmem [shape: f32[1,10,10], index: 0, kind: input, shape index: {}]   ;;  %s337_s1 = inlined_call_operand.vmem [shape: f32[1,10,10], index: 1, kind: output, shape index: {}]  }
   0x1   :  { %v33_v3 = vld [vmem:[%s336_s0 + $0x8] sm:$0xff]  ;;  %v31_v5 = vld [vmem:[%s336_s0] sm:$0xff] }
   0x2   :  { %v283_v1 = vand.u32 127, %v38_v0  ;;  %v42_v2 = vshrl.u32 %v38_v0, 7 }
   0x4   :  { %vm40_vm0 = vcmp.lt.s32.totalorder %v283_v1, 10  ;;  %v59_v4 = vadd.s32 8, %v42_v2  ;;  %vm49_vm1 = vcmp.le.s32.totalorder %v42_v2, %v283_v1  ;;  %vm44_vm5 = vcmp.eq.s32.totalorder %v42_v2, %v283_v1 }
   0x5   :  { %vm293_vm2 = vmand %vm49_vm1, %vm40_vm0  ;;  %v46_v10 = vsel %vm44_vm5, %v31_v5, 0.0  ;;  %vm86_vm7 = vcmp.eq.s32.totalorder %v283_v1, 9  ;;  %vm76_vm9 = vcmp.eq.s32.totalorder %v283_v1, %v42_v2  ;;  %vm94_vm10 = vcmp.eq.s32.totalorder %v283_v1, 8 }
   0x6   :  { %vm60_vm3 = vcmp.eq.s32.totalorder %v59_v4, %v283_v1  ;;  %vm65_vm4 = vcmp.le.s32.totalorder %v59_v4, %v283_v1  ;;  %v51_v7 = vsel %vm293_vm2, %v31_v5, 0.0  ;;  %vm83_vm8 = vcmp.eq.s32.totalorder %v283_v1, %v59_v4 }
   0x7   :  { %v62_v8 = vsel %vm60_vm3, %v33_v3, 0.0  ;;  %vm66_vm6 = vmand %vm65_vm4, %vm40_vm0  ;;  %v87_v18 = vsel %vm86_vm7, 1.0, %v271_v17  ;;  %v77_v24 = vsel %vm76_vm9, -1.0, %v272_v23  ;;  %vm104_vm11 = vcmp.eq.s32.totalorder %v283_v1, 7 }
   0x8   :  { %v67_v9 = vsel %vm66_vm6, %v33_v3, 0.0  ;;  %63 = vadd.xlane.f32.xlu0 %v62_v8  ;;  %v88_v19 = vsel %vm83_vm8, %v87_v18, 0.0  ;;  %vm118_vm12 = vcmp.eq.s32.totalorder %v283_v1, 6  ;;  %vm132_vm13 = vcmp.eq.s32.totalorder %v283_v1, 5 }
   0x9   :  { %vm146_vm14 = vcmp.eq.s32.totalorder %v283_v1, 4  ;;  %vm160_vm15 = vcmp.eq.s32.totalorder %v283_v1, 3  ;;  %vm174_vm0 = vcmp.eq.s32.totalorder %v283_v1, 2  ;;  %vm188_vm1 = vcmp.eq.s32.totalorder %v283_v1, 1 }
   0xa   :  { %vm201_vm2 = vcmp.eq.s32.totalorder %v283_v1, 0 }
   0xc   :  { %47 = vadd.xlane.f32.xlu0 %v46_v10 }
  0x95   :  { %v302_v11 = vpop.xlane.xlu0 %63 }
  0x96   :  { %267 = vrcp.f32 %v302_v11  ;;  %vm217_vm4 = vweird.f32 %v302_v11 }
  0x99   :  { %v305_v12 = vpop.xlane.xlu0 %47 }
  0x9a   :  { %269 = vrcp.f32 %v305_v12  ;;  %vm212_vm3 = vweird.f32 %v305_v12 }
  0xa0   :  { %v308_v13 = vpop.eup %267 }
  0xa1   :  { %v69_v14 = vmul.f32 %v308_v13, %v67_v9 }
  0xa3   :  { %70 = vst [vmem:[#allocation2 + $0x8] sm:$0xff] %v69_v14 }
  0xa4   :  { %v311_v15 = vpop.eup %269 }
  0xa5   :  { %v53_v16 = vmul.f32 %v311_v15, %v51_v7 }
  0xa7   :  { %54 = vst [vmem:[#allocation2] sm:$0xff] %v53_v16 }
  0xaa   :  { %v90_v20 = vld [vmem:[#allocation2 + $0x8] ss:$0 sm:$0xff] }
  0xab   :  { %v91_v21 = vxor.u32 2147483648, %v90_v20 }
  0xad   :  { %v95_v22 = vmul.f32 %v91_v21, %v88_v19 }
  0xae   :  { %v100_v25 = vld [vmem:[#allocation2 + $0x7] ss:$0 sm:$0xff]  ;;  %v114_v30 = vld [vmem:[#allocation2 + $0x6] ss:$0 sm:$0xff]  ;;  %v128_v38 = vld [vmem:[#allocation2 + $0x5] ss:$0 sm:$0xff] }
  0xaf   :  { %96 = vadd.xlane.f32.xlu1 %v95_v22  ;;  %v101_v26 = vxor.u32 2147483648, %v100_v25  ;;  %v115_v33 = vxor.u32 2147483648, %v114_v30  ;;  %v129_v41 = vxor.u32 2147483648, %v128_v38  ;;  %v142_v46 = vld [vmem:[#allocation2 + $0x4] ss:$0 sm:$0xff] }
  0xb0   :  { %v143_v49 = vxor.u32 2147483648, %v142_v46  ;;  %v156_v54 = vld [vmem:[#allocation2 + $0x3] ss:$0 sm:$0xff]  ;;  %v170_v62 = vld [vmem:[#allocation2 + $0x2] ss:$0 sm:$0xff] }
  0xb1   :  { %v105_v27 = vmul.f32 %v101_v26, %v77_v24  ;;  %v157_v57 = vxor.u32 2147483648, %v156_v54  ;;  %v171_v2 = vxor.u32 2147483648, %v170_v62  ;;  %v184_v7 = vld [vmem:[#allocation2 + $0x1] ss:$0 sm:$0xff] }
  0xb2   :  { %v185_v10 = vxor.u32 2147483648, %v184_v7 }
  0xb3   :  { %106 = vadd.xlane.f32.xlu1 %v105_v27 }
 0x13c   :  { %v97_v28 = vpop.xlane.xlu1 %96 }
 0x13d   :  { %v98_v29 = vsel %vm94_vm10, %v97_v28, %v88_v19  ;;  %v197_v19 = vld [vmem:[#allocation2] ss:$0 sm:$0xff] }
 0x13e   :  { %v109_v31 = vmul.f32 %v101_v26, %v98_v29  ;;  %v198_v22 = vxor.u32 2147483648, %v197_v19 }
 0x140   :  { %110 = vadd.xlane.f32.xlu0 %v109_v31  ;;  %v107_v32 = vpop.xlane.xlu1 %106 }
 0x141   :  { %v108_v34 = vsel %vm104_vm11, %v107_v32, %v77_v24 }
 0x142   :  { %v119_v35 = vmul.f32 %v115_v33, %v108_v34 }
 0x144   :  { %120 = vadd.xlane.f32.xlu1 %v119_v35 }
 0x1cd   :  { %v111_v36 = vpop.xlane.xlu0 %110 }
 0x1ce   :  { %v112_v37 = vsel %vm104_vm11, %v111_v36, %v98_v29 }
 0x1cf   :  { %v123_v39 = vmul.f32 %v115_v33, %v112_v37 }
 0x1d1   :  { %124 = vadd.xlane.f32.xlu0 %v123_v39  ;;  %v121_v40 = vpop.xlane.xlu1 %120 }
 0x1d2   :  { %v122_v42 = vsel %vm118_vm12, %v121_v40, %v108_v34 }
 0x1d3   :  { %v133_v43 = vmul.f32 %v129_v41, %v122_v42 }
 0x1d5   :  { %134 = vadd.xlane.f32.xlu1 %v133_v43 }
 0x25e   :  { %v125_v44 = vpop.xlane.xlu0 %124 }
 0x25f   :  { %v126_v45 = vsel %vm118_vm12, %v125_v44, %v112_v37 }
 0x260   :  { %v137_v47 = vmul.f32 %v129_v41, %v126_v45 }
 0x262   :  { %138 = vadd.xlane.f32.xlu0 %v137_v47  ;;  %v135_v48 = vpop.xlane.xlu1 %134 }
 0x263   :  { %v136_v50 = vsel %vm132_vm13, %v135_v48, %v122_v42 }
 0x264   :  { %v147_v51 = vmul.f32 %v143_v49, %v136_v50 }
 0x266   :  { %148 = vadd.xlane.f32.xlu1 %v147_v51 }
 0x2ef   :  { %v139_v52 = vpop.xlane.xlu0 %138 }
 0x2f0   :  { %v140_v53 = vsel %vm132_vm13, %v139_v52, %v126_v45 }
 0x2f1   :  { %v151_v55 = vmul.f32 %v143_v49, %v140_v53 }
 0x2f3   :  { %152 = vadd.xlane.f32.xlu0 %v151_v55  ;;  %v149_v56 = vpop.xlane.xlu1 %148 }
 0x2f4   :  { %v150_v58 = vsel %vm146_vm14, %v149_v56, %v136_v50 }
 0x2f5   :  { %v161_v59 = vmul.f32 %v157_v57, %v150_v58 }
 0x2f7   :  { %162 = vadd.xlane.f32.xlu1 %v161_v59 }
 0x380   :  { %v153_v60 = vpop.xlane.xlu0 %152 }
 0x381   :  { %v154_v61 = vsel %vm146_vm14, %v153_v60, %v140_v53 }
 0x382   :  { %v165_v63 = vmul.f32 %v157_v57, %v154_v61 }
 0x384   :  { %166 = vadd.xlane.f32.xlu0 %v165_v63  ;;  %v163_v0 = vpop.xlane.xlu1 %162 }
 0x385   :  { %v164_v3 = vsel %vm160_vm15, %v163_v0, %v150_v58 }
 0x386   :  { %v175_v4 = vmul.f32 %v171_v2, %v164_v3 }
 0x388   :  { %176 = vadd.xlane.f32.xlu1 %v175_v4 }
 0x411   :  { %v167_v5 = vpop.xlane.xlu0 %166 }
 0x412   :  { %v168_v6 = vsel %vm160_vm15, %v167_v5, %v154_v61 }
 0x413   :  { %v179_v8 = vmul.f32 %v171_v2, %v168_v6 }
 0x415   :  { %180 = vadd.xlane.f32.xlu0 %v179_v8  ;;  %v177_v9 = vpop.xlane.xlu1 %176 }
 0x416   :  { %v178_v14 = vsel %vm174_vm0, %v177_v9, %v164_v3 }
 0x417   :  { %v189_v16 = vmul.f32 %v185_v10, %v178_v14 }
 0x419   :  { %190 = vadd.xlane.f32.xlu1 %v189_v16 }
 0x4a2   :  { %v181_v17 = vpop.xlane.xlu0 %180 }
 0x4a3   :  { %v182_v18 = vsel %vm174_vm0, %v181_v17, %v168_v6 }
 0x4a4   :  { %v193_v20 = vmul.f32 %v185_v10, %v182_v18 }
 0x4a6   :  { %194 = vadd.xlane.f32.xlu0 %v193_v20  ;;  %v191_v21 = vpop.xlane.xlu1 %190 }
 0x4a7   :  { %v192_v23 = vsel %vm188_vm1, %v191_v21, %v178_v14 }
 0x4a8   :  { %v202_v24 = vmul.f32 %v198_v22, %v192_v23 }
 0x4aa   :  { %203 = vadd.xlane.f32.xlu1 %v202_v24 }
 0x533   :  { %v195_v25 = vpop.xlane.xlu0 %194 }
 0x534   :  { %v196_v26 = vsel %vm188_vm1, %v195_v25, %v182_v18 }
 0x535   :  { %v206_v27 = vmul.f32 %v198_v22, %v196_v26 }
 0x537   :  { %207 = vadd.xlane.f32.xlu0 %v206_v27  ;;  %v204_v28 = vpop.xlane.xlu1 %203 }
 0x538   :  { %v205_v29 = vsel %vm201_vm2, %v204_v28, %v192_v23 }
 0x539   :  { %v211_v30 = vmul.f32 %v311_v15, %v205_v29 }
 0x53b   :  { %v213_v31 = vsel %vm212_vm3, %v205_v29, %v211_v30 }
 0x53c   :  { %251 = vst [vmem:[%s337_s1] sm:$0xff] %v213_v31 }
 0x5c4   :  { %v208_v32 = vpop.xlane.xlu0 %207 }
 0x5c5   :  { %v209_v33 = vsel %vm201_vm2, %v208_v32, %v196_v26 }
 0x5c6   :  { %v216_v34 = vmul.f32 %v308_v13, %v209_v33 }
 0x5c8   :  { %v218_v35 = vsel %vm217_vm4, %v209_v33, %v216_v34 }
 0x5c9   :  { %253 = vst [vmem:[%s337_s1 + $0x8] sm:$0xff] %v218_v35 }

// kernel: custom-call.73
= control target key start
LH: loop header
LB: loop body
LE: loop exit
PB: predicated region body
PF: predicated region fallthrough
CT: control target
= control target key end

     0   :  { %v430_v0 = vmov 0.0   ;;  %vm41_vm0 = vcmask 7168   ;;  %vm72_vm1 = vcmask 15368   ;;  %vm89_vm2 = vcmask 1047553   ;;  %s481_s0 = inlined_call_operand.vmem [shape: f32[10,10], index: 0, kind: input, shape index: {}]   ;;  %s482_s1 = inlined_call_operand.vmem [shape: f32[10,10], index: 1, kind: output, shape index: {}]  }
   0x1   :  { %38 = vst [vmem:[#allocation1] sm:$0xff] %v430_v0  ;;  %v444_v4 = vld [vmem:[%s481_s0] sm:$0xff]  ;;  %v450_v5 = vld [vmem:[%s481_s0 + $0x8] sm:$0xff]  ;;  %vm90_vm3 = vmand %vm72_vm1, %vm89_vm2  ;;  %vm107_vm4 = vcmask 23568   ;;  %vm124_vm5 = vcmask 1047554   ;;  %vm142_vm7 = vcmask 31768  }
   0x2   :  { %32 = vst [vmem:[#allocation0] sm:$0xff] %v444_v4  ;;  %34 = vst [vmem:[#allocation0 + $0x8] sm:$0xff] %v450_v5  ;;  %vm159_vm8 = vcmask 1047555   ;;  %vm177_vm10 = vcmask 39968   ;;  %vm194_vm11 = vcmask 1047556   ;;  %vm212_vm13 = vcmask 48168  }
   0x3   :  { %vm125_vm6 = vmand %vm107_vm4, %vm124_vm5  ;;  %vm229_vm14 = vcmask 1047557   ;;  %vm299_vm5 = vcmask 1047559  }
   0x4   :  { %vm160_vm9 = vmand %vm142_vm7, %vm159_vm8  ;;  %vm340_vm8 = vcmask 80968  }
   0x5   :  { %vm195_vm12 = vmand %vm177_vm10, %vm194_vm11 }
   0x6   :  { %vm230_vm15 = vmand %vm212_vm13, %vm229_vm14 }
   0x8   :  { %v42_v1 = vld [vmem:[#allocation1] ss:$0 sm:$0xff] }
   0x9   :  { %v44_v2 = vmul.f32 %v42_v1, %v42_v1  ;;  %v63_v3 = vmul.f32 0.0, %v42_v1  ;;  %v43_v6 = vld [vmem:[#allocation0] ss:$0 sm:$0xff]  ;;  %v76_v22 = vld [vmem:[#allocation0 + $0x1] ss:$0 sm:$0xff] }
   0xa   :  { %v111_v40 = vld [vmem:[#allocation0 + $0x2] ss:$0 sm:$0xff]  ;;  %v146_v58 = vld [vmem:[#allocation0 + $0x3] ss:$0 sm:$0xff] }
   0xb   :  { %45 = vadd.xlane.f32.xlu0 %v44_v2  ;;  %64 = vadd.xlane.f32.xlu1 %v63_v3 }
   0xf   :  { %52 = vadd.xlane.f32.xlu0 %v63_v3 }
  0x98   :  { %v46_v7 = vpop.xlane.xlu0 %45  ;;  %v65_v13 = vpop.xlane.xlu1 %64 }
  0x99   :  { %v47_v8 = vsub.f32 %v43_v6, %v46_v7  ;;  %v66_v15 = vsub.f32 %v450_v5, %v65_v13 }
  0x9b   :  { %410 = vrsqrt.f32 %v47_v8 }
  0x9c   :  { %v53_v9 = vpop.xlane.xlu0 %52 }
  0x9d   :  { %v54_v10 = vsub.f32 %v444_v4, %v53_v9 }
  0xa5   :  { %v411_v11 = vpop.eup %410 }
  0xa6   :  { %v55_v12 = vmul.f32 %v411_v11, %v54_v10  ;;  %v67_v16 = vmul.f32 %v411_v11, %v66_v15 }
  0xa8   :  { %v56_v14 = vsel %vm41_vm0, %v55_v12, 0.0  ;;  %v68_v17 = vsel %vm41_vm0, %v67_v16, 0.0  ;;  %vm247_vm0 = vcmask 56368  }
  0xa9   :  { %58 = vst [vmem:[#allocation1] sm:$0xff] %v56_v14 }
  0xb0   :  { %v74_v18 = vld [vmem:[#allocation1 + $0x1] ss:$0 sm:$0xff] }
  0xb1   :  { %v84_v19 = vmul.f32 %v74_v18, %v56_v14  ;;  %v77_v20 = vmul.f32 %v74_v18, %v74_v18  ;;  %v98_v21 = vmul.f32 %v74_v18, %v68_v17 }
  0xb3   :  { %85 = vadd.xlane.f32.xlu0 %v84_v19  ;;  %78 = vadd.xlane.f32.xlu1 %v77_v20 }
  0xb7   :  { %99 = vadd.xlane.f32.xlu1 %v98_v21 }
 0x140   :  { %v79_v23 = vpop.xlane.xlu1 %78  ;;  %v86_v25 = vpop.xlane.xlu0 %85 }
 0x141   :  { %v80_v24 = vsub.f32 %v76_v22, %v79_v23  ;;  %v87_v26 = vsub.f32 %v444_v4, %v86_v25 }
 0x143   :  { %412 = vrsqrt.f32 %v80_v24 }
 0x144   :  { %v100_v31 = vpop.xlane.xlu1 %99 }
 0x145   :  { %v101_v32 = vsub.f32 %v450_v5, %v100_v31 }
 0x14d   :  { %v413_v27 = vpop.eup %412 }
 0x14e   :  { %v88_v28 = vmul.f32 %v413_v27, %v87_v26  ;;  %v102_v33 = vmul.f32 %v413_v27, %v101_v32  ;;  %v216_v32 = vld [vmem:[#allocation0 + $0x5] ss:$0 sm:$0xff] }
 0x150   :  { %v91_v29 = vsel %vm90_vm3, %v88_v28, 0.0  ;;  %v103_v34 = vsel %vm72_vm1, %v102_v33, 0.0  ;;  %vm264_vm1 = vcmask 1047558  }
 0x151   :  { %v92_v30 = vadd.f32 %v91_v29, %v56_v14  ;;  %v104_v38 = vadd.f32 %v103_v34, %v68_v17  ;;  %v181_v14 = vld [vmem:[#allocation0 + $0x4] ss:$0 sm:$0xff]  ;;  %vm265_vm3 = vmand %vm247_vm0, %vm264_vm1 }
 0x153   :  { %93 = vst [vmem:[#allocation1] sm:$0xff] %v92_v30 }
 0x15a   :  { %v109_v35 = vld [vmem:[#allocation1 + $0x2] ss:$0 sm:$0xff] }
 0x15b   :  { %v119_v36 = vmul.f32 %v109_v35, %v92_v30  ;;  %v112_v37 = vmul.f32 %v109_v35, %v109_v35  ;;  %v133_v39 = vmul.f32 %v109_v35, %v104_v38 }
 0x15d   :  { %120 = vadd.xlane.f32.xlu1 %v119_v36  ;;  %113 = vadd.xlane.f32.xlu0 %v112_v37 }
 0x161   :  { %134 = vadd.xlane.f32.xlu0 %v133_v39 }
 0x1ea   :  { %v114_v41 = vpop.xlane.xlu0 %113  ;;  %v121_v43 = vpop.xlane.xlu1 %120 }
 0x1eb   :  { %v115_v42 = vsub.f32 %v111_v40, %v114_v41  ;;  %v122_v44 = vsub.f32 %v444_v4, %v121_v43 }
 0x1ed   :  { %414 = vrsqrt.f32 %v115_v42 }
 0x1ee   :  { %v135_v49 = vpop.xlane.xlu0 %134 }
 0x1ef   :  { %v136_v50 = vsub.f32 %v450_v5, %v135_v49 }
 0x1f7   :  { %v415_v45 = vpop.eup %414 }
 0x1f8   :  { %v123_v46 = vmul.f32 %v415_v45, %v122_v44  ;;  %v137_v51 = vmul.f32 %v415_v45, %v136_v50  ;;  %v251_v50 = vld [vmem:[#allocation0 + $0x6] ss:$0 sm:$0xff] }
 0x1fa   :  { %v126_v47 = vsel %vm125_vm6, %v123_v46, 0.0  ;;  %v138_v52 = vsel %vm107_vm4, %v137_v51, 0.0  ;;  %vm282_vm4 = vcmask 64568  }
 0x1fb   :  { %v127_v48 = vadd.f32 %v126_v47, %v92_v30  ;;  %v139_v56 = vadd.f32 %v138_v52, %v104_v38  ;;  %vm300_vm6 = vmand %vm282_vm4, %vm299_vm5 }
 0x1fd   :  { %128 = vst [vmem:[#allocation1] sm:$0xff] %v127_v48 }
 0x204   :  { %v144_v53 = vld [vmem:[#allocation1 + $0x3] ss:$0 sm:$0xff] }
 0x205   :  { %v154_v54 = vmul.f32 %v144_v53, %v127_v48  ;;  %v147_v55 = vmul.f32 %v144_v53, %v144_v53  ;;  %v168_v57 = vmul.f32 %v144_v53, %v139_v56 }
 0x207   :  { %155 = vadd.xlane.f32.xlu0 %v154_v54  ;;  %148 = vadd.xlane.f32.xlu1 %v147_v55 }
 0x20b   :  { %169 = vadd.xlane.f32.xlu1 %v168_v57 }
 0x294   :  { %v149_v59 = vpop.xlane.xlu1 %148  ;;  %v156_v61 = vpop.xlane.xlu0 %155 }
 0x295   :  { %v150_v60 = vsub.f32 %v146_v58, %v149_v59  ;;  %v157_v62 = vsub.f32 %v444_v4, %v156_v61 }
 0x297   :  { %416 = vrsqrt.f32 %v150_v60 }
 0x298   :  { %v170_v3 = vpop.xlane.xlu1 %169 }
 0x299   :  { %v171_v6 = vsub.f32 %v450_v5, %v170_v3  ;;  %v286_v3 = vld [vmem:[#allocation0 + $0x7] ss:$0 sm:$0xff] }
 0x2a1   :  { %v417_v63 = vpop.eup %416 }
 0x2a2   :  { %v158_v0 = vmul.f32 %v417_v63, %v157_v62  ;;  %v172_v7 = vmul.f32 %v417_v63, %v171_v6 }
 0x2a4   :  { %v161_v1 = vsel %vm160_vm9, %v158_v0, 0.0  ;;  %v173_v8 = vsel %vm142_vm7, %v172_v7, 0.0  ;;  %vm317_vm7 = vcmask 72768   ;;  %vm360_vm9 = vmand %vm340_vm8, %vm89_vm2 }
 0x2a5   :  { %v162_v2 = vadd.f32 %v161_v1, %v127_v48  ;;  %v174_v12 = vadd.f32 %v173_v8, %v139_v56 }
 0x2a7   :  { %163 = vst [vmem:[#allocation1] sm:$0xff] %v162_v2 }
 0x2ae   :  { %v179_v9 = vld [vmem:[#allocation1 + $0x4] ss:$0 sm:$0xff] }
 0x2af   :  { %v189_v10 = vmul.f32 %v179_v9, %v162_v2  ;;  %v182_v11 = vmul.f32 %v179_v9, %v179_v9  ;;  %v203_v13 = vmul.f32 %v179_v9, %v174_v12 }
 0x2b1   :  { %190 = vadd.xlane.f32.xlu1 %v189_v10  ;;  %183 = vadd.xlane.f32.xlu0 %v182_v11 }
 0x2b5   :  { %204 = vadd.xlane.f32.xlu0 %v203_v13 }
 0x33e   :  { %v184_v15 = vpop.xlane.xlu0 %183  ;;  %v191_v17 = vpop.xlane.xlu1 %190 }
 0x33f   :  { %v185_v16 = vsub.f32 %v181_v14, %v184_v15  ;;  %v192_v18 = vsub.f32 %v444_v4, %v191_v17 }
 0x341   :  { %418 = vrsqrt.f32 %v185_v16 }
 0x342   :  { %v205_v23 = vpop.xlane.xlu0 %204 }
 0x343   :  { %v206_v24 = vsub.f32 %v450_v5, %v205_v23 }
 0x34b   :  { %v419_v19 = vpop.eup %418 }
 0x34c   :  { %v193_v20 = vmul.f32 %v419_v19, %v192_v18  ;;  %v207_v25 = vmul.f32 %v419_v19, %v206_v24  ;;  %v321_v18 = vld [vmem:[#allocation0 + $0x8] ss:$0 sm:$0xff] }
 0x34e   :  { %v196_v21 = vsel %vm195_vm12, %v193_v20, 0.0  ;;  %v208_v26 = vsel %vm177_vm10, %v207_v25, 0.0 }
 0x34f   :  { %v197_v22 = vadd.f32 %v196_v21, %v162_v2  ;;  %v209_v30 = vadd.f32 %v208_v26, %v174_v12 }
 0x351   :  { %198 = vst [vmem:[#allocation1] sm:$0xff] %v197_v22 }
 0x358   :  { %v214_v27 = vld [vmem:[#allocation1 + $0x5] ss:$0 sm:$0xff] }
 0x359   :  { %v224_v28 = vmul.f32 %v214_v27, %v197_v22  ;;  %v217_v29 = vmul.f32 %v214_v27, %v214_v27  ;;  %v238_v31 = vmul.f32 %v214_v27, %v209_v30 }
 0x35b   :  { %225 = vadd.xlane.f32.xlu0 %v224_v28  ;;  %218 = vadd.xlane.f32.xlu1 %v217_v29 }
 0x35f   :  { %239 = vadd.xlane.f32.xlu1 %v238_v31 }
 0x3e8   :  { %v219_v33 = vpop.xlane.xlu1 %218  ;;  %v226_v35 = vpop.xlane.xlu0 %225 }
 0x3e9   :  { %v220_v34 = vsub.f32 %v216_v32, %v219_v33  ;;  %v227_v36 = vsub.f32 %v444_v4, %v226_v35 }
 0x3eb   :  { %420 = vrsqrt.f32 %v220_v34  ;;  %v344_v34 = vld [vmem:[#allocation0 + $0x9] ss:$0 sm:$0xff] }
 0x3ec   :  { %v240_v41 = vpop.xlane.xlu1 %239 }
 0x3ed   :  { %v241_v42 = vsub.f32 %v450_v5, %v240_v41 }
 0x3f5   :  { %v421_v37 = vpop.eup %420 }
 0x3f6   :  { %v228_v38 = vmul.f32 %v421_v37, %v227_v36  ;;  %v242_v43 = vmul.f32 %v421_v37, %v241_v42 }
 0x3f8   :  { %v231_v39 = vsel %vm230_vm15, %v228_v38, 0.0  ;;  %v243_v44 = vsel %vm212_vm13, %v242_v43, 0.0 }
 0x3f9   :  { %v232_v40 = vadd.f32 %v231_v39, %v197_v22  ;;  %v244_v48 = vadd.f32 %v243_v44, %v209_v30 }
 0x3fb   :  { %233 = vst [vmem:[#allocation1] sm:$0xff] %v232_v40 }
 0x402   :  { %v249_v45 = vld [vmem:[#allocation1 + $0x6] ss:$0 sm:$0xff] }
 0x403   :  { %v259_v46 = vmul.f32 %v249_v45, %v232_v40  ;;  %v252_v47 = vmul.f32 %v249_v45, %v249_v45  ;;  %v273_v49 = vmul.f32 %v249_v45, %v244_v48 }
 0x405   :  { %260 = vadd.xlane.f32.xlu1 %v259_v46  ;;  %253 = vadd.xlane.f32.xlu0 %v252_v47 }
 0x409   :  { %274 = vadd.xlane.f32.xlu0 %v273_v49 }
 0x492   :  { %v254_v51 = vpop.xlane.xlu0 %253  ;;  %v261_v53 = vpop.xlane.xlu1 %260 }
 0x493   :  { %v255_v52 = vsub.f32 %v251_v50, %v254_v51  ;;  %v262_v54 = vsub.f32 %v444_v4, %v261_v53 }
 0x495   :  { %422 = vrsqrt.f32 %v255_v52 }
 0x496   :  { %v275_v56 = vpop.xlane.xlu0 %274 }
 0x497   :  { %v276_v59 = vsub.f32 %v450_v5, %v275_v56 }
 0x49f   :  { %v423_v55 = vpop.eup %422 }
 0x4a0   :  { %v263_v57 = vmul.f32 %v423_v55, %v262_v54  ;;  %v277_v61 = vmul.f32 %v423_v55, %v276_v59 }
 0x4a2   :  { %v266_v58 = vsel %vm265_vm3, %v263_v57, 0.0  ;;  %v278_v62 = vsel %vm247_vm0, %v277_v61, 0.0 }
 0x4a3   :  { %v267_v60 = vadd.f32 %v266_v58, %v232_v40  ;;  %v279_v63 = vadd.f32 %v278_v62, %v244_v48 }
 0x4a5   :  { %268 = vst [vmem:[#allocation1] sm:$0xff] %v267_v60 }
 0x4ac   :  { %v284_v0 = vld [vmem:[#allocation1 + $0x7] ss:$0 sm:$0xff] }
 0x4ad   :  { %v308_v1 = vmul.f32 %v284_v0, %v279_v63  ;;  %v287_v2 = vmul.f32 %v284_v0, %v284_v0  ;;  %v294_v17 = vmul.f32 %v284_v0, %v267_v60 }
 0x4af   :  { %309 = vadd.xlane.f32.xlu0 %v308_v1  ;;  %288 = vadd.xlane.f32.xlu1 %v287_v2 }
 0x53c   :  { %v289_v6 = vpop.xlane.xlu1 %288  ;;  %v310_v8 = vpop.xlane.xlu0 %309 }
 0x53d   :  { %v290_v7 = vsub.f32 %v286_v3, %v289_v6  ;;  %v311_v9 = vsub.f32 %v450_v5, %v310_v8 }
 0x53f   :  { %424 = vrsqrt.f32 %v290_v7 }
 0x549   :  { %v425_v10 = vpop.eup %424 }
 0x54a   :  { %v312_v11 = vmul.f32 %v425_v10, %v311_v9 }
 0x54c   :  { %v313_v12 = vsel %vm282_vm4, %v312_v11, 0.0 }
 0x54d   :  { %v314_v13 = vadd.f32 %v313_v12, %v279_v63 }
 0x54f   :  { %316 = vst [vmem:[#allocation1 + $0x8] sm:$0xff] %v314_v13 }
 0x556   :  { %v319_v14 = vld [vmem:[#allocation1 + $0x8] ss:$0 sm:$0xff] }
 0x557   :  { %v331_v15 = vmul.f32 %v319_v14, %v314_v13  ;;  %v322_v16 = vmul.f32 %v319_v14, %v319_v14 }
 0x559   :  { %332 = vadd.xlane.f32.xlu0 %v331_v15  ;;  %323 = vadd.xlane.f32.xlu1 %v322_v16 }
 0x55d   :  { %295 = vadd.xlane.f32.xlu0 %v294_v17 }
 0x5e6   :  { %v333_v19 = vpop.xlane.xlu0 %332  ;;  %v324_v20 = vpop.xlane.xlu1 %323 }
 0x5e7   :  { %v325_v21 = vsub.f32 %v321_v18, %v324_v20  ;;  %v334_v27 = vsub.f32 %v450_v5, %v333_v19 }
 0x5e9   :  { %426 = vrsqrt.f32 %v325_v21 }
 0x5ea   :  { %v296_v22 = vpop.xlane.xlu0 %295 }
 0x5eb   :  { %v297_v23 = vsub.f32 %v444_v4, %v296_v22 }
 0x5ed   :  { %v298_v24 = vmul.f32 %v425_v10, %v297_v23 }
 0x5ef   :  { %v301_v25 = vsel %vm300_vm6, %v298_v24, 0.0 }
 0x5f0   :  { %v302_v26 = vadd.f32 %v301_v25, %v267_v60 }
 0x5f2   :  { %303 = vst [vmem:[#allocation1] sm:$0xff] %v302_v26  ;;  %395 = vst [vmem:[%s482_s1] sm:$0xff] %v302_v26 }
 0x5f3   :  { %v427_v28 = vpop.eup %426 }
 0x5f4   :  { %v335_v29 = vmul.f32 %v427_v28, %v334_v27 }
 0x5f6   :  { %v336_v30 = vsel %vm317_vm7, %v335_v29, 0.0 }
 0x5f7   :  { %v337_v31 = vadd.f32 %v336_v30, %v314_v13 }
 0x5f9   :  { %339 = vst [vmem:[#allocation1 + $0x8] sm:$0xff] %v337_v31 }
 0x600   :  { %v342_v32 = vld [vmem:[#allocation1 + $0x9] ss:$0 sm:$0xff] }
 0x601   :  { %v345_v4 = vmul.f32 %v342_v32, %v342_v32  ;;  %v354_v33 = vmul.f32 %v342_v32, %v337_v31 }
 0x603   :  { %346 = vadd.xlane.f32.xlu1 %v345_v4 }
 0x607   :  { %355 = vadd.xlane.f32.xlu1 %v354_v33 }
 0x690   :  { %v347_v35 = vpop.xlane.xlu1 %346 }
 0x691   :  { %v348_v36 = vsub.f32 %v344_v34, %v347_v35 }
 0x693   :  { %428 = vrsqrt.f32 %v348_v36 }
 0x694   :  { %v356_v37 = vpop.xlane.xlu1 %355 }
 0x695   :  { %v357_v38 = vsub.f32 %v450_v5, %v356_v37 }
 0x69d   :  { %v429_v39 = vpop.eup %428 }
 0x69e   :  { %v358_v40 = vmul.f32 %v429_v39, %v357_v38 }
 0x6a0   :  { %v361_v41 = vsel %vm360_vm9, %v358_v40, 0.0 }
 0x6a1   :  { %v362_v42 = vadd.f32 %v361_v41, %v337_v31 }
 0x6a3   :  { %364 = vst [vmem:[#allocation1 + $0x8] sm:$0xff] %v362_v42  ;;  %397 = vst [vmem:[%s482_s1 + $0x8] sm:$0xff] %v362_v42 }

// kernel: custom-call.115
= control target key start
LH: loop header
LB: loop body
LE: loop exit
PB: predicated region body
PF: predicated region fallthrough
CT: control target
= control target key end

     0   :  { %v469_v3 = vmov 0.0   ;;  %s495_s15 = smov 0   ;;  %s607_s0 = inlined_call_operand.vmem [shape: f32[20,10], index: 0, kind: input, shape index: {}]   ;;  %s608_s1 = inlined_call_operand.vmem [shape: f32[20,10], index: 1, kind: output, shape index: {0}]   ;;  %s609_s2 = inlined_call_operand.vmem [shape: f32[10], index: 2, kind: output, shape index: {1}]  }
   0x1   :  { %v35_v0 = vld [vmem:[%s607_s0] sm:$0xff]  ;;  %v37_v1 = vld [vmem:[%s607_s0 + $0x8] sm:$0xff]  ;;  %v39_v2 = vld [vmem:[%s607_s0 + $0x10] sm:$0xff]  ;;  %54 = vst [vmem:[#allocation2] sm:$0x1] %v469_v3 }
   0x2   :  { %45 = vst [vmem:[#allocation1] sm:$0xff] %v35_v0  ;;  %49 = vst [vmem:[#allocation1 + $0x8] sm:$0xff] %v37_v1 }
   0x3   :  { %53 = vst [vmem:[#allocation1 + $0x10] sm:$0xff] %v39_v2 }
   0x4 LB: > { %v62_v4 = vlaneseq  ;;  %v504_v7 = vstv %s467_s15  ;;  %s109_s0 = scalar_lea.vmem [#allocation1], %s467_s15  ;;  %s145_s16 = smov [#allocation1]  ;;  %s467_s15 = sphi %s495_s15, %s60_s15  }
   0x5   : > { %s203_s17 = scalar_lea.vmem [#allocation4], %s467_s15  ;;  %s219_s18 = smov [#allocation1] }
   0x6   : > { %v501_v6 = vshrl.u32 %v62_v4, 7  ;;  %v533_v63 = vand.u32 127, %v62_v4  ;;  %s220_s19 = smov [#allocation4] }
   0x8   : > { %vm66_vm0 = vcmp.gt.s32.totalorder %v501_v6, %v504_v7  ;;  %v73_v9 = vadd.s32 8, %v501_v6  ;;  %v83_v10 = vadd.s32 16, %v501_v6  ;;  %v148_v6 = vmov %v501_v6 }
   0x9   : > { %v61_v5 = vld [vmem:[#allocation1] sm:$0xff]  ;;  %v70_v8 = vld [vmem:[#allocation1 + $0x8] sm:$0xff]  ;;  %v185_v56 = vadd.s32 16, %v148_v6  ;;  %v167_v57 = vadd.s32 8, %v148_v6  ;;  %vm152_vm13 = vcmp.gt.s32.totalorder %v148_v6, %v504_v7  ;;  %v223_v6 = vmov %v501_v6 }
   0xa   : > { %v67_v11 = vsel %vm66_vm0, %v61_v5, 0.0  ;;  %v80_v12 = vld [vmem:[#allocation1 + $0x10] sm:$0xff]  ;;  %vm75_vm1 = vcmp.gt.s32.totalorder %v73_v9, %v504_v7  ;;  %vm85_vm2 = vcmp.gt.s32.totalorder %v83_v10, %v504_v7  ;;  %vm86_vm3 = vcmp.lt.s32.totalorder %v83_v10, 20  ;;  %v110_v26 = vld [vmem:[%s109_s0] ss:$0 sm:$0xff]  ;;  %v429_v60 = vld [vmem:[%s145_s16 + $0x8] sm:$0xff] }
   0xb   : > { %v68_v13 = vmul.f32 %v67_v11, %v67_v11  ;;  %v76_v14 = vsel %vm75_vm1, %v70_v8, 0.0  ;;  %vm87_vm4 = vmand %vm85_vm2, %vm86_vm3  ;;  %v111_v27 = vand.u32 2147483647, %v110_v26  ;;  %vm136_vm10 = vcmp.lt.f32.partialorder %v110_v26, 0.0  ;;  %v149_v58 = vld [vmem:[%s145_s16] sm:$0xff]  ;;  %v430_v59 = vld [vmem:[%s145_s16 + $0x10] sm:$0xff] }
   0xc   : > { %v77_v15 = vmul.f32 %v76_v14, %v76_v14  ;;  %v88_v16 = vsel %vm87_vm4, %v80_v12, 0.0  ;;  %vm187_vm11 = vcmp.gt.s32.totalorder %v185_v56, %v504_v7  ;;  %vm188_vm12 = vcmp.lt.s32.totalorder %v185_v56, 20 }
   0xd   : > { %v89_v17 = vmul.f32 %v88_v16, %v88_v16  ;;  %v112_v32 = vmax.f32 %v111_v27, 0.0  ;;  %vm189_vm14 = vmand %vm187_vm11, %vm188_vm12  ;;  %vm169_vm15 = vcmp.gt.s32.totalorder %v167_v57, %v504_v7  ;;  %v153_v0 = vsel %vm152_vm13, %v149_v58, 0.0 }
   0xe   : > { %v78_v18 = vadd.f32 %v77_v15, %v68_v13  ;;  %v190_v1 = vsel %vm189_vm14, %v430_v59, 0.0  ;;  %v170_v2 = vsel %vm169_vm15, %v429_v60, 0.0  ;;  %vm537_vm0 = vcmp.eq.s32.totalorder %v533_v63, %v504_v7 }
  0x10   : > { %v90_v19 = vadd.f32 %v89_v17, %v78_v18 }
  0x12   : > { %v91_v20 = vrot.slane %v90_v19, 4 }
  0x14   : > { %v92_v21 = vadd.f32 %v91_v20, %v90_v19 }
  0x16   : > { %v93_v22 = vrot.slane %v92_v21, 2 }
  0x18   : > { %v94_v23 = vadd.f32 %v93_v22, %v92_v21  ;;  %v216_v21 = vld [vmem:[#allocation2] ss:$0 sm:$0xff] }
  0x1a   : > { %v95_v24 = vrot.slane %v94_v23, 1 }
  0x1c   : > { %v512_v25 = vadd.f32 %v95_v24, %v94_v23 }
  0x1e   : > { %451 = vrsqrt.f32 %v512_v25  ;;  %vm99_vm5 = vcmp.eq.f32.partialorder %v512_v25, inf  ;;  %v102_v29 = vand.u32 2147483648, %v512_v25  ;;  %vm101_vm6 = vcmp.eq.f32.partialorder %v512_v25, 0.0 }
  0x28   : > { %v452_v28 = vpop.eup %451 }
  0x29   : > { %v98_v30 = vmul.f32 %v452_v28, %v512_v25  ;;  %v432_v28 = vld [vmem:[%s219_s18 + $0x8] sm:$0xff] }
  0x2b   : > { %v100_v31 = vsel %vm99_vm5, %v512_v25, %v98_v30  ;;  %v470_v25 = vmov 1.0  }
  0x2c   : > { %v103_v33 = vsel %vm101_vm6, %v102_v29, %v100_v31  ;;  %v434_v29 = vld [vmem:[%s219_s18 + $0x10] sm:$0xff] }
  0x2d   : > { %v113_v34 = vand.u32 2147483647, %v103_v33 }
  0x2f   : > { %v114_v35 = vmax.f32 %v112_v32, %v113_v34 }
  0x31   : > { %453 = vrcp.f32 %v114_v35  ;;  %vm126_vm9 = vcmp.eq.f32.partialorder %v114_v35, 0.0 }
  0x3b   : > { %v454_v36 = vpop.eup %453 }
  0x3c   : > { %v116_v37 = vmul.f32 %v454_v36, %v111_v27  ;;  %v119_v38 = vmul.f32 0.0, %v454_v36  ;;  %v123_v39 = vmul.f32 %v454_v36, %v113_v34  ;;  %v226_v27 = vld [vmem:[%s219_s18] sm:$0xff]  ;;  %s562_s18 = smov %s219_s18 }
  0x3d   : > { %s317_s20 = scalar_lea.vmem %s562_s18, %s467_s15  ;;  %s60_s15 = sadd.s32 1, %s467_s15  }
  0x3e   : > { %v117_v40 = vmul.f32 %v116_v37, %v116_v37  ;;  %v120_v41 = vmul.f32 %v119_v38, %v119_v38  ;;  %v124_v42 = vmul.f32 %v123_v39, %v123_v39  ;;  %p57_p0 = scmp.ge.s32.totalorder %s60_s15, 10  }
  0x40   : > { %v121_v43 = vadd.f32 %v120_v41, %v117_v40 }
  0x42   : > { %v125_v44 = vadd.f32 %v124_v42, %v121_v43 }
  0x44   : > { %455 = vrsqrt.f32 %v125_v44  ;;  %vm129_vm7 = vcmp.eq.f32.partialorder %v125_v44, inf  ;;  %v132_v46 = vand.u32 2147483648, %v125_v44  ;;  %vm131_vm8 = vcmp.eq.f32.partialorder %v125_v44, 0.0 }
  0x4e   : > { %v456_v45 = vpop.eup %455 }
  0x4f   : > { %v128_v47 = vmul.f32 %v456_v45, %v125_v44 }
  0x51   : > { %v130_v48 = vsel %vm129_vm7, %v125_v44, %v128_v47  ;;  %v261_v47 = vld [vmem:[%s562_s18] sm:$0xff] }
  0x52   : > { %v133_v49 = vsel %vm131_vm8, %v132_v46, %v130_v48  ;;  %v436_v48 = vld [vmem:[%s562_s18 + $0x8] sm:$0xff] }
  0x53   : > { %v134_v50 = vmul.f32 %v133_v49, %v114_v35  ;;  %v439_v49 = vld [vmem:[%s562_s18 + $0x10] sm:$0xff] }
  0x55   : > { %v135_v51 = vsel %vm126_vm9, 0.0, %v134_v50 }
  0x56   : > { %v137_v52 = vxor.u32 2147483648, %v135_v51 }
  0x58   : > { %v138_v53 = vsel %vm136_vm10, %v135_v51, %v137_v52 }
  0x59   : > { %v526_v54 = vsel %vm101_vm6, %v110_v26, %v138_v53  ;;  %457 = vrcp.f32 %v138_v53  ;;  %v139_v61 = vsub.f32 %v138_v53, %v110_v26 }
  0x5a   : > { %v144_v55 = vsub.f32 %v110_v26, %v526_v54  ;;  %v235_v26 = vadd.s32 16, %v223_v6  ;;  %v254_v6 = vmov %v501_v6 }
  0x5b   : > { %v275_v44 = vadd.s32 8, %v254_v6  ;;  %v296_v45 = vadd.s32 16, %v254_v6  ;;  %vm271_vm2 = vcmp.ge.s32.totalorder %v254_v6, %v504_v7 }
  0x5c   : > { %459 = vrcp.f32 %v144_v55  ;;  %vm241_vm1 = vcmp.lt.s32.totalorder %v235_v26, 20  ;;  %vm572_vm5 = vmand %vm537_vm0, %vm271_vm2 }
  0x5d   : > { %vm292_vm3 = vcmp.ge.s32.totalorder %v275_v44, %v504_v7  ;;  %vm313_vm4 = vcmp.ge.s32.totalorder %v296_v45, %v504_v7 }
  0x5e   : > { %vm293_vm7 = vmand %vm537_vm0, %vm292_vm3 }
  0x5f   : > { %vm314_vm8 = vmand %vm537_vm0, %vm313_vm4 }
  0x63   : > { %v458_v62 = vpop.eup %457 }
  0x64   : > { %v141_v3 = vmul.f32 %v458_v62, %v139_v61 }
  0x66   : > { %v460_v5 = vpop.eup %459  ;;  %v143_v14 = vsel %vm101_vm6, 0.0, %v141_v3 }
  0x67   : > { %v155_v8 = vmul.f32 %v460_v5, %v153_v0  ;;  %v192_v10 = vmul.f32 %v460_v5, %v190_v1  ;;  %v172_v11 = vmul.f32 %v460_v5, %v170_v2  ;;  %v209_v18 = vsel %vm537_vm0, %v143_v14, 0.0 }
  0x69   : > { %v156_v12 = vsel %vm101_vm6, 0.0, %v155_v8  ;;  %v193_v4 = vsel %vm101_vm6, 0.0, %v192_v10  ;;  %v173_v13 = vsel %vm101_vm6, 0.0, %v172_v11  ;;  %vm263_vm6 = vcmp.gt.s32.totalorder %v533_v63, %v504_v7 }
  0x6a   : > { %v161_v15 = vsel %vm537_vm0, %v156_v12, 0.0  ;;  %v198_v16 = vsel %vm537_vm0, %v193_v4, 0.0  ;;  %v178_v17 = vsel %vm537_vm0, %v173_v13, 0.0 }
  0x6b   : > { %162 = vadd.xlane.f32.xlu0 %v161_v15  ;;  %199 = vadd.xlane.f32.xlu1 %v198_v16 }
  0x6f   : > { %179 = vadd.xlane.f32.xlu0 %v178_v17  ;;  %210 = vadd.xlane.f32.xlu1 %v209_v18 }
  0xf8   : > { %v163_v19 = vpop.xlane.xlu0 %162  ;;  %v200_v20 = vpop.xlane.xlu1 %199 }
  0xf9   : > { %164 = vst [vmem:[#allocation4] sm:$0xff] %v163_v19  ;;  %202 = vst [vmem:[#allocation4 + $0x10] sm:$0xff] %v200_v20 }
  0xfc   : > { %v180_v22 = vpop.xlane.xlu0 %179  ;;  %v211_v23 = vpop.xlane.xlu1 %210 }
  0xfd   : > { %182 = vst [vmem:[#allocation4 + $0x8] sm:$0xff] %v180_v22  ;;  %v217_v24 = vsel %vm537_vm0, %v211_v23, %v216_v21 }
  0xfe   : > { %204 = vst [vmem:[%s203_s17] sm:$0x1] %v470_v25  ;;  %218 = vst [vmem:[#allocation2] sm:$0x1] %v217_v24 }
 0x105   : > { %v225_v30 = vld [vmem:[%s220_s19] sm:$0xff]  ;;  %v431_v31 = vld [vmem:[%s220_s19 + $0x8] sm:$0xff]  ;;  %v433_v32 = vld [vmem:[%s220_s19 + $0x10] sm:$0xff]  ;;  %s251_s19 = smov %s220_s19 }
 0x106   : > { %v227_v33 = vmul.f32 %v226_v27, %v225_v30  ;;  %v233_v34 = vmul.f32 %v432_v28, %v431_v31  ;;  %v240_v35 = vmul.f32 %v434_v29, %v433_v32  ;;  %v259_v51 = vld [vmem:[%s251_s19] sm:$0xff]  ;;  %v435_v52 = vld [vmem:[%s251_s19 + $0x8] sm:$0xff]  ;;  %v438_v53 = vld [vmem:[%s251_s19 + $0x10] sm:$0xff] }
 0x107   :  { %v328_v5 = vld [vmem:[#allocation2] sm:$0x1] (%p57_p0) }
 0x108   : > { %v234_v36 = vadd.f32 %v233_v34, %v227_v33  ;;  %v242_v37 = vsel %vm241_vm1, %v240_v35, 0.0  ;;  %330 = vst [vmem:[#allocation3] sm:$0x1] (%p57_p0), %v328_v5 }
 0x10a   : > { %v243_v38 = vadd.f32 %v242_v37, %v234_v36 }
 0x10c   : > { %v244_v39 = vrot.slane %v243_v38, 4 }
 0x10e   : > { %v245_v40 = vadd.f32 %v244_v39, %v243_v38 }
 0x10f   :  { %v388_v9 = vld [vmem:[#allocation3] sm:$0x1] (%p57_p0) }
 0x110   : > { %v246_v41 = vrot.slane %v245_v40, 2  ;;  %389 = vst [vmem:[%s609_s2] sm:$0x1] (%p57_p0), %v388_v9 }
 0x112   : > { %v247_v42 = vadd.f32 %v246_v41, %v245_v40 }
 0x114   : > { %v248_v43 = vrot.slane %v247_v42, 1 }
 0x116   : > { %v249_v46 = vadd.f32 %v248_v43, %v247_v42 }
 0x118   : > { %v255_v50 = vmul.f32 %v249_v46, %v211_v23 }
 0x11a   : > { %v260_v56 = vmul.f32 %v259_v51, %v255_v50  ;;  %v280_v6 = vmul.f32 %v435_v52, %v255_v50  ;;  %v301_v57 = vmul.f32 %v438_v53, %v255_v50 }
 0x11c   : > { %v264_v58 = vsub.f32 %v261_v47, %v260_v56  ;;  %v285_v59 = vsub.f32 %v436_v48, %v280_v6  ;;  %v306_v60 = vsub.f32 %v439_v49, %v301_v57 }
 0x11e   : > { %v265_v61 = vsel %vm263_vm6, %v264_v58, %v261_v47  ;;  %v286_v62 = vsel %vm263_vm6, %v285_v59, %v436_v48  ;;  %v307_v0 = vsel %vm263_vm6, %v306_v60, %v439_v49 }
 0x11f   : > { %v273_v1 = vsel %vm572_vm5, %v259_v51, %v265_v61  ;;  %v294_v2 = vsel %vm293_vm7, %v435_v52, %v286_v62  ;;  %v315_v3 = vsel %vm314_vm8, %v438_v53, %v307_v0 }
 0x120   : > { %274 = vst [vmem:[%s562_s18] sm:$0xff] %v273_v1  ;;  %437 = vst [vmem:[%s562_s18 + $0x8] sm:$0xff] %v294_v2 }
 0x121   : > { %440 = vst [vmem:[%s562_s18 + $0x10] sm:$0xff] %v315_v3 }
 0x124   :  { %59 = sbr.rel (!%p57_p0) target bundleno = 4 (0x4), region = 157 }
 0x128   : > { %v318_v7 = vld [vmem:[%s317_s20] ss:$0 sm:$0xff] }
 0x129   : > { %v323_v63 = vsel %vm537_vm0, %v526_v54, %v318_v7 }
 0x12a   : > { %324 = vst [vmem:[%s317_s20] sm:$0x1] %v323_v63 }
 0x131   :  { %v362_v8 = vld [vmem:[#allocation1] sm:$0xff]  ;;  %v364_v10 = vld [vmem:[#allocation1 + $0x8] sm:$0xff]  ;;  %v366_v54 = vld [vmem:[#allocation1 + $0x10] sm:$0xff] }
 0x132   :  { %363 = vst [vmem:[%s608_s1] sm:$0xff] %v362_v8  ;;  %365 = vst [vmem:[%s608_s1 + $0x8] sm:$0xff] %v364_v10 }
 0x133   :  { %367 = vst [vmem:[%s608_s1 + $0x10] sm:$0xff] %v366_v54 }

// kernel: custom-call.116
= control target key start
LH: loop header
LB: loop body
LE: loop exit
PB: predicated region body
PF: predicated region fallthrough
CT: control target
= control target key end

     0   :  { %s539_s0 = inlined_call_operand.vmem [shape: f32[10,10], index: 0, kind: input, shape index: {}]   ;;  %s540_s1 = inlined_call_operand.vmem [shape: f32[10,10], index: 1, kind: output, shape index: {}]  }
   0x1   :  { %s15_s8 = scalar_lea.vmem %s539_s0, 8 }
   0x2   :  { %p275_p0 = scmp.gt.s32.totalorder %s539_s0, %s15_s8 }
   0x3   :  { %s477_s11 = smov (!%p275_p0), [#allocation0]   ;;  %s481_s14 = smov (!%p275_p0), %s539_s0  }
   0x4   :  { %276 = sbr.rel (%p275_p0) target bundleno = 21 (0x15), region = 84 }
   0xb LB: > { %v49_v0 = vld [vmem:[%s483_s14] sm:$0xff]  ;;  %s51_s14 = scalar_lea.vmem %s483_s14, 8   ;;  %s483_s14 = sphi %s481_s14, %s51_s14   ;;  %s479_s11 = sphi %s477_s11, %s52_s11  }
   0xc   : > { %50 = vst [vmem:[%s479_s11] sm:$0xff] %v49_v0  ;;  %s52_s11 = scalar_lea.vmem %s479_s11, 8   ;;  %p46_p1 = scmp.gt.s32.totalorder %s51_s14, %s15_s8 }
   0xe   :  { %48 = sbr.rel (!%p46_p1) target bundleno = 11 (0xb), region = 90 }
  0x15 PF:  { %v64_v1 = vlaneseq  ;;  %v84_v2 = vld [vmem:[#allocation0 + $0x1] ss:$0 sm:$0xff]  ;;  %vm85_vm0 = vcmask 80896   ;;  %v95_v10 = vld [vmem:[#allocation0 + $0x2] ss:$0 sm:$0xff]  ;;  %v493_v41 = vmov 0.0   ;;  %s485_s16 = smov %s540_s1  }
  0x16   :  { %v70_v5 = vld [vmem:[#allocation0] sm:$0xff]  ;;  %v86_v6 = vsel %vm85_vm0, %v84_v2, 0.0  ;;  %v97_v11 = vsel %vm85_vm0, %v95_v10, 0.0  ;;  %v161_v37 = vld [vmem:[#allocation0 + $0x8] ss:$0 sm:$0xff]  ;;  %s489_s17 = smov [#allocation1]  }
  0x17   :  { %v513_v3 = vand.u32 127, %v64_v1  ;;  %v67_v4 = vshrl.u32 %v64_v1, 7  ;;  %v106_v15 = vld [vmem:[#allocation0 + $0x3] ss:$0 sm:$0xff]  ;;  %v117_v20 = vld [vmem:[#allocation0 + $0x4] ss:$0 sm:$0xff] }
  0x18   :  { %v108_v16 = vsel %vm85_vm0, %v106_v15, 0.0  ;;  %v119_v21 = vsel %vm85_vm0, %v117_v20, 0.0  ;;  %v128_v25 = vld [vmem:[#allocation0 + $0x5] ss:$0 sm:$0xff]  ;;  %v139_v30 = vld [vmem:[#allocation0 + $0x6] ss:$0 sm:$0xff] }
  0x19   :  { %vm69_vm1 = vcmp.eq.s32.totalorder %v513_v3, %v67_v4  ;;  %vm73_vm2 = vcmp.eq.s32.totalorder %v513_v3, 0  ;;  %vm89_vm3 = vcmp.eq.s32.totalorder %v513_v3, 1  ;;  %vm100_vm4 = vcmp.eq.s32.totalorder %v513_v3, 2  ;;  %v150_v36 = vld [vmem:[#allocation0 + $0x7] ss:$0 sm:$0xff] }
  0x1a   :  { %v74_v7 = vsel %vm73_vm2, %v70_v5, 1.0  ;;  %vm111_vm5 = vcmp.eq.s32.totalorder %v513_v3, 3  ;;  %vm122_vm6 = vcmp.eq.s32.totalorder %v513_v3, 4  ;;  %v130_v26 = vsel %vm85_vm0, %v128_v25, 0.0  ;;  %v176_v47 = vld [vmem:[#allocation0 + $0x9] ss:$0 sm:$0xff] }
  0x1b   :  { %v75_v8 = vsel %vm69_vm1, %v74_v7, 0.0  ;;  %vm133_vm7 = vcmp.eq.s32.totalorder %v513_v3, 5  ;;  %v141_v31 = vsel %vm85_vm0, %v139_v30, 0.0  ;;  %v80_v35 = vadd.s32 8, %v67_v4 }
  0x1c   :  { %v90_v9 = vmul.f32 %v86_v6, %v75_v8  ;;  %vm144_vm8 = vcmp.eq.s32.totalorder %v513_v3, 6  ;;  %v152_v38 = vsel %vm85_vm0, %v150_v36, 0.0  ;;  %v163_v43 = vsel %vm85_vm0, %v161_v37, 0.0 }
  0x1d   :  { %vm81_vm9 = vcmp.eq.s32.totalorder %v513_v3, %v80_v35  ;;  %vm155_vm10 = vcmp.eq.s32.totalorder %v513_v3, 7  ;;  %vm166_vm11 = vcmp.eq.s32.totalorder %v513_v3, 8  ;;  %v178_v50 = vsel %vm85_vm0, %v176_v47, 0.0 }
  0x1e   :  { %91 = vadd.xlane.f32.xlu0 %v90_v9  ;;  %v82_v42 = vsel %vm81_vm9, 1.0, %v493_v41  ;;  %vm181_vm12 = vcmp.eq.s32.totalorder %v513_v3, 9 }
  0x1f   :  { %v171_v45 = vmul.f32 %v163_v43, %v82_v42 }
  0xab   :  { %v92_v12 = vpop.xlane.xlu0 %91 }
  0xac   :  { %v93_v13 = vsel %vm89_vm3, %v92_v12, %v75_v8 }
  0xad   :  { %v101_v14 = vmul.f32 %v97_v11, %v93_v13 }
  0xaf   :  { %102 = vadd.xlane.f32.xlu0 %v101_v14 }
 0x13c   :  { %v103_v17 = vpop.xlane.xlu0 %102 }
 0x13d   :  { %v104_v18 = vsel %vm100_vm4, %v103_v17, %v93_v13 }
 0x13e   :  { %v112_v19 = vmul.f32 %v108_v16, %v104_v18 }
 0x140   :  { %113 = vadd.xlane.f32.xlu1 %v112_v19 }
 0x1cd   :  { %v114_v22 = vpop.xlane.xlu1 %113 }
 0x1ce   :  { %v115_v23 = vsel %vm111_vm5, %v114_v22, %v104_v18 }
 0x1cf   :  { %v123_v24 = vmul.f32 %v119_v21, %v115_v23 }
 0x1d1   :  { %124 = vadd.xlane.f32.xlu1 %v123_v24 }
 0x25e   :  { %v125_v27 = vpop.xlane.xlu1 %124 }
 0x25f   :  { %v126_v28 = vsel %vm122_vm6, %v125_v27, %v115_v23 }
 0x260   :  { %v134_v29 = vmul.f32 %v130_v26, %v126_v28 }
 0x262   :  { %135 = vadd.xlane.f32.xlu0 %v134_v29 }
 0x2ef   :  { %v136_v32 = vpop.xlane.xlu0 %135 }
 0x2f0   :  { %v137_v33 = vsel %vm133_vm7, %v136_v32, %v126_v28 }
 0x2f1   :  { %v145_v34 = vmul.f32 %v141_v31, %v137_v33 }
 0x2f3   :  { %146 = vadd.xlane.f32.xlu1 %v145_v34 }
 0x380   :  { %v147_v39 = vpop.xlane.xlu1 %146 }
 0x381   :  { %v148_v40 = vsel %vm144_vm8, %v147_v39, %v137_v33 }
 0x382   :  { %v156_v44 = vmul.f32 %v152_v38, %v148_v40 }
 0x384   :  { %157 = vadd.xlane.f32.xlu0 %v156_v44 }
 0x388   :  { %172 = vadd.xlane.f32.xlu0 %v171_v45 }
 0x411   :  { %v158_v46 = vpop.xlane.xlu0 %157 }
 0x412   :  { %v159_v48 = vsel %vm155_vm10, %v158_v46, %v148_v40 }
 0x413   :  { %v167_v49 = vmul.f32 %v163_v43, %v159_v48 }
 0x415   :  { %168 = vadd.xlane.f32.xlu1 %v167_v49  ;;  %v173_v51 = vpop.xlane.xlu0 %172 }
 0x416   :  { %v174_v52 = vsel %vm166_vm11, %v173_v51, %v82_v42 }
 0x417   :  { %v186_v53 = vmul.f32 %v178_v50, %v174_v52 }
 0x419   :  { %187 = vadd.xlane.f32.xlu0 %v186_v53 }
 0x4a2   :  { %v169_v54 = vpop.xlane.xlu1 %168 }
 0x4a3   :  { %v170_v55 = vsel %vm166_vm11, %v169_v54, %v159_v48 }
 0x4a4   :  { %v182_v56 = vmul.f32 %v178_v50, %v170_v55 }
 0x4a6   :  { %183 = vadd.xlane.f32.xlu1 %v182_v56  ;;  %v188_v57 = vpop.xlane.xlu0 %187 }
 0x4a7   :  { %v189_v58 = vsel %vm181_vm12, %v188_v57, %v174_v52 }
 0x4a8   :  { %192 = vst [vmem:[#allocation1 + $0x8] sm:$0xff] %v189_v58 }
 0x533   :  { %v184_v59 = vpop.xlane.xlu1 %183 }
 0x534   :  { %v185_v60 = vsel %vm181_vm12, %v184_v59, %v170_v55  }
 0x535   :  { %190 = vst [vmem:[#allocation1] sm:$0xff] %v185_v60 }
 0x536 LB:  { %s491_s17 = sphi %s489_s17, %s242_s17   ;;  %s487_s16 = sphi %s485_s16, %s243_s16  }
 0x53c   : > { %v240_v61 = vld [vmem:[%s491_s17] sm:$0xff]  ;;  %s242_s17 = scalar_lea.vmem %s491_s17, 8  }
 0x53d   : > { %241 = vst [vmem:[%s487_s16] sm:$0xff] %v240_v61  ;;  %s243_s16 = scalar_lea.vmem %s487_s16, 8   ;;  %p237_p2 = scmp.gt.s32.totalorder %s242_s17, [#allocation1 + $0x8] }
 0x53f   :  { %239 = sbr.rel (!%p237_p2) target bundleno = 1334 (0x536), region = 112 }

// kernel: custom-call.77
= control target key start
LH: loop header
LB: loop body
LE: loop exit
PB: predicated region body
PF: predicated region fallthrough
CT: control target
= control target key end

     0   :  { %s2375_s30 = smov [#allocation0]   ;;  %s2742_s0 = inlined_call_operand.vmem [shape: f32[5,5], index: 0, kind: input, shape index: {}]   ;;  %s2743_s1 = inlined_call_operand.vmem [shape: f32[5,5], index: 1, kind: input, shape index: {}]   ;;  %s2744_s2 = inlined_call_operand.vmem [shape: f32[5,5], index: 2, kind: input, shape index: {}]   ;;  %s2745_s3 = inlined_call_operand.vmem [shape: f32[5,5], index: 3, kind: input, shape index: {}]   ;;  %s2746_s4 = inlined_call_operand.vmem [shape: f32[5], index: 4, kind: output, shape index: {0}]   ;;  %s2747_s5 = inlined_call_operand.vmem [shape: f32[5], index: 5, kind: output, shape index: {1}]   ;;  %s2748_s6 = inlined_call_operand.vmem [shape: f32[5,5], index: 6, kind: output, shape index: {2}]   ;;  %s2749_s7 = inlined_call_operand.vmem [shape: f32[5,5], index: 7, kind: output, shape index: {3}]   ;;  %s2750_s8 = inlined_call_operand.vmem [shape: f32[5,5], index: 8, kind: output, shape index: {4}]   ;;  %s2751_s9 = inlined_call_operand.vmem [shape: f32[5,5], index: 9, kind: output, shape index: {5}]  }
   0x1   :  { %s2379_s12 = smov %s2742_s0  }
   0x2 LB: > { %v58_v0 = vld [vmem:[%s2381_s12] sm:$0xff]  ;;  %s60_s12 = scalar_lea.vmem %s2381_s12, 8   ;;  %s2381_s12 = sphi %s2379_s12, %s60_s12   ;;  %s2377_s30 = sphi %s2375_s30, %s61_s30  }
   0x3   : > { %59 = vst [vmem:[%s2377_s30] sm:$0xff] %v58_v0  ;;  %s61_s30 = scalar_lea.vmem %s2377_s30, 8   ;;  %p55_p0 = scmp.gt.s32.totalorder %s60_s12, %s2742_s0 }
   0x4   :  { %s2383_s15 = smov (%p55_p0), [#allocation1]   ;;  %s2387_s18 = smov (%p55_p0), %s2743_s1  }
   0x5   :  { %57 = sbr.rel (!%p55_p0) target bundleno = 2 (0x2), region = 358 }
   0xc LB: > { %v120_v1 = vld [vmem:[%s2389_s18] sm:$0xff]  ;;  %s122_s18 = scalar_lea.vmem %s2389_s18, 8   ;;  %s2389_s18 = sphi %s2387_s18, %s122_s18   ;;  %s2385_s15 = sphi %s2383_s15, %s123_s15  }
   0xd   : > { %121 = vst [vmem:[%s2385_s15] sm:$0xff] %v120_v1  ;;  %s123_s15 = scalar_lea.vmem %s2385_s15, 8   ;;  %p117_p1 = scmp.gt.s32.totalorder %s122_s18, %s2743_s1 }
   0xe   :  { %s2391_s0 = smov (%p117_p1), [#allocation2]   ;;  %s2395_s23 = smov (%p117_p1), %s2744_s2  }
   0xf   :  { %119 = sbr.rel (!%p117_p1) target bundleno = 12 (0xc), region = 380 }
  0x16 LB: > { %v182_v2 = vld [vmem:[%s2397_s23] sm:$0xff]  ;;  %s184_s23 = scalar_lea.vmem %s2397_s23, 8   ;;  %s2397_s23 = sphi %s2395_s23, %s184_s23   ;;  %s2393_s0 = sphi %s2391_s0, %s185_s0  }
  0x17   : > { %183 = vst [vmem:[%s2393_s0] sm:$0xff] %v182_v2  ;;  %s185_s0 = scalar_lea.vmem %s2393_s0, 8   ;;  %p179_p2 = scmp.gt.s32.totalorder %s184_s23, %s2744_s2 }
  0x18   :  { %s2399_s1 = smov (%p179_p2), [#allocation3]   ;;  %s2403_s28 = smov (%p179_p2), %s2745_s3  }
  0x19   :  { %181 = sbr.rel (!%p179_p2) target bundleno = 22 (0x16), region = 402 }
  0x20 LB: > { %v244_v3 = vld [vmem:[%s2405_s28] sm:$0xff]  ;;  %s246_s28 = scalar_lea.vmem %s2405_s28, 8   ;;  %s2405_s28 = sphi %s2403_s28, %s246_s28   ;;  %s2401_s1 = sphi %s2399_s1, %s247_s1  }
  0x21   : > { %245 = vst [vmem:[%s2401_s1] sm:$0xff] %v244_v3  ;;  %s247_s1 = scalar_lea.vmem %s2401_s1, 8   ;;  %p241_p3 = scmp.gt.s32.totalorder %s246_s28, %s2745_s3 }
  0x22   :  { %s259_s2 = smov (%p241_p3), [#allocation12]  ;;  %v260_v4 = vld [vmem:[#allocation0] sm:$0xff] (%p241_p3)  ;;  %s262_s10 = smov (%p241_p3), [#allocation13]  ;;  %v263_v5 = vld [vmem:[#allocation1] sm:$0xff] (%p241_p3)  ;;  %v266_v6 = vld [vmem:[#allocation2] sm:$0xff] (%p241_p3)  ;;  %v276_v7 = vlaneseq (%p241_p3)  ;;  %v2447_v9 = vmov (%p241_p3), 0.0  }
  0x23   :  { %243 = sbr.rel (!%p241_p3) target bundleno = 32 (0x20), region = 424  ;;  %261 = vst [vmem:[%s259_s2] sm:$0xff] (%p241_p3), %v260_v4  ;;  %264 = vst [vmem:[%s262_s10] sm:$0xff] (%p241_p3), %v263_v5  ;;  %s265_s11 = smov (%p241_p3), [#allocation14] }
  0x24   :  { %s268_s12 = smov (%p241_p3), [#allocation15]  ;;  %271 = vst [vmem:[#allocation8] sm:$0xff] (%p241_p3), %v2447_v9  ;;  %272 = vst [vmem:[#allocation9] sm:$0xff] (%p241_p3), %v2447_v9  ;;  %v2524_v10 = vand.u32 (%p241_p3), 127, %v276_v7  ;;  %v2526_v11 = vshrl.u32 (%p241_p3), %v276_v7, 7  ;;  %s275_s3 = smov (%p241_p3), [#allocation8] }
  0x25   :  { %273 = vst [vmem:[#allocation10] sm:$0xff] (%p241_p3), %v2447_v9  ;;  %274 = vst [vmem:[#allocation11] sm:$0xff] (%p241_p3), %v2447_v9  ;;  %s288_s13 = smov (%p241_p3), [#allocation11]  ;;  %s1401_s14 = smov (%p241_p3), [#allocation12] }
  0x26   :  { %267 = vst [vmem:[%s265_s11] sm:$0xff] (%p241_p3), %v266_v6  ;;  %v278_v10 = vmov (%p241_p3), %v2524_v10  ;;  %v281_v11 = vmov (%p241_p3), %v2526_v11  ;;  %vm1405_vm2 = vcmp.lt.s32.totalorder (%p241_p3), %v2524_v10, 5  ;;  %s1418_s15 = smov (%p241_p3), [#allocation13]  ;;  %s1435_s16 = smov (%p241_p3), [#allocation14] }
  0x27   :  { %v291_v10 = vmov (%p241_p3), %v2524_v10  ;;  %v294_v11 = vmov (%p241_p3), %v2526_v11  ;;  %vm285_vm0 = vcmp.eq.s32.totalorder (%p241_p3), %v281_v11, %v278_v10  ;;  %s1452_s17 = smov (%p241_p3), [#allocation15] }
  0x28   :  { %v269_v8 = vld [vmem:[#allocation3] sm:$0xff] (%p241_p3)  ;;  %vm298_vm1 = vcmp.eq.s32.totalorder (%p241_p3), %v294_v11, %v291_v10  ;;  %v1397_v10 = vmov (%p241_p3), %v2524_v10  ;;  %v1400_v11 = vmov (%p241_p3), %v2526_v11 }
  0x29   :  { %270 = vst [vmem:[%s268_s12] sm:$0xff] (%p241_p3), %v269_v8  ;;  %vm1410_vm3 = vcmp.eq.s32.totalorder (%p241_p3), %v1400_v11, %v1397_v10  ;;  %v1448_v10 = vmov (%p241_p3), %v2524_v10  ;;  %v1417_v11 = vmov (%p241_p3), %v2526_v11 }
  0x2a   :  { %v1407_v16 = vld [vmem:[%s1401_s14] sm:$0x1f]  ;;  %v1414_v10 = vmov %v2524_v10  ;;  %v1451_v11 = vmov %v2526_v11 }
  0x2b   :  { %v282_v12 = vld [vmem:[%s275_s3] sm:$0x1f]  ;;  %v1408_v18 = vsel %vm1405_vm2, %v1407_v16, 0.0  ;;  %v1431_v10 = vmov %v2524_v10  ;;  %v1434_v11 = vmov %v2526_v11  ;;  %vm1461_vm4 = vcmp.eq.s32.totalorder %v1451_v11, %v1448_v10 }
  0x2c   :  { %v295_v13 = vld [vmem:[%s288_s13] sm:$0x1f]  ;;  %v286_v14 = vsel %vm285_vm0, 1.0, %v282_v12  ;;  %v1409_v22 = vmul.f32 %v1408_v18, %v1408_v18 }
  0x2d   :  { %v299_v15 = vsel %vm298_vm1, 1.0, %v295_v13  ;;  %287 = vst [vmem:[%s275_s3] sm:$0x1f] %v286_v14  ;;  %v1424_v17 = vld [vmem:[%s1418_s15] sm:$0x1f] }
  0x2e   :  { %300 = vst [vmem:[%s288_s13] sm:$0x1f] %v299_v15  ;;  %v1425_v19 = vsel %vm1405_vm2, %v1424_v17, 0.0  ;;  %v1441_v20 = vld [vmem:[%s1435_s16] sm:$0x1f]  ;;  %v1411_v29 = vsel %vm1410_vm3, 0.0, %v1409_v22 }
  0x2f   :  { %v1426_v23 = vmul.f32 %v1425_v19, %v1425_v19  ;;  %v1442_v24 = vsel %vm1405_vm2, %v1441_v20, 0.0 }
  0x30   :  { %v1458_v21 = vld [vmem:[%s1452_s17] sm:$0x1f]  ;;  %v1443_v26 = vmul.f32 %v1442_v24, %v1442_v24 }
  0x31   :  { %v1459_v25 = vsel %vm1405_vm2, %v1458_v21, 0.0  ;;  %v1428_v27 = vadd.f32 %v1426_v23, %v1409_v22  ;;  %v1427_v30 = vadd.f32 %v1426_v23, %v1411_v29 }
  0x32   :  { %v1460_v28 = vmul.f32 %v1459_v25, %v1459_v25 }
  0x33   :  { %v1445_v31 = vadd.f32 %v1443_v26, %v1428_v27  ;;  %v1444_v32 = vadd.f32 %v1443_v26, %v1427_v30 }
  0x34   :  { %v1462_v33 = vsel %vm1461_vm4, 0.0, %v1460_v28 }
  0x35   :  { %v1464_v34 = vadd.f32 %v1460_v28, %v1445_v31  ;;  %v1463_v35 = vadd.f32 %v1462_v33, %v1444_v32 }
  0x37   :  { %1465 = vadd.xlane.f32.xlu0 %v1464_v34 }
  0x3b   :  { %1473 = vadd.xlane.f32.xlu0 %v1463_v35 }
  0xc4   :  { %v1466_v36 = vpop.xlane.xlu0 %1465 }
  0xc5   :  { %v1467_v37 = vrot.slane %v1466_v36, 4 }
  0xc7   :  { %v1468_v38 = vadd.f32 %v1467_v37, %v1466_v36 }
  0xc8   :  { %v1474_v39 = vpop.xlane.xlu0 %1473 }
  0xc9   :  { %v1469_v40 = vrot.slane %v1468_v38, 2  ;;  %v1475_v41 = vrot.slane %v1474_v39, 4 }
  0xcb   :  { %v1476_v42 = vadd.f32 %v1475_v41, %v1474_v39  ;;  %v1470_v43 = vadd.f32 %v1469_v40, %v1468_v38 }
  0xcd   :  { %v1477_v44 = vrot.slane %v1476_v42, 2  ;;  %v1471_v46 = vrot.slane %v1470_v43, 1 }
  0xcf   :  { %v1478_v45 = vadd.f32 %v1477_v44, %v1476_v42  ;;  %v1472_v49 = vadd.f32 %v1471_v46, %v1470_v43 }
  0xd1   :  { %v1479_v47 = vrot.slane %v1478_v45, 1 }
  0xd3   :  { %v1480_v48 = vadd.f32 %v1479_v47, %v1478_v45 }
  0xd5   :  { %1656 = vpush %v1480_v48 }
  0xd6   :  { %1658 = vpush %v1472_v49 }
 0x106   :  { %s1657_s18 = spop %1656 }
 0x107   :  { %s1659_s19 = spop %1658 }
 0x108   :  { %s1483_s20 = smul.f32 1e-10, %s1659_s19 }
 0x10a   :  { %p1484_p4 = scmp.le.f32.partialorder %s1657_s18, %s1483_s20 }
 0x10b   :  { %s2550_s0 = smov (!%p1484_p4), 0  }
 0x10c   :  { %1487 = sbr.rel (%p1484_p4) target bundleno = 950 (0x3b6), region = 440 }
 0x113 LB: > { %s2555_s21 = smov 0   ;;  %s2409_s0 = sphi %s2550_s0, %s2752_s0  }
 0x114 LB: >> { %s405_s22 = smov [#allocation12]  ;;  %v409_v10 = vmov %v2524_v10  ;;  %v412_v11 = vmov %v2526_v11  ;;  %s425_s23 = smov [#allocation13]  ;;  %vm728_vm14 = vcmp.eq.s32.totalorder %v2526_v11, 0  ;;  %vm740_vm15 = vcmp.eq.s32.totalorder %v2526_v11, 4  ;;  %s2413_s21 = sphi %s2555_s21, %s404_s21  }
 0x115   : >> { %v429_v10 = vmov %v2524_v10  ;;  %v432_v11 = vmov %v2526_v11  ;;  %v413_v50 = vld [vmem:[%s405_s22] sm:$0x1f]  ;;  %vm416_vm5 = vcmp.eq.s32.totalorder %v412_v11, %v409_v10  ;;  %s445_s24 = smov [#allocation15]  ;;  %s406_s25 = smov [#allocation16] }
 0x116   : >> { %vm436_vm6 = vcmp.eq.s32.totalorder %v432_v11, %v429_v10  ;;  %v449_v10 = vmov %v2524_v10  ;;  %v452_v11 = vmov %v2526_v11  ;;  %v417_v51 = vsel %vm416_vm5, %v413_v50, 0.0  ;;  %v433_v52 = vld [vmem:[%s425_s23] sm:$0x1f]  ;;  %s426_s1 = smov [#allocation17]  ;;  %s446_s26 = smov [#allocation18] }
 0x117   : >> { %vm456_vm7 = vcmp.eq.s32.totalorder %v452_v11, %v449_v10  ;;  %v418_v53 = vrot.slane %v417_v51, 4  ;;  %v437_v54 = vsel %vm436_vm6, %v433_v52, 0.0  ;;  %v453_v55 = vld [vmem:[%s445_s24] sm:$0x1f]  ;;  %s469_s27 = smov [#allocation17]  ;;  %s467_s28 = smov [#allocation16]  ;;  %v518_v10 = vmov %v2524_v10 }
 0x118   : >> { %v438_v56 = vrot.slane %v437_v54, 4  ;;  %v457_v57 = vsel %vm456_vm7, %v453_v55, 0.0  ;;  %s471_s29 = smov [#allocation18]  ;;  %s506_s30 = smov [#allocation19]  ;;  %v521_v11 = vmov %v2526_v11  ;;  %v533_v10 = vmov %v2524_v10 }
 0x119   : >> { %v419_v58 = vadd.f32 %v418_v53, %v417_v51  ;;  %v458_v59 = vrot.slane %v457_v57, 4  ;;  %s508_s2 = smov [#allocation20]  ;;  %s465_s10 = smov [#allocation21]  ;;  %v536_v11 = vmov %v2526_v11  ;;  %vm523_vm12 = vcmp.eq.s32.totalorder %v521_v11, %v518_v10 }
 0x11a   : >> { %v439_v60 = vadd.f32 %v438_v56, %v437_v54  ;;  %s466_s11 = smov [#allocation22]  ;;  %s510_s10 = smov %s465_s10  ;;  %vm538_vm13 = vcmp.eq.s32.totalorder %v536_v11, %v533_v10  ;;  %v631_v10 = vmov %v2524_v10  ;;  %v634_v11 = vmov %v2526_v11 }
 0x11b   : >> { %v420_v61 = vrot.slane %v419_v58, 2  ;;  %v459_v62 = vadd.f32 %v458_v59, %v457_v57  ;;  %s512_s11 = smov %s466_s11  ;;  %s514_s12 = smov [#allocation21]  ;;  %v645_v10 = vmov %v2524_v10  ;;  %v648_v11 = vmov %v2526_v11 }
 0x11c   : >> { %v440_v63 = vrot.slane %v439_v60, 2  ;;  %s529_s3 = smov [#allocation22]  ;;  %s527_s13 = smov [#allocation23]  ;;  %vm638_vm0 = vcmp.eq.s32.totalorder %v634_v11, %v631_v10  ;;  %v604_v10 = vmov %v2524_v10  ;;  %v607_v11 = vmov %v2526_v11 }
 0x11d   : >> { %v421_v0 = vadd.f32 %v420_v61, %v419_v58  ;;  %v460_v1 = vrot.slane %v459_v62, 2  ;;  %s544_s14 = smov [#allocation23]  ;;  %s2570_s15 = smov [#allocation12]  ;;  %v618_v10 = vmov %v2524_v10  ;;  %v621_v11 = vmov %v2526_v11 }
 0x11e   : >> { %v441_v2 = vadd.f32 %v440_v63, %v439_v60  ;;  %s542_s16 = smov [#allocation24]  ;;  %s2572_s17 = smov [#allocation13]  ;;  %v552_v49 = vld [vmem:[%s2570_s15] sm:$0x1f]  ;;  %vm653_vm1 = vcmp.eq.s32.totalorder %v648_v11, %v645_v10  ;;  %vm612_vm3 = vcmp.eq.s32.totalorder %v607_v11, %v604_v10  ;;  %vm625_vm4 = vcmp.eq.s32.totalorder %v621_v11, %v618_v10 }
 0x11f   : >> { %v422_v3 = vrot.slane %v421_v0, 1  ;;  %v461_v4 = vadd.f32 %v460_v1, %v459_v62  ;;  %s2574_s18 = smov [#allocation14]  ;;  %s2576_s19 = smov [#allocation15]  ;;  %v553_v50 = vld [vmem:[%s2572_s17] sm:$0x1f]  ;;  %vm667_vm5 = vcmp.eq.s32.totalorder %v2524_v10, 0 }
 0x120   : >> { %v442_v5 = vrot.slane %v441_v2, 1  ;;  %s2578_s20 = smov [#allocation8]  ;;  %s2580_s22 = smov [#allocation9]  ;;  %v554_v51 = vld [vmem:[%s2574_s18] sm:$0x1f]  ;;  %vm671_vm6 = vcmp.eq.s32.totalorder %v2524_v10, 1 }
 0x121   : >> { %v423_v6 = vadd.f32 %v422_v3, %v421_v0  ;;  %v462_v7 = vrot.slane %v461_v4, 1  ;;  %s2582_s23 = smov [#allocation10]  ;;  %s768_s24 = smov [#allocation23]  ;;  %v555_v52 = vld [vmem:[%s2576_s19] sm:$0x1f]  ;;  %vm684_vm7 = vcmp.eq.s32.totalorder %v2524_v10, 4 }
 0x122   : >> { %v443_v8 = vadd.f32 %v442_v5, %v441_v2  ;;  %v776_v53 = vld [vmem:[%s2578_s20] sm:$0x1f]  ;;  %s404_s21 = sadd.s32 1, %s2413_s21  }
 0x123   : >> { %424 = vst [vmem:[%s406_s25] sm:$0x1] %v423_v6  ;;  %v463_v9 = vadd.f32 %v462_v7, %v461_v4  ;;  %s2586_s25 = smov [#allocation11]  ;;  %v777_v54 = vld [vmem:[%s2580_s22] sm:$0x1f]  ;;  %p401_p5 = scmp.ge.s32.totalorder %s404_s21, 9  }
 0x124   : >> { %444 = vst [vmem:[%s426_s1] sm:$0x1] %v443_v8  ;;  %v778_v55 = vld [vmem:[%s2582_s23] sm:$0x1f]  ;;  %s546_s1 = smov [#allocation24]  ;;  %v305_v10 = vmov (%p401_p5), %v2524_v10  ;;  %v308_v11 = vmov (%p401_p5), %v2526_v11 }
 0x125   : >> { %464 = vst [vmem:[%s446_s26] sm:$0x1] %v463_v9  ;;  %v779_v57 = vld [vmem:[%s2586_s25] sm:$0x1f]  ;;  %s770_s26 = smov [#allocation24]  ;;  %v358_v10 = vmov (%p401_p5), %v2524_v10 }
 0x12a   : >> { %v468_v14 = vld [vmem:[%s467_s28] sm:$0xff]  ;;  %s574_s28 = smov [#allocation22] }
 0x12b   : >> { %v470_v12 = vld [vmem:[%s469_s27] sm:$0xff]  ;;  %v491_v27 = vand.u32 2147483647, %v468_v14  ;;  %s572_s27 = smov [#allocation21] }
 0x12c   : >> { %v474_v13 = vmul.f32 2.0, %v470_v12  ;;  %v472_v15 = vld [vmem:[%s471_s29] sm:$0xff]  ;;  %v492_v32 = vand.u32 2147483647, %v470_v12  ;;  %s2602_s29 = smov [#allocation8] }
 0x12d   : >> { %v473_v16 = vsub.f32 %v472_v15, %v468_v14  ;;  %v493_v28 = vand.u32 2147483647, %v472_v15 }
 0x12e   : >> { %2135 = vrcp.f32 %v474_v13 }
 0x12f   : >> { %v494_v31 = vmin.f32 %v491_v27, %v493_v28 }
 0x131   : >> { %v495_v33 = vmul.f32 1.1920929e-08, %v494_v31 }
 0x133   : >> { %vm496_vm11 = vcmp.le.f32.partialorder %v492_v32, %v495_v33 }
 0x138   : >> { %v2136_v17 = vpop.eup %2135 }
 0x139   : >> { %v476_v18 = vmul.f32 %v2136_v17, %v473_v16 }
 0x13b   : >> { %v478_v19 = vmul.f32 %v476_v18, %v476_v18  ;;  %vm477_vm10 = vcmp.ge.f32.partialorder %v476_v18, 0.0 }
 0x13d   : >> { %v479_v20 = vadd.f32 1.0, %v478_v19 }
 0x13f   : >> { %2137 = vrsqrt.f32 %v479_v20  ;;  %vm482_vm8 = vcmp.eq.f32.partialorder %v479_v20, inf  ;;  %v485_v22 = vand.u32 2147483648, %v479_v20  ;;  %vm484_vm9 = vcmp.eq.f32.partialorder %v479_v20, 0.0 }
 0x149   : >> { %v2138_v21 = vpop.eup %2137 }
 0x14a   : >> { %v481_v23 = vmul.f32 %v2138_v21, %v479_v20 }
 0x14c   : >> { %v483_v24 = vsel %vm482_vm8, %v479_v20, %v481_v23  ;;  %vm320_vm8 = vcmp.eq.s32.totalorder (%p401_p5), %v308_v11, %v305_v10  ;;  %v361_v11 = vmov (%p401_p5), %v2526_v11  ;;  %v324_v10 = vmov (%p401_p5), %v2524_v10 }
 0x14d   : >> { %v486_v25 = vsel %vm484_vm9, %v485_v22, %v483_v24  ;;  %v327_v11 = vmov (%p401_p5), %v2526_v11  ;;  %v341_v10 = vmov (%p401_p5), %v2524_v10  ;;  %vm373_vm9 = vcmp.eq.s32.totalorder (%p401_p5), %v361_v11, %v358_v10 }
 0x14e   : >> { %v487_v26 = vxor.u32 2147483648, %v486_v25  ;;  %v344_v11 = vmov (%p401_p5), %v2526_v11 }
 0x150   : >> { %v488_v29 = vsel %vm477_vm10, %v486_v25, %v487_v26 }
 0x151   : >> { %v489_v30 = vadd.f32 %v488_v29, %v476_v18 }
 0x153   : >> { %2139 = vrcp.f32 %v489_v30 }
 0x15d   : >> { %v2140_v34 = vpop.eup %2139 }
 0x15e   : >> { %v497_v35 = vsel %vm496_vm11, 0.0, %v2140_v34 }
 0x15f   : >> { %v498_v36 = vmul.f32 %v497_v35, %v497_v35  ;;  %v502_v37 = vmul.f32 %v497_v35, %v470_v12 }
 0x161   : >> { %v499_v38 = vadd.f32 1.0, %v498_v36  ;;  %v503_v39 = vsub.f32 %v468_v14, %v502_v37  ;;  %v505_v40 = vadd.f32 %v502_v37, %v472_v15 }
 0x163   : >> { %2141 = vrsqrt.f32 %v499_v38  ;;  %507 = vst [vmem:[%s506_s30] sm:$0xff] %v503_v39  ;;  %509 = vst [vmem:[%s508_s2] sm:$0xff] %v505_v40  ;;  %s2604_s30 = smov [#allocation14]  ;;  %s2606_s2 = smov [#allocation15] }
 0x16d   : >> { %v2142_v41 = vpop.eup %2141 }
 0x16e   : >> { %511 = vst [vmem:[%s510_s10] sm:$0xff] %v2142_v41  ;;  %v501_v42 = vmul.f32 %v2142_v41, %v497_v35  ;;  %s2608_s10 = smov [#allocation12] }
 0x170   : >> { %513 = vst [vmem:[%s512_s11] sm:$0xff] %v501_v42  ;;  %s2610_s11 = smov [#allocation10] }
 0x175   : >> { %v515_v43 = vld [vmem:[%s514_s12] ss:$0 sm:$0xff]  ;;  %s2612_s12 = smov [#allocation9] }
 0x176   : >> { %v524_v44 = vsel %vm523_vm12, %v515_v43, 0.0  ;;  %v573_v23 = vld [vmem:[%s572_s27] ss:$0 sm:$0xff]  ;;  %s744_s27 = smov [#allocation13] }
 0x177   : >> { %525 = vadd.xlane.f32.xlu0 %v524_v44  ;;  %v530_v45 = vld [vmem:[%s529_s3] ss:$0 sm:$0xff]  ;;  %s2616_s3 = smov [#allocation11] }
 0x178   : >> { %v539_v46 = vsel %vm538_vm13, %v530_v45, 0.0  ;;  %v575_v24 = vld [vmem:[%s574_s28] ss:$0 sm:$0xff]  ;;  %s721_s28 = smov [#allocation14] }
 0x17b   : >> { %540 = vadd.xlane.f32.xlu0 %v539_v46 }
 0x204   : >> { %v526_v47 = vpop.xlane.xlu0 %525 }
 0x205   : >> { %528 = vst [vmem:[%s527_s13] sm:$0xff] %v526_v47  ;;  %s2618_s13 = smov [#allocation13] }
 0x208   : >> { %v541_v48 = vpop.xlane.xlu0 %540 }
 0x209   : >> { %543 = vst [vmem:[%s542_s16] sm:$0xff] %v541_v48  ;;  %s641_s16 = smov [#allocation15] }
 0x20c   : >> { %v545_v56 = vld [vmem:[%s544_s14] sm:$0xff]  ;;  %s642_s14 = smov [#allocation20] }
 0x20d   : >> { %v769_v58 = vld [vmem:[%s768_s24] sm:$0xff]  ;;  %v556_v59 = vmul.f32 %v552_v49, %v545_v56  ;;  %v559_v60 = vmul.f32 %v553_v50, %v545_v56  ;;  %v563_v61 = vmul.f32 %v554_v51, %v545_v56  ;;  %v566_v62 = vmul.f32 %v555_v52, %v545_v56  ;;  %s657_s24 = smov [#allocation13] }
 0x20e   : >> { %v780_v63 = vmul.f32 %v776_v53, %v769_v58  ;;  %v783_v0 = vmul.f32 %v777_v54, %v769_v58  ;;  %v787_v1 = vmul.f32 %v778_v55, %v769_v58  ;;  %v790_v2 = vmul.f32 %v779_v57, %v769_v58 }
 0x210   : >> { %v547_v3 = vld [vmem:[%s546_s1] sm:$0xff]  ;;  %s2663_s1 = smov [#allocation15] }
 0x211   : >> { %v771_v4 = vld [vmem:[%s770_s26] sm:$0xff]  ;;  %v557_v5 = vmul.f32 %v554_v51, %v547_v3  ;;  %v560_v6 = vmul.f32 %v555_v52, %v547_v3  ;;  %v562_v7 = vmul.f32 %v552_v49, %v547_v3  ;;  %v565_v8 = vmul.f32 %v553_v50, %v547_v3  ;;  %s720_s26 = smov [#allocation12] }
 0x212   : >> { %v781_v9 = vmul.f32 %v778_v55, %v771_v4  ;;  %v784_v12 = vmul.f32 %v779_v57, %v771_v4  ;;  %v786_v13 = vmul.f32 %v776_v53, %v771_v4  ;;  %v789_v14 = vmul.f32 %v777_v54, %v771_v4  ;;  %v649_v55 = vld [vmem:[%s642_s14] ss:$0 sm:$0xff] }
 0x213   : >> { %v558_v15 = vsub.f32 %v556_v59, %v557_v5  ;;  %v561_v16 = vsub.f32 %v559_v60, %v560_v6  ;;  %v564_v17 = vadd.f32 %v563_v61, %v562_v7  ;;  %v567_v18 = vadd.f32 %v566_v62, %v565_v8 }
 0x214   : >> { %v782_v19 = vsub.f32 %v780_v63, %v781_v9  ;;  %v785_v20 = vsub.f32 %v783_v0, %v784_v12  ;;  %v788_v21 = vadd.f32 %v787_v1, %v786_v13  ;;  %v791_v22 = vadd.f32 %v790_v2, %v789_v14 }
 0x215   : >> { %569 = vst [vmem:[%s2572_s17] sm:$0x1f] %v561_v16  ;;  %571 = vst [vmem:[%s2576_s19] sm:$0x1f] %v567_v18  ;;  %s601_s17 = smov [#allocation19]  ;;  %s615_s19 = smov [#allocation13] }
 0x216   : >> { %568 = vst [vmem:[%s2570_s15] sm:$0x1f] %v558_v15  ;;  %570 = vst [vmem:[%s2574_s18] sm:$0x1f] %v564_v17  ;;  %s628_s15 = smov [#allocation14]  ;;  %s600_s18 = smov [#allocation12]  ;;  %v608_v59 = vld [vmem:[%s601_s17] ss:$0 sm:$0xff] }
 0x217   : >> { %792 = vst [vmem:[%s2578_s20] sm:$0x1f] %v782_v19  ;;  %793 = vst [vmem:[%s2580_s22] sm:$0x1f] %v785_v20  ;;  %s2660_s20 = smov [#allocation14]  ;;  %s2448_s22 = smov 1  }
 0x218   : >> { %794 = vst [vmem:[%s2582_s23] sm:$0x1f] %v788_v21  ;;  %795 = vst [vmem:[%s2586_s25] sm:$0x1f] %v791_v22  ;;  %s656_s23 = smov [#allocation12]  ;;  %s2449_s25 = smov 127  }
 0x21c   : >> { %v583_v26 = vld [vmem:[%s2606_s2] sm:$0x1f] }
 0x21d   : >> { %v582_v25 = vld [vmem:[%s2604_s30] sm:$0x1f]  ;;  %v591_v32 = vmul.f32 %v583_v26, %v575_v24  ;;  %v594_v38 = vmul.f32 %v583_v26, %v573_v23 }
 0x21e   : >> { %v580_v27 = vld [vmem:[%s2608_s10] sm:$0x1f]  ;;  %v590_v31 = vmul.f32 %v582_v25, %v573_v23  ;;  %v593_v33 = vmul.f32 %v582_v25, %v575_v24 }
 0x21f   : >> { %v798_v28 = vld [vmem:[%s2602_s29] ss:$0 sm:$0xff]  ;;  %v1627_v30 = vld [vmem:[%s2602_s29 + $0x4] ss:$0 sm:$0xff]  ;;  %v584_v44 = vmul.f32 %v580_v27, %v573_v23  ;;  %v587_v45 = vmul.f32 %v580_v27, %v575_v24 }
 0x220   : >> { %v1626_v29 = vld [vmem:[%s2602_s29 - $0x1] sm:$0x1e]  ;;  %v1631_v41 = vld [vmem:[%s2612_s12 + $0x4] ss:$0 sm:$0xff]  ;;  %v592_v43 = vsub.f32 %v590_v31, %v591_v32  ;;  %v595_v49 = vadd.f32 %v594_v38, %v593_v33 }
 0x221   : >> { %v805_v34 = vsel %vm728_vm14, %v798_v28, %v1626_v29  ;;  %v809_v35 = vld [vmem:[%s2610_s11] ss:$0 sm:$0xff]  ;;  %v1629_v36 = vld [vmem:[%s2610_s11 + $0x1] sm:$0xf] }
 0x222   : >> { %v822_v37 = vld [vmem:[%s2612_s12] ss:$0 sm:$0xff]  ;;  %808 = vst [vmem:[%s2602_s29] sm:$0x1f] %v805_v34  ;;  %v817_v39 = vsel %vm740_vm15, %v1627_v30, %v1629_v36  ;;  %v1633_v47 = vld [vmem:[%s2616_s3 + $0x1] sm:$0xf]  ;;  %598 = vst [vmem:[%s2604_s30] sm:$0x1f] %v592_v43 }
 0x223   : >> { %v1630_v40 = vld [vmem:[%s2612_s12 - $0x1] sm:$0x1e]  ;;  %1628 = vst [vmem:[%s2602_s29 + $0x1] sm:$0x1] %v809_v35  ;;  %819 = vst [vmem:[%s2610_s11] sm:$0x1f] %v817_v39  ;;  %v841_v50 = vsel %vm740_vm15, %v1631_v41, %v1633_v47  ;;  %s745_s29 = smov [#allocation15] }
 0x224   : >> { %v833_v42 = vld [vmem:[%s2616_s3] ss:$0 sm:$0xff]  ;;  %v829_v46 = vsel %vm728_vm14, %v822_v37, %v1630_v40  ;;  %599 = vst [vmem:[%s2606_s2] sm:$0x1f] %v595_v49  ;;  %s844_s30 = sadd.s32 (%p401_p5), 1, %s2409_s0   ;;  %s309_s2 = smov (%p401_p5), [#allocation12] }
 0x225   : >> { %v581_v48 = vld [vmem:[%s2618_s13] sm:$0x1f]  ;;  %832 = vst [vmem:[%s2612_s12] sm:$0x1f] %v829_v46  ;;  %843 = vst [vmem:[%s2616_s3] sm:$0x1f] %v841_v50  ;;  %s345_s11 = smov (%p401_p5), [#allocation14]  ;;  %p397_p6 = scmp.ge.s32.totalorder (%p401_p5), %s844_s30, 15 }
 0x226   : >> { %v585_v51 = vmul.f32 %v581_v48, %v575_v24  ;;  %v588_v52 = vmul.f32 %v581_v48, %v573_v23  ;;  %1632 = vst [vmem:[%s2612_s12 + $0x1] sm:$0x1] %v833_v42  ;;  %s362_s12 = smov (%p401_p5), [#allocation15]  ;;  %s2752_s0 = smov (%p401_p5), %s844_s30 }
 0x228   : >> { %v586_v53 = vsub.f32 %v584_v44, %v585_v51  ;;  %v589_v54 = vadd.f32 %v588_v52, %v587_v45 }
 0x229   : >> { %v635_v56 = vld [vmem:[%s628_s15] sm:$0x1f] }
 0x22a   : >> { %596 = vst [vmem:[%s2608_s10] sm:$0x1f] %v586_v53  ;;  %597 = vst [vmem:[%s2618_s13] sm:$0x1f] %v589_v54  ;;  %v639_v57 = vsel %vm638_vm0, 0.0, %v635_v56  ;;  %s328_s10 = smov (%p401_p5), [#allocation13] }
 0x22b   : >> { %v650_v58 = vld [vmem:[%s641_s16] sm:$0x1f]  ;;  %640 = vst [vmem:[%s628_s15] sm:$0x1f] %v639_v57 }
 0x22c   : >> { %v654_v60 = vsel %vm653_vm1, %v649_v55, %v650_v58 }
 0x22d   : >> { %655 = vst [vmem:[%s641_s16] sm:$0x1f] %v654_v60 }
 0x231   : >> { %v609_v61 = vld [vmem:[%s600_s18] sm:$0x1f] }
 0x232   : >> { %v622_v62 = vld [vmem:[%s615_s19] sm:$0x1f]  ;;  %v613_v63 = vsel %vm612_vm3, %v608_v59, %v609_v61 }
 0x233   : >> { %v626_v0 = vsel %vm625_vm4, 0.0, %v622_v62  ;;  %614 = vst [vmem:[%s600_s18] sm:$0x1f] %v613_v63  ;;  %v694_v1 = vld [vmem:[%s2660_s20] sm:$0x1f] }
 0x234   : >> { %627 = vst [vmem:[%s615_s19] sm:$0x1f] %v626_v0  ;;  %695 = vrot.lane.b32.xlu0 %v694_v1, %s2448_s22  ;;  %v690_v5 = vld [vmem:[%s2663_s1] sm:$0x1f] }
 0x235   : >> { %v711_v6 = vld [vmem:[%s2663_s1] sm:$0x1f] }
 0x236   : >> { %v693_v26 = vld [vmem:[%s2660_s20] sm:$0x1f] }
 0x23a   : >> { %v662_v2 = vld [vmem:[%s656_s23] sm:$0x1f] }
 0x23b   : >> { %663 = vrot.lane.b32.xlu1 %v662_v2, %s2448_s22  ;;  %v658_v3 = vld [vmem:[%s657_s24] sm:$0x1f] }
 0x23c   : >> { %v679_v4 = vld [vmem:[%s657_s24] sm:$0x1f] }
 0x23d   : >> { %v661_v14 = vld [vmem:[%s656_s23] sm:$0x1f] }
 0x23f   : >> { %659 = vrot.lane.b32.xlu1 %v658_v3, %s2448_s22 }
 0x243   : >> { %680 = vrot.lane.b32.xlu1 %v679_v4, %s2449_s25 }
 0x247   : >> { %691 = vrot.lane.b32.xlu1 %v690_v5, %s2448_s22 }
 0x24b   : >> { %712 = vrot.lane.b32.xlu1 %v711_v6, %s2449_s25 }
 0x2a6   : >> { %v696_v16 = vpop.permute.xlu0 %695 }
 0x2a7   : >> { %v700_v18 = vsel %vm667_vm5, %v694_v1, %v696_v16 }
 0x2ad   : >> { %v664_v7 = vpop.permute.xlu1 %663 }
 0x2ae   : >> { %v668_v8 = vsel %vm667_vm5, %v662_v2, %v664_v7 }
 0x2b1   : >> { %v660_v9 = vpop.permute.xlu1 %659 }
 0x2b2   : >> { %v672_v12 = vsel %vm671_vm6, %v660_v9, %v668_v8 }
 0x2b3   : >> { %v678_v13 = vsel %vm1405_vm2, %v672_v12, 0.0 }
 0x2b4   : >> { %686 = vst [vmem:[%s656_s23] sm:$0x1f] %v678_v13 }
 0x2b5   : >> { %v681_v15 = vpop.permute.xlu1 %680 }
 0x2b6   : >> { %v685_v17 = vsel %vm684_vm7, %v661_v14, %v681_v15 }
 0x2b7   : >> { %687 = vst [vmem:[%s657_s24] sm:$0x1f] %v685_v17 }
 0x2b9   : >> { %v692_v19 = vpop.permute.xlu1 %691 }
 0x2ba   : >> { %v704_v20 = vsel %vm671_vm6, %v692_v19, %v700_v18 }
 0x2bb   : >> { %v722_v21 = vld [vmem:[%s720_s26] ss:$0 sm:$0xff]  ;;  %v1619_v23 = vld [vmem:[%s720_s26 + $0x4] ss:$0 sm:$0xff]  ;;  %v710_v25 = vsel %vm1405_vm2, %v704_v20, 0.0 }
 0x2bc   : >> { %v1618_v22 = vld [vmem:[%s720_s26 - $0x1] sm:$0x1e]  ;;  %718 = vst [vmem:[%s2660_s20] sm:$0x1f] %v710_v25 }
 0x2bd   : >> { %v729_v24 = vsel %vm728_vm14, %v722_v21, %v1618_v22  ;;  %v713_v27 = vpop.permute.xlu1 %712 }
 0x2be   : >> { %732 = vst [vmem:[%s720_s26] sm:$0x1f] %v729_v24  ;;  %v746_v28 = vld [vmem:[%s744_s27] ss:$0 sm:$0xff]  ;;  %v1623_v30 = vld [vmem:[%s744_s27 + $0x4] ss:$0 sm:$0xff]  ;;  %v717_v31 = vsel %vm684_vm7, %v693_v26, %v713_v27 }
 0x2bf   : >> { %v1622_v29 = vld [vmem:[%s744_s27 - $0x1] sm:$0x1e]  ;;  %719 = vst [vmem:[%s2663_s1] sm:$0x1f] %v717_v31 }
 0x2c0   : >> { %v753_v32 = vsel %vm728_vm14, %v746_v28, %v1622_v29 }
 0x2c1   : >> { %756 = vst [vmem:[%s744_s27] sm:$0x1f] %v753_v32 }
 0x2c3   : >> { %v733_v33 = vld [vmem:[%s721_s28] ss:$0 sm:$0xff]  ;;  %v1621_v34 = vld [vmem:[%s721_s28 + $0x1] sm:$0xf] }
 0x2c4   : >> { %1620 = vst [vmem:[%s720_s26 + $0x1] sm:$0x1] %v733_v33  ;;  %v741_v35 = vsel %vm740_vm15, %v1619_v23, %v1621_v34  ;;  %403 = sbr.rel (!%p401_p5) target bundleno = 276 (0x114), region = 435 }
 0x2c5   : >> { %743 = vst [vmem:[%s721_s28] sm:$0x1f] %v741_v35 }
 0x2c6   : >> { %v757_v36 = vld [vmem:[%s745_s29] ss:$0 sm:$0xff]  ;;  %v1625_v37 = vld [vmem:[%s745_s29 + $0x1] sm:$0xf] }
 0x2c7   : >> { %1624 = vst [vmem:[%s744_s27 + $0x1] sm:$0x1] %v757_v36  ;;  %v765_v38 = vsel %vm740_vm15, %v1623_v30, %v1625_v37 }
 0x2c8   : >> { %767 = vst [vmem:[%s745_s29] sm:$0x1f] %v765_v38 }
 0x2cb   : > { %v315_v39 = vld [vmem:[%s309_s2] sm:$0x1f] }
 0x2cc   : > { %v316_v41 = vsel %vm1405_vm2, %v315_v39, 0.0  ;;  %v351_v43 = vld [vmem:[%s345_s11] sm:$0x1f] }
 0x2cd   : > { %v317_v45 = vmul.f32 %v316_v41, %v316_v41  ;;  %v352_v47 = vsel %vm1405_vm2, %v351_v43, 0.0 }
 0x2ce   : > { %v334_v40 = vld [vmem:[%s328_s10] sm:$0x1f]  ;;  %v353_v49 = vmul.f32 %v352_v47, %v352_v47 }
 0x2cf   : > { %v335_v42 = vsel %vm1405_vm2, %v334_v40, 0.0  ;;  %v368_v44 = vld [vmem:[%s362_s12] sm:$0x1f]  ;;  %v321_v52 = vsel %vm320_vm8, 0.0, %v317_v45 }
 0x2d0   : > { %v336_v46 = vmul.f32 %v335_v42, %v335_v42  ;;  %v369_v48 = vsel %vm1405_vm2, %v368_v44, 0.0 }
 0x2d1   : > { %v370_v51 = vmul.f32 %v369_v48, %v369_v48 }
 0x2d2   : > { %v338_v50 = vadd.f32 %v336_v46, %v317_v45  ;;  %v337_v53 = vadd.f32 %v336_v46, %v321_v52 }
 0x2d3   : > { %v374_v56 = vsel %vm373_vm9, 0.0, %v370_v51 }
 0x2d4   : > { %v355_v54 = vadd.f32 %v353_v49, %v338_v50  ;;  %v354_v55 = vadd.f32 %v353_v49, %v337_v53 }
 0x2d6   : > { %v376_v57 = vadd.f32 %v370_v51, %v355_v54  ;;  %v375_v58 = vadd.f32 %v374_v56, %v354_v55 }
 0x2d8   : > { %377 = vadd.xlane.f32.xlu0 %v376_v57 }
 0x2dc   : > { %385 = vadd.xlane.f32.xlu0 %v375_v58 }
 0x365   : > { %v378_v59 = vpop.xlane.xlu0 %377 }
 0x366   : > { %v379_v60 = vrot.slane %v378_v59, 4 }
 0x368   : > { %v380_v61 = vadd.f32 %v379_v60, %v378_v59 }
 0x369   : > { %v386_v62 = vpop.xlane.xlu0 %385 }
 0x36a   : > { %v381_v63 = vrot.slane %v380_v61, 2  ;;  %v387_v0 = vrot.slane %v386_v62, 4 }
 0x36c   : > { %v388_v1 = vadd.f32 %v387_v0, %v386_v62  ;;  %v382_v2 = vadd.f32 %v381_v63, %v380_v61 }
 0x36e   : > { %v389_v3 = vrot.slane %v388_v1, 2  ;;  %v383_v5 = vrot.slane %v382_v2, 1 }
 0x370   : > { %v390_v4 = vadd.f32 %v389_v3, %v388_v1  ;;  %v384_v8 = vadd.f32 %v383_v5, %v382_v2 }
 0x372   : > { %v391_v6 = vrot.slane %v390_v4, 1 }
 0x374   : > { %v392_v7 = vadd.f32 %v391_v6, %v390_v4 }
 0x376   : > { %1660 = vpush %v392_v7 }
 0x377   : > { %1662 = vpush %v384_v8 }
 0x3a7   : > { %s1661_s21 = spop %1660 }
 0x3a8   : > { %s1663_s3 = spop %1662 }
 0x3a9   : > { %s395_s13 = smul.f32 1e-10, %s1663_s3 }
 0x3ab   : > { %p396_p7 = scmp.le.f32.partialorder %s1661_s21, %s395_s13 }
 0x3ad   : > { %p398_p8 = por %p397_p6, %p396_p7 }
 0x3af   :  { %846 = sbr.rel (!%p398_p8) target bundleno = 275 (0x113), region = 446 }
 0x3b6 PF:  { %s847_s14 = smov [#allocation12]  ;;  %v851_v10 = vmov %v2524_v10  ;;  %v854_v11 = vmov %v2526_v11  ;;  %s867_s15 = smov [#allocation15] }
 0x3b7   :  { %v871_v10 = vmov %v2524_v10  ;;  %v874_v11 = vmov %v2526_v11  ;;  %v855_v9 = vld [vmem:[%s847_s14] sm:$0x1f]  ;;  %vm858_vm10 = vcmp.eq.s32.totalorder %v854_v11, %v851_v10  ;;  %s848_s0 = smov [#allocation4]  ;;  %s868_s16 = smov [#allocation6] }
 0x3b8   :  { %vm878_vm11 = vcmp.eq.s32.totalorder %v874_v11, %v871_v10  ;;  %v859_v12 = vsel %vm858_vm10, %v855_v9, 0.0  ;;  %v875_v13 = vld [vmem:[%s867_s15] sm:$0x1f]  ;;  %s2415_s24 = smov %s2748_s6   ;;  %s2419_s25 = smov [#allocation8]  }
 0x3b9   :  { %v860_v14 = vrot.slane %v859_v12, 4  ;;  %v879_v15 = vsel %vm878_vm11, %v875_v13, 0.0 }
 0x3ba   :  { %v880_v16 = vrot.slane %v879_v15, 4 }
 0x3bb   :  { %v861_v17 = vadd.f32 %v860_v14, %v859_v12 }
 0x3bc   :  { %v881_v18 = vadd.f32 %v880_v16, %v879_v15 }
 0x3bd   :  { %v862_v19 = vrot.slane %v861_v17, 2 }
 0x3be   :  { %v882_v20 = vrot.slane %v881_v18, 2 }
 0x3bf   :  { %v863_v21 = vadd.f32 %v862_v19, %v861_v17 }
 0x3c0   :  { %v883_v22 = vadd.f32 %v882_v20, %v881_v18 }
 0x3c1   :  { %v864_v23 = vrot.slane %v863_v21, 1 }
 0x3c2   :  { %v884_v24 = vrot.slane %v883_v22, 1 }
 0x3c3   :  { %v865_v25 = vadd.f32 %v864_v23, %v863_v21 }
 0x3c4   :  { %v885_v26 = vadd.f32 %v884_v24, %v883_v22 }
 0x3c5   :  { %866 = vst [vmem:[%s848_s0] sm:$0x1] %v865_v25 }
 0x3c6   :  { %886 = vst [vmem:[%s868_s16] sm:$0x1] %v885_v26 }
 0x3cc   :  { %v890_v10 = vld [vmem:[#allocation4] sm:$0x1] }
 0x3cd   :  { %892 = vst [vmem:[#allocation5] sm:$0x1] %v890_v10  ;;  %v896_v11 = vld [vmem:[#allocation6] sm:$0x1] }
 0x3ce   :  { %898 = vst [vmem:[#allocation7] sm:$0x1] %v896_v11 }
 0x3d4   :  { %v961_v27 = vld [vmem:[#allocation5] sm:$0x1] }
 0x3d5   :  { %962 = vst [vmem:[%s2746_s4] sm:$0x1] %v961_v27  ;;  %v1025_v28 = vld [vmem:[#allocation7] sm:$0x1] }
 0x3d6   :  { %1026 = vst [vmem:[%s2747_s5] sm:$0x1] %v1025_v28 }
 0x3d7 LB: > { %v1074_v29 = vld [vmem:[%s2421_s25] sm:$0xff]  ;;  %s1076_s25 = scalar_lea.vmem %s2421_s25, 8   ;;  %s2421_s25 = sphi %s2419_s25, %s1076_s25   ;;  %s2417_s24 = sphi %s2415_s24, %s1077_s24  }
 0x3d8   : > { %1075 = vst [vmem:[%s2417_s24] sm:$0xff] %v1074_v29  ;;  %s1077_s24 = scalar_lea.vmem %s2417_s24, 8   ;;  %p1071_p9 = scmp.gt.s32.totalorder %s1076_s25, [#allocation8] }
 0x3d9   :  { %s2423_s5 = smov (%p1071_p9), %s2749_s7   ;;  %s2427_s26 = smov (%p1071_p9), [#allocation9]  }
 0x3da   :  { %1073 = sbr.rel (!%p1071_p9) target bundleno = 983 (0x3d7), region = 512 }
 0x3e1 LB: > { %v1136_v30 = vld [vmem:[%s2429_s26] sm:$0xff]  ;;  %s1138_s26 = scalar_lea.vmem %s2429_s26, 8   ;;  %s2429_s26 = sphi %s2427_s26, %s1138_s26   ;;  %s2425_s5 = sphi %s2423_s5, %s1139_s5  }
 0x3e2   : > { %1137 = vst [vmem:[%s2425_s5] sm:$0xff] %v1136_v30  ;;  %s1139_s5 = scalar_lea.vmem %s2425_s5, 8   ;;  %p1133_p10 = scmp.gt.s32.totalorder %s1138_s26, [#allocation9] }
 0x3e3   :  { %s2431_s28 = smov (%p1133_p10), %s2750_s8   ;;  %s2435_s29 = smov (%p1133_p10), [#allocation10]  }
 0x3e4   :  { %1135 = sbr.rel (!%p1133_p10) target bundleno = 993 (0x3e1), region = 534 }
 0x3eb LB: > { %v1198_v31 = vld [vmem:[%s2437_s29] sm:$0xff]  ;;  %s1200_s29 = scalar_lea.vmem %s2437_s29, 8   ;;  %s2437_s29 = sphi %s2435_s29, %s1200_s29   ;;  %s2433_s28 = sphi %s2431_s28, %s1201_s28  }
 0x3ec   : > { %1199 = vst [vmem:[%s2433_s28] sm:$0xff] %v1198_v31  ;;  %s1201_s28 = scalar_lea.vmem %s2433_s28, 8   ;;  %p1195_p11 = scmp.gt.s32.totalorder %s1200_s29, [#allocation10] }
 0x3ed   :  { %s2439_s2 = smov (%p1195_p11), %s2751_s9   ;;  %s2443_s10 = smov (%p1195_p11), [#allocation11]  }
 0x3ee   :  { %1197 = sbr.rel (!%p1195_p11) target bundleno = 1003 (0x3eb), region = 556 }
 0x3f5 LB: > { %v1260_v32 = vld [vmem:[%s2445_s10] sm:$0xff]  ;;  %s1262_s10 = scalar_lea.vmem %s2445_s10, 8   ;;  %s2445_s10 = sphi %s2443_s10, %s1262_s10   ;;  %s2441_s2 = sphi %s2439_s2, %s1263_s2  }
 0x3f6   : > { %1261 = vst [vmem:[%s2441_s2] sm:$0xff] %v1260_v32  ;;  %s1263_s2 = scalar_lea.vmem %s2441_s2, 8   ;;  %p1257_p12 = scmp.gt.s32.totalorder %s1262_s10, [#allocation11] }
 0x3f8   :  { %1259 = sbr.rel (!%p1257_p12) target bundleno = 1013 (0x3f5), region = 578 }

// kernel: reverse
= control target key start
LH: loop header
LB: loop body
LE: loop exit
PB: predicated region body
PF: predicated region fallthrough
CT: control target
= control target key end

     0   :  { %v2_v0 = vlaneseq  ;;  %s123_s0 = inlined_call_operand.vmem [shape: f32[10], index: 0, kind: input, shape index: {}]   ;;  %s124_s1 = inlined_call_operand.vmem [shape: f32[10], index: 1, kind: output, shape index: {}]  }
   0x2   :  { %v3_v1 = vsub.s32 9, %v2_v0 }
   0x4   :  { %4 = vset.pattern.permute.xlu0 %v3_v1 }
   0x5   :  { %v43_v2 = vld [vmem:[#allocation1] sm:$0x1]  ;;  %v21_v3 = vld [vmem:[%s123_s0] sm:$0x1]  ;;  %v58_v10 = vshrl.u32 %v2_v0, 7 }
   0x6   :  { %44 = vst [vmem:[#allocation0] sm:$0x1] %v43_v2  ;;  %22 = vst [vmem:[#allocation1 + $0x1] sm:$0x1] %v21_v3 }
   0x7   :  { %vm59_vm0 = vcmp.lt.s32.totalorder %v58_v10, 1 }
   0xd   :  { %v46_v4 = vld [vmem:[#allocation0 + $0x7] ss:$-1 sm:$0xff]  ;;  %v40_v5 = vld [vmem:[#allocation1 + $0x1] sm:$0x1] }
   0xe   :  { %v47_v6 = vrot.slane %v46_v4, 7  ;;  %42 = vst [vmem:[#allocation0 + $0x8] sm:$0x1] %v40_v5 }
  0x10   :  { %48 = vperm.xlu0 %4, %v47_v6  }
  0x15   :  { %v53_v7 = vld [vmem:[#allocation0 + $0xf] ss:$-1 sm:$0xff] }
  0x16   :  { %v54_v8 = vrot.slane %v53_v7, 7 }
  0x18   :  { %55 = vperm.xlu0 %4, %v54_v8  }
  0x8f   :  { %v49_v9 = vpop.permute.xlu0 %48 }
  0x90   :  { %50 = vst [vmem:[#allocation2] sm:$0xff] %v49_v9 }
  0x97   :  { %v56_v11 = vpop.permute.xlu0 %55 }
  0x98   :  { %60 = vst.msk [vmem:[#allocation2] sm:$0xff] %vm59_vm0, %v56_v11 }
  0x9f   :  { %v64_v12 = vld [vmem:[#allocation2] sm:$0x1] }
  0xa0   :  { %66 = vst [vmem:[#allocation3] sm:$0x1] %v64_v12 }
  0xa7   :  { %v82_v13 = vld [vmem:[#allocation3] sm:$0x1] }
  0xa8   :  { %83 = vst [vmem:[%s124_s1] sm:$0x1] %v82_v13 }

// kernel: custom-call.27
= control target key start
LH: loop header
LB: loop body
LE: loop exit
PB: predicated region body
PF: predicated region fallthrough
CT: control target
= control target key end

     0   :  { %v395_v2 = vmov 0.0   ;;  %s418_s13 = smov 0   ;;  %s502_s0 = inlined_call_operand.vmem [shape: f32[10,10], index: 0, kind: input, shape index: {}]   ;;  %s503_s1 = inlined_call_operand.vmem [shape: f32[10,10], index: 1, kind: output, shape index: {0}]   ;;  %s504_s2 = inlined_call_operand.vmem [shape: f32[10], index: 2, kind: output, shape index: {1}]  }
   0x1   :  { %v33_v0 = vld [vmem:[%s502_s0] sm:$0xff]  ;;  %v35_v1 = vld [vmem:[%s502_s0 + $0x8] sm:$0xff]  ;;  %46 = vst [vmem:[#allocation2] sm:$0x1] %v395_v2 }
   0x2   :  { %41 = vst [vmem:[#allocation1] sm:$0xff] %v33_v0  ;;  %45 = vst [vmem:[#allocation1 + $0x8] sm:$0xff] %v35_v1 }
   0x3 LB: > { %v54_v3 = vlaneseq  ;;  %v427_v6 = vstv %s393_s13  ;;  %s91_s0 = scalar_lea.vmem [#allocation1], %s393_s13  ;;  %s127_s14 = smov [#allocation1]  ;;  %s393_s13 = sphi %s418_s13, %s52_s13  }
   0x4   : > { %s167_s15 = scalar_lea.vmem [#allocation4], %s393_s13  ;;  %s183_s16 = smov [#allocation1] }
   0x5   : > { %v424_v5 = vshrl.u32 %v54_v3, 7  ;;  %v453_v54 = vand.u32 127, %v54_v3  ;;  %s184_s17 = smov [#allocation4] }
   0x7   : > { %vm58_vm0 = vcmp.gt.s32.totalorder %v424_v5, %v427_v6  ;;  %v65_v7 = vadd.s32 8, %v424_v5  ;;  %v130_v5 = vmov %v424_v5  ;;  %vm457_vm14 = vcmp.eq.s32.totalorder %v453_v54, %v427_v6 }
   0x8   : > { %v149_v50 = vadd.s32 8, %v130_v5  ;;  %vm134_vm12 = vcmp.gt.s32.totalorder %v130_v5, %v427_v6  ;;  %v187_v5 = vmov %v424_v5 }
   0x9   : > { %v53_v4 = vld [vmem:[#allocation1] sm:$0xff]  ;;  %v62_v9 = vld [vmem:[#allocation1 + $0x8] sm:$0xff]  ;;  %vm67_vm1 = vcmp.gt.s32.totalorder %v65_v7, %v427_v6  ;;  %vm68_vm2 = vcmp.lt.s32.totalorder %v65_v7, 10  ;;  %v180_v7 = vld [vmem:[#allocation2] ss:$0 sm:$0xff] }
   0xa   : > { %v59_v8 = vsel %vm58_vm0, %v53_v4, 0.0  ;;  %vm69_vm3 = vmand %vm67_vm1, %vm68_vm2  ;;  %v92_v20 = vld [vmem:[%s91_s0] ss:$0 sm:$0xff]  ;;  %vm151_vm10 = vcmp.gt.s32.totalorder %v149_v50, %v427_v6  ;;  %vm152_vm11 = vcmp.lt.s32.totalorder %v149_v50, 10  ;;  %v361_v53 = vld [vmem:[%s127_s14 + $0x8] sm:$0xff]  ;;  %vm220_vm2 = vcmp.gt.s32.totalorder %v453_v54, %v427_v6 }
   0xb   : > { %v60_v10 = vmul.f32 %v59_v8, %v59_v8  ;;  %v70_v11 = vsel %vm69_vm3, %v62_v9, 0.0  ;;  %v93_v21 = vand.u32 2147483647, %v92_v20  ;;  %vm118_vm9 = vcmp.lt.f32.partialorder %v92_v20, 0.0  ;;  %v131_v52 = vld [vmem:[%s127_s14] sm:$0xff]  ;;  %vm153_vm13 = vmand %vm151_vm10, %vm152_vm11 }
   0xc   : > { %v71_v12 = vmul.f32 %v70_v11, %v70_v11  ;;  %v135_v56 = vsel %vm134_vm12, %v131_v52, 0.0  ;;  %v154_v57 = vsel %vm153_vm13, %v361_v53, 0.0 }
   0xd   : > { %v94_v26 = vmax.f32 %v93_v21, 0.0 }
   0xe   : > { %v72_v13 = vadd.f32 %v71_v12, %v60_v10  ;;  %v396_v12 = vmov 1.0  }
  0x10   : > { %v73_v14 = vrot.slane %v72_v13, 4 }
  0x12   : > { %v74_v15 = vadd.f32 %v73_v14, %v72_v13  ;;  %v192_v13 = vadd.s32 8, %v187_v5  ;;  %v190_v14 = vld [vmem:[%s183_s16] sm:$0xff]  ;;  %v211_v5 = vmov %v424_v5 }
  0x13   : > { %vm228_vm0 = vcmp.ge.s32.totalorder %v211_v5, %v427_v6 }
  0x14   : > { %v75_v16 = vrot.slane %v74_v15, 2  ;;  %vm198_vm15 = vcmp.lt.s32.totalorder %v192_v13, 10  ;;  %vm229_vm3 = vmand %vm457_vm14, %vm228_vm0 }
  0x16   : > { %v76_v17 = vadd.f32 %v75_v16, %v74_v15  ;;  %v363_v15 = vld [vmem:[%s183_s16 + $0x8] sm:$0xff]  ;;  %s207_s16 = smov %s183_s16 }
  0x17   : > { %s253_s18 = scalar_lea.vmem %s207_s16, %s393_s13  ;;  %s52_s13 = sadd.s32 1, %s393_s13  }
  0x18   : > { %v77_v18 = vrot.slane %v76_v17, 1  ;;  %p49_p0 = scmp.ge.s32.totalorder %s52_s13, 10  }
  0x1a   : > { %v433_v19 = vadd.f32 %v77_v18, %v76_v17 }
  0x1c   : > { %377 = vrsqrt.f32 %v433_v19  ;;  %vm81_vm4 = vcmp.eq.f32.partialorder %v433_v19, inf  ;;  %v84_v23 = vand.u32 2147483648, %v433_v19  ;;  %vm83_vm5 = vcmp.eq.f32.partialorder %v433_v19, 0.0 }
  0x26   : > { %v378_v22 = vpop.eup %377 }
  0x27   : > { %v80_v24 = vmul.f32 %v378_v22, %v433_v19 }
  0x29   : > { %v82_v25 = vsel %vm81_vm4, %v433_v19, %v80_v24 }
  0x2a   : > { %v85_v27 = vsel %vm83_vm5, %v84_v23, %v82_v25 }
  0x2b   : > { %v95_v28 = vand.u32 2147483647, %v85_v27  ;;  %v232_v27 = vadd.s32 8, %v211_v5 }
  0x2d   : > { %v96_v29 = vmax.f32 %v94_v26, %v95_v28  ;;  %vm249_vm1 = vcmp.ge.s32.totalorder %v232_v27, %v427_v6 }
  0x2e   : > { %vm250_vm4 = vmand %vm457_vm14, %vm249_vm1 }
  0x2f   : > { %379 = vrcp.f32 %v96_v29  ;;  %vm108_vm8 = vcmp.eq.f32.partialorder %v96_v29, 0.0 }
  0x39   : > { %v380_v30 = vpop.eup %379 }
  0x3a   : > { %v98_v31 = vmul.f32 %v380_v30, %v93_v21  ;;  %v101_v32 = vmul.f32 0.0, %v380_v30  ;;  %v105_v33 = vmul.f32 %v380_v30, %v95_v28 }
  0x3c   : > { %v99_v34 = vmul.f32 %v98_v31, %v98_v31  ;;  %v102_v35 = vmul.f32 %v101_v32, %v101_v32  ;;  %v106_v36 = vmul.f32 %v105_v33, %v105_v33  ;;  %v365_v33 = vld [vmem:[%s207_s16 + $0x8] sm:$0xff] }
  0x3e   : > { %v103_v37 = vadd.f32 %v102_v35, %v99_v34 }
  0x40   : > { %v107_v38 = vadd.f32 %v106_v36, %v103_v37 }
  0x42   : > { %381 = vrsqrt.f32 %v107_v38  ;;  %vm111_vm6 = vcmp.eq.f32.partialorder %v107_v38, inf  ;;  %v114_v40 = vand.u32 2147483648, %v107_v38  ;;  %vm113_vm7 = vcmp.eq.f32.partialorder %v107_v38, 0.0 }
  0x4c   : > { %v382_v39 = vpop.eup %381 }
  0x4d   : > { %v110_v41 = vmul.f32 %v382_v39, %v107_v38 }
  0x4f   : > { %v112_v42 = vsel %vm111_vm6, %v107_v38, %v110_v41 }
  0x50   : > { %v115_v43 = vsel %vm113_vm7, %v114_v40, %v112_v42 }
  0x51   : > { %v116_v44 = vmul.f32 %v115_v43, %v96_v29  ;;  %v218_v29 = vld [vmem:[%s207_s16] sm:$0xff] }
  0x53   : > { %v117_v45 = vsel %vm108_vm8, 0.0, %v116_v44 }
  0x54   : > { %v119_v46 = vxor.u32 2147483648, %v117_v45 }
  0x56   : > { %v120_v47 = vsel %vm118_vm9, %v117_v45, %v119_v46 }
  0x57   : > { %v447_v48 = vsel %vm83_vm5, %v92_v20, %v120_v47  ;;  %383 = vrcp.f32 %v120_v47  ;;  %v121_v51 = vsub.f32 %v120_v47, %v92_v20 }
  0x58   : > { %v126_v49 = vsub.f32 %v92_v20, %v447_v48 }
  0x5a   : > { %385 = vrcp.f32 %v126_v49 }
  0x61   : > { %v384_v55 = vpop.eup %383 }
  0x62   : > { %v123_v58 = vmul.f32 %v384_v55, %v121_v51 }
  0x64   : > { %v386_v59 = vpop.eup %385  ;;  %v125_v61 = vsel %vm83_vm5, 0.0, %v123_v58 }
  0x65   : > { %v137_v62 = vmul.f32 %v386_v59, %v135_v56  ;;  %v156_v63 = vmul.f32 %v386_v59, %v154_v57  ;;  %v173_v0 = vsel %vm457_vm14, %v125_v61, 0.0 }
  0x66   : > { %174 = vadd.xlane.f32.xlu1 %v173_v0 }
  0x67   : > { %v138_v1 = vsel %vm83_vm5, 0.0, %v137_v62  ;;  %v157_v2 = vsel %vm83_vm5, 0.0, %v156_v63 }
  0x68   : > { %v143_v3 = vsel %vm457_vm14, %v138_v1, 0.0  ;;  %v162_v4 = vsel %vm457_vm14, %v157_v2, 0.0 }
  0x69   : > { %144 = vadd.xlane.f32.xlu0 %v143_v3 }
  0x6d   : > { %163 = vadd.xlane.f32.xlu0 %v162_v4 }
  0xf3   : > { %v175_v8 = vpop.xlane.xlu1 %174 }
  0xf4   : > { %v181_v9 = vsel %vm457_vm14, %v175_v8, %v180_v7 }
  0xf5   : > { %182 = vst [vmem:[#allocation2] sm:$0x1] %v181_v9 }
  0xf6   : > { %v145_v10 = vpop.xlane.xlu0 %144 }
  0xf7   : > { %146 = vst [vmem:[#allocation4] sm:$0xff] %v145_v10 }
  0xfa   : > { %v164_v11 = vpop.xlane.xlu0 %163 }
  0xfb   : > { %166 = vst [vmem:[#allocation4 + $0x8] sm:$0xff] %v164_v11 }
  0xfc   : > { %168 = vst [vmem:[%s167_s15] sm:$0x1] %v396_v12  ;;  %v264_v42 = vld [vmem:[#allocation2] sm:$0x1] (%p49_p0) }
  0xfd   :  { %266 = vst [vmem:[#allocation3] sm:$0x1] (%p49_p0), %v264_v42 }
 0x103   : > { %v189_v16 = vld [vmem:[%s184_s17] sm:$0xff]  ;;  %v362_v17 = vld [vmem:[%s184_s17 + $0x8] sm:$0xff]  ;;  %s208_s17 = smov %s184_s17 }
 0x104   : > { %v191_v18 = vmul.f32 %v190_v14, %v189_v16  ;;  %v197_v19 = vmul.f32 %v363_v15, %v362_v17  ;;  %v216_v31 = vld [vmem:[%s208_s17] sm:$0xff]  ;;  %v364_v32 = vld [vmem:[%s208_s17 + $0x8] sm:$0xff]  ;;  %v320_v45 = vld [vmem:[#allocation3] sm:$0x1] (%p49_p0) }
 0x105   :  { %321 = vst [vmem:[%s504_s2] sm:$0x1] (%p49_p0), %v320_v45 }
 0x106   : > { %v199_v20 = vsel %vm198_vm15, %v197_v19, 0.0 }
 0x107   : > { %v200_v21 = vadd.f32 %v199_v20, %v191_v18 }
 0x109   : > { %v201_v22 = vrot.slane %v200_v21, 4 }
 0x10b   : > { %v202_v23 = vadd.f32 %v201_v22, %v200_v21 }
 0x10d   : > { %v203_v24 = vrot.slane %v202_v23, 2 }
 0x10f   : > { %v204_v25 = vadd.f32 %v203_v24, %v202_v23 }
 0x111   : > { %v205_v26 = vrot.slane %v204_v25, 1 }
 0x113   : > { %v206_v28 = vadd.f32 %v205_v26, %v204_v25 }
 0x115   : > { %v212_v30 = vmul.f32 %v206_v28, %v175_v8 }
 0x117   : > { %v217_v34 = vmul.f32 %v216_v31, %v212_v30  ;;  %v237_v35 = vmul.f32 %v364_v32, %v212_v30 }
 0x119   : > { %v221_v36 = vsub.f32 %v218_v29, %v217_v34  ;;  %v242_v5 = vsub.f32 %v365_v33, %v237_v35 }
 0x11b   : > { %v222_v37 = vsel %vm220_vm2, %v221_v36, %v218_v29  ;;  %v243_v38 = vsel %vm220_vm2, %v242_v5, %v365_v33 }
 0x11c   : > { %v230_v39 = vsel %vm229_vm3, %v216_v31, %v222_v37  ;;  %v251_v40 = vsel %vm250_vm4, %v364_v32, %v243_v38 }
 0x11d   : > { %231 = vst [vmem:[%s207_s16] sm:$0xff] %v230_v39  ;;  %366 = vst [vmem:[%s207_s16 + $0x8] sm:$0xff] %v251_v40 }
 0x120   :  { %51 = sbr.rel (!%p49_p0) target bundleno = 3 (0x3), region = 148 }
 0x124   : > { %v254_v41 = vld [vmem:[%s253_s18] ss:$0 sm:$0xff] }
 0x125   : > { %v259_v6 = vsel %vm457_vm14, %v447_v48, %v254_v41 }
 0x126   : > { %260 = vst [vmem:[%s253_s18] sm:$0x1] %v259_v6 }
 0x12d   :  { %v296_v43 = vld [vmem:[#allocation1] sm:$0xff]  ;;  %v298_v44 = vld [vmem:[#allocation1 + $0x8] sm:$0xff] }
 0x12e   :  { %297 = vst [vmem:[%s503_s1] sm:$0xff] %v296_v43  ;;  %299 = vst [vmem:[%s503_s1 + $0x8] sm:$0xff] %v298_v44 }

// kernel: tile.13
= control target key start
LH: loop header
LB: loop body
LE: loop exit
PB: predicated region body
PF: predicated region fallthrough
CT: control target
= control target key end

     0   :  { %s22_s0 = inlined_call_operand.vmem [shape: f32[40], index: 0, kind: input, shape index: {}]   ;;  %s23_s1 = inlined_call_operand.vmem [shape: f32[8,40], index: 1, kind: output, shape index: {}]  }
   0x1   :  { %v4_v0 = vld [vmem:[%s22_s0] ss:$0 sm:$0xff] }
   0x2   :  { %5 = vst [vmem:[%s23_s1] sm:$0xff] %v4_v0 }

// kernel: tile.18
= control target key start
LH: loop header
LB: loop body
LE: loop exit
PB: predicated region body
PF: predicated region fallthrough
CT: control target
= control target key end

     0   :  { %s22_s0 = inlined_call_operand.vmem [shape: f32[10], index: 0, kind: input, shape index: {}]   ;;  %s23_s1 = inlined_call_operand.vmem [shape: f32[8,10], index: 1, kind: output, shape index: {}]  }
   0x1   :  { %v4_v0 = vld [vmem:[%s22_s0] ss:$0 sm:$0xff] }
   0x2   :  { %5 = vst [vmem:[%s23_s1] sm:$0xff] %v4_v0 }

// kernel: dwn_block_forward.1
= control target key start
LH: loop header
LB: loop body
LE: loop exit
PB: predicated region body
PF: predicated region fallthrough
CT: control target
= control target key end

     0   :  { %v603_v3 = vmov 0.0   ;;  %vm80_vm0 = vcmask 654336   ;;  %vm605_vm1 = vmmov 0   ;;  %vm226_vm2 = vcmask 648192   ;;  %s896_s1 = inlined_call_operand.vmem [shape: f32[81,448], index: 1, kind: input, shape index: {}]   ;;  %s897_s2 = inlined_call_operand.vmem [shape: f32[321,80], index: 2, kind: input, shape index: {}]   ;;  %s898_s0 = inlined_call_operand.vmem [shape: f32[2,80], index: 0, kind: input, shape index: {}]   ;;  %s899_s4 = inlined_call_operand.vmem [shape: f32[2,80], index: 4, kind: output, shape index: {1}]   ;;  %s900_s3 = inlined_call_operand.vmem [shape: f32[2,80], index: 3, kind: output, shape index: {0}]  }
   0x1   :  { %v18_v0 = vld [vmem:[%s896_s1 + $0x8] sm:$0xff]  ;;  %v20_v2 = vld [vmem:[%s896_s1 + $0x18] sm:$0xff]  ;;  %148 = vmatprep.mubr.f32.mxu0 %v603_v3  ;;  %219 = vmatprep.mubr.f32.mxu1 %v603_v3  ;;  %v17_v6 = vld [vmem:[%s896_s1] sm:$0xff]  ;;  %vm288_vm3 = vcmask 523264  }
   0x2   :  { %v22_v1 = vld [vmem:[%s896_s1 + $0x28] sm:$0xff]  ;;  %v24_v5 = vld [vmem:[%s896_s1 + $0x38] sm:$0xff]  ;;  %v21_v7 = vld [vmem:[%s896_s1 + $0x20] sm:$0xff] }
   0x3   :  { %v510_v4 = vpack.c.bf16 %v22_v1, %v18_v0  ;;  %v530_v8 = vpack.c.bf16 %v24_v5, %v20_v2  ;;  %v512_v9 = vpack.c.bf16 %v21_v7, %v17_v6  ;;  %v19_v10 = vld [vmem:[%s896_s1 + $0x10] sm:$0xff]  ;;  %v26_v12 = vld [vmem:[%s896_s1 + $0x48] sm:$0xff]  ;;  %v28_v15 = vld [vmem:[%s896_s1 + $0x58] sm:$0xff] }
   0x4   :  { %v23_v11 = vld [vmem:[%s896_s1 + $0x30] sm:$0xff]  ;;  %v30_v14 = vld [vmem:[%s896_s1 + $0x68] sm:$0xff]  ;;  %v32_v16 = vld [vmem:[%s896_s1 + $0x78] sm:$0xff] }
   0x5   :  { %511 = vmatprep.subr.bf16.mxu0 %v510_v4  ;;  %v532_v13 = vpack.c.bf16 %v23_v11, %v19_v10  ;;  %531 = vmatprep.subr.bf16.mxu1 %v530_v8  ;;  %v514_v17 = vpack.c.bf16 %v30_v14, %v26_v12  ;;  %v534_v18 = vpack.c.bf16 %v32_v16, %v28_v15  ;;  %v25_v19 = vld [vmem:[%s896_s1 + $0x40] sm:$0xff]  ;;  %v27_v21 = vld [vmem:[%s896_s1 + $0x50] sm:$0xff]  ;;  %v34_v24 = vld [vmem:[%s896_s1 + $0x88] sm:$0xff] }
   0x6   :  { %513 = vmatpush1.bf16.msra.mxu0 %v512_v9  ;;  %v29_v20 = vld [vmem:[%s896_s1 + $0x60] sm:$0xff]  ;;  %v31_v23 = vld [vmem:[%s896_s1 + $0x70] sm:$0xff]  ;;  %v38_v25 = vld [vmem:[%s896_s1 + $0xa8] sm:$0xff] }
   0x7   :  { %533 = vmatpush1.bf16.msra.mxu1 %v532_v13  ;;  %v516_v22 = vpack.c.bf16 %v29_v20, %v25_v19  ;;  %515 = vmatprep.subr.bf16.mxu0 %v514_v17  ;;  %v536_v26 = vpack.c.bf16 %v31_v23, %v27_v21  ;;  %v518_v27 = vpack.c.bf16 %v38_v25, %v34_v24  ;;  %v36_v28 = vld [vmem:[%s896_s1 + $0x98] sm:$0xff]  ;;  %v33_v30 = vld [vmem:[%s896_s1 + $0x80] sm:$0xff]  ;;  %v35_v33 = vld [vmem:[%s896_s1 + $0x90] sm:$0xff] }
   0x8   :  { %535 = vmatprep.subr.bf16.mxu1 %v534_v18  ;;  %v40_v29 = vld [vmem:[%s896_s1 + $0xb8] sm:$0xff]  ;;  %v37_v32 = vld [vmem:[%s896_s1 + $0xa0] sm:$0xff]  ;;  %v39_v34 = vld [vmem:[%s896_s1 + $0xb0] sm:$0xff] }
   0x9   :  { %v538_v31 = vpack.c.bf16 %v40_v29, %v36_v28  ;;  %v520_v35 = vpack.c.bf16 %v37_v32, %v33_v30  ;;  %v42_v36 = vld [vmem:[%s896_s1 + $0xc8] sm:$0xff]  ;;  %v44_v38 = vld [vmem:[%s896_s1 + $0xd8] sm:$0xff]  ;;  %v540_v39 = vpack.c.bf16 %v39_v34, %v35_v33  ;;  %v41_v42 = vld [vmem:[%s896_s1 + $0xc0] sm:$0xff] }
   0xa   :  { %517 = vmatpush1.bf16.msra.mxu0 %v516_v22  ;;  %v46_v37 = vld [vmem:[%s896_s1 + $0xe8] sm:$0xff]  ;;  %v48_v41 = vld [vmem:[%s896_s1 + $0xf8] sm:$0xff]  ;;  %v45_v43 = vld [vmem:[%s896_s1 + $0xe0] sm:$0xff] }
   0xb   :  { %537 = vmatpush1.bf16.msra.mxu1 %v536_v26  ;;  %519 = vmatprep.subr.bf16.mxu0 %v518_v27  ;;  %v522_v40 = vpack.c.bf16 %v46_v37, %v42_v36  ;;  %v542_v44 = vpack.c.bf16 %v48_v41, %v44_v38  ;;  %v43_v45 = vld [vmem:[%s896_s1 + $0xd0] sm:$0xff]  ;;  %v50_v47 = vld [vmem:[%s896_s1 + $0x108] sm:$0xff]  ;;  %v52_v49 = vld [vmem:[%s896_s1 + $0x118] sm:$0xff]  ;;  %v524_v51 = vpack.c.bf16 %v45_v43, %v41_v42 }
   0xc   :  { %539 = vmatprep.subr.bf16.mxu1 %v538_v31  ;;  %v47_v46 = vld [vmem:[%s896_s1 + $0xf0] sm:$0xff]  ;;  %v54_v48 = vld [vmem:[%s896_s1 + $0x128] sm:$0xff]  ;;  %v56_v50 = vld [vmem:[%s896_s1 + $0x138] sm:$0xff]  ;;  %v604_v31 = vmov 0.0|0.0  }
   0xd   :  { %v544_v52 = vpack.c.bf16 %v47_v46, %v43_v45  ;;  %v526_v53 = vpack.c.bf16 %v54_v48, %v50_v47  ;;  %v49_v54 = vld [vmem:[%s896_s1 + $0x100] sm:$0xff]  ;;  %v51_v56 = vld [vmem:[%s896_s1 + $0x110] sm:$0xff]  ;;  %v546_v57 = vpack.c.bf16 %v56_v50, %v52_v49  ;;  %v260_v60 = vld [vmem:[%s897_s2 + $0x88] sm:$0xff] }
   0xe   :  { %521 = vmatpush1.bf16.msra.mxu0 %v520_v35  ;;  %v53_v55 = vld [vmem:[%s896_s1 + $0x120] sm:$0xff]  ;;  %v55_v58 = vld [vmem:[%s896_s1 + $0x130] sm:$0xff]  ;;  %v244_v1 = vld [vmem:[%s897_s2 + $0x8] sm:$0xff] }
   0xf   :  { %541 = vmatpush1.bf16.msra.mxu1 %v540_v39  ;;  %523 = vmatprep.subr.bf16.mxu0 %v522_v40  ;;  %v259_v59 = vld [vmem:[%s897_s2 + $0x80] sm:$0xff]  ;;  %v528_v61 = vpack.c.bf16 %v53_v55, %v49_v54  ;;  %v548_v62 = vpack.c.bf16 %v55_v58, %v51_v56  ;;  %v261_v2 = vld [vmem:[%s897_s2 + $0x90] sm:$0xff]  ;;  %v262_v4 = vld [vmem:[%s897_s2 + $0x98] sm:$0xff] }
  0x10   :  { %543 = vmatprep.subr.bf16.mxu1 %v542_v44  ;;  %v550_v63 = vpack.c.bf16 %v260_v60, %v259_v59  ;;  %v243_v0 = vld [vmem:[%s897_s2] sm:$0xff]  ;;  %v554_v7 = vpack.c.bf16 %v262_v4, %v261_v2  ;;  %v245_v8 = vld [vmem:[%s897_s2 + $0x10] sm:$0xff]  ;;  %v246_v9 = vld [vmem:[%s897_s2 + $0x18] sm:$0xff]  ;;  %v60_v60 = vlaneseq }
  0x11   :  { %v774_v5 = vld [vmem:[%s898_s0] sm:$0x3]  ;;  %v552_v6 = vpack.c.bf16 %v244_v1, %v243_v0  ;;  %v264_v11 = vld [vmem:[%s897_s2 + $0xa8] sm:$0xff]  ;;  %v556_v12 = vpack.c.bf16 %v246_v9, %v245_v8  ;;  %v265_v17 = vld [vmem:[%s897_s2 + $0xb0] sm:$0xff] }
  0x12   :  { %525 = vmatpush1.bf16.msra.mxu0 %v524_v51  ;;  %v263_v10 = vld [vmem:[%s897_s2 + $0xa0] sm:$0xff]  ;;  %v248_v15 = vld [vmem:[%s897_s2 + $0x28] sm:$0xff]  ;;  %v266_v18 = vld [vmem:[%s897_s2 + $0xb8] sm:$0xff] }
  0x13   :  { %545 = vmatpush1.bf16.msra.mxu1 %v544_v52  ;;  %527 = vmatprep.subr.bf16.mxu0 %v526_v53  ;;  %v558_v13 = vpack.c.bf16 %v264_v11, %v263_v10  ;;  %v247_v14 = vld [vmem:[%s897_s2 + $0x20] sm:$0xff]  ;;  %v562_v19 = vpack.c.bf16 %v266_v18, %v265_v17  ;;  %v249_v20 = vld [vmem:[%s897_s2 + $0x30] sm:$0xff]  ;;  %v250_v21 = vld [vmem:[%s897_s2 + $0x38] sm:$0xff] }
  0x14   :  { %547 = vmatprep.subr.bf16.mxu1 %v546_v57  ;;  %v560_v16 = vpack.c.bf16 %v248_v15, %v247_v14  ;;  %v564_v22 = vpack.c.bf16 %v250_v21, %v249_v20  ;;  %v267_v23 = vld [vmem:[%s897_s2 + $0xc0] sm:$0xff]  ;;  %v268_v24 = vld [vmem:[%s897_s2 + $0xc8] sm:$0xff]  ;;  %v269_v33 = vld [vmem:[%s897_s2 + $0xd0] sm:$0xff] }
  0x15   :  { %v566_v25 = vpack.c.bf16 %v268_v24, %v267_v23  ;;  %v251_v26 = vld [vmem:[%s897_s2 + $0x40] sm:$0xff]  ;;  %v252_v27 = vld [vmem:[%s897_s2 + $0x48] sm:$0xff]  ;;  %v270_v34 = vld [vmem:[%s897_s2 + $0xd8] sm:$0xff] }
  0x16   :  { %529 = vmatpush1.bf16.msra.mxu0 %v528_v61  ;;  %v275_v28 = vld [vmem:[%s897_s2 + $0x100] sm:$0xff]  ;;  %v568_v29 = vpack.c.bf16 %v252_v27, %v251_v26  ;;  %v276_v30 = vld [vmem:[%s897_s2 + $0x108] sm:$0xff]  ;;  %v570_v35 = vpack.c.bf16 %v270_v34, %v269_v33  ;;  %v253_v36 = vld [vmem:[%s897_s2 + $0x50] sm:$0xff]  ;;  %v61_v61 = vshrl.u32 %v60_v60, 7 }
  0x17   :  { %549 = vmatpush1.bf16.msra.mxu1 %v548_v62  ;;  %551 = vmatprep.subr.bf16.mxu0 %v550_v63  ;;  %v583_v32 = vpack.c.bf16 %v276_v30, %v275_v28  ;;  %v254_v37 = vld [vmem:[%s897_s2 + $0x58] sm:$0xff]  ;;  %v277_v38 = vld [vmem:[%s897_s2 + $0x110] sm:$0xff]  ;;  %v271_v42 = vld [vmem:[%s897_s2 + $0xe0] sm:$0xff] }
  0x18   :  { %582 = vmatprep.subr.bf16.mxu1 %v604_v31  ;;  %v572_v39 = vpack.c.bf16 %v254_v37, %v253_v36  ;;  %v278_v40 = vld [vmem:[%s897_s2 + $0x118] sm:$0xff]  ;;  %v272_v43 = vld [vmem:[%s897_s2 + $0xe8] sm:$0xff]  ;;  %v255_v45 = vld [vmem:[%s897_s2 + $0x60] sm:$0xff]  ;;  %v62_v62 = vsub.s32 0, %v61_v61  ;;  %v70_v0 = vsub.s32 2, %v61_v61  ;;  %v66_v1 = vsub.s32 1, %v61_v61 }
  0x19   :  { %443 = vmatmul.mubr.msk.f32.vlgmr.msra.gmra.mrb[0].mxu0 %vm80_vm0, %v774_v5  ;;  %v586_v41 = vpack.c.bf16 %v278_v40, %v277_v38  ;;  %v574_v44 = vpack.c.bf16 %v272_v43, %v271_v42  ;;  %v256_v46 = vld [vmem:[%s897_s2 + $0x68] sm:$0xff]  ;;  %v279_v47 = vld [vmem:[%s897_s2 + $0x120] sm:$0xff]  ;;  %v273_v51 = vld [vmem:[%s897_s2 + $0xf0] sm:$0xff]  ;;  %v74_v2 = vsub.s32 3, %v61_v61 }
  0x1a   :  { %444 = vmatmul.mubr.msk.f32.vlgmr.msra.gmra.mrb[0].mxu1 %vm80_vm0, %v774_v5  ;;  %553 = vmatpush3.bf16.msra.mxu0 %v552_v6  ;;  %v576_v48 = vpack.c.bf16 %v256_v46, %v255_v45  ;;  %v280_v49 = vld [vmem:[%s897_s2 + $0x128] sm:$0xff]  ;;  %v274_v52 = vld [vmem:[%s897_s2 + $0xf8] sm:$0xff]  ;;  %v257_v54 = vld [vmem:[%s897_s2 + $0x70] sm:$0xff] }
  0x1b   :  { %555 = vmatprep.subr.bf16.mxu0 %v554_v7  ;;  %584 = vmatpush3.bf16.msra.mxu1 %v583_v32  ;;  %v589_v50 = vpack.c.bf16 %v280_v49, %v279_v47  ;;  %v578_v53 = vpack.c.bf16 %v274_v52, %v273_v51  ;;  %v258_v55 = vld [vmem:[%s897_s2 + $0x78] sm:$0xff]  ;;  %v281_v56 = vld [vmem:[%s897_s2 + $0x130] sm:$0xff]  ;;  %v445_v33 = vld [vmem:[%s897_s2 + $0x140] ss:$0 sm:$0xff] }
  0x1c   :  { %585 = vmatprep.subr.bf16.mxu1 %v604_v31  ;;  %v580_v57 = vpack.c.bf16 %v258_v55, %v257_v54  ;;  %v282_v58 = vld [vmem:[%s897_s2 + $0x138] sm:$0xff]  ;;  %507 = vmatprep.mubr.msk.f32.mxu1 %vm605_vm1, %v603_v3 }
  0x1d   :  { %v592_v59 = vpack.c.bf16 %v282_v58, %v281_v56  ;;  %v442_v63 = vld [vmem:[%s896_s1 + $0x140] ss:$8 sm:$0xf] }
  0x1e   :  { %557 = vmatpush3.bf16.msra.mxu0 %v556_v12  ;;  %v63_v4 = vrot.slane %v442_v63, %v62_v62  ;;  %v71_v6 = vrot.slane %v442_v63, %v70_v0  ;;  %v67_v7 = vrot.slane %v442_v63, %v66_v1  ;;  %v75_v8 = vrot.slane %v442_v63, %v74_v2 }
  0x1f   :  { %559 = vmatprep.subr.bf16.mxu0 %v558_v13  ;;  %587 = vmatpush3.bf16.msra.mxu1 %v586_v41 }
  0x20   :  { %588 = vmatprep.subr.bf16.mxu1 %v604_v31 }
  0x22   :  { %561 = vmatpush3.bf16.msra.mxu0 %v560_v16 }
  0x23   :  { %563 = vmatprep.subr.bf16.mxu0 %v562_v19  ;;  %590 = vmatpush3.bf16.msra.mxu1 %v589_v50 }
  0x24   :  { %591 = vmatprep.subr.bf16.mxu1 %v604_v31 }
  0x26   :  { %565 = vmatpush3.bf16.msra.mxu0 %v564_v22 }
  0x27   :  { %567 = vmatprep.subr.bf16.mxu0 %v566_v25  ;;  %593 = vmatpush3.bf16.msra.mxu1 %v592_v59 }
  0x2a   :  { %569 = vmatpush3.bf16.msra.mxu0 %v568_v29 }
  0x2b   :  { %571 = vmatprep.subr.bf16.mxu0 %v570_v35 }
  0x2e   :  { %573 = vmatpush3.bf16.msra.mxu0 %v572_v39 }
  0x2f   :  { %575 = vmatprep.subr.bf16.mxu0 %v574_v44 }
  0x32   :  { %577 = vmatpush3.bf16.msra.mxu0 %v576_v48 }
  0x33   :  { %579 = vmatprep.subr.bf16.mxu0 %v578_v53 }
  0x36   :  { %581 = vmatpush3.bf16.msra.mxu0 %v580_v57 }
  0xec   :  { %v150_v9 = vpop.f32.mrb[0].mxu0 }
  0xed   :  { %v151_v10 = vadd.f32 %v150_v9, %v63_v4  ;;  %v221_v11 = vpop.f32.mrb[0].mxu1  ;;  %v152_v12 = vpop.f32.mrb[1].mxu0 }
  0xee   :  { %v222_v3 = vadd.f32 %v221_v11, %v71_v6  ;;  %v153_v13 = vadd.f32 %v152_v12, %v67_v7  ;;  %v223_v14 = vpop.f32.mrb[1].mxu1 }
  0xef   :  { %227 = vst.msk [vmem:[%s899_s4] sm:$0x3] %vm226_vm2, %v151_v10  ;;  %v224_v15 = vadd.f32 %v223_v14, %v75_v8 }
  0xf0   :  { %v232_v16 = vmul.f32 0.70710677, %v222_v3  ;;  %v231_v17 = vmul.f32 0.70710677, %v153_v13  ;;  %v229_v21 = vmul.f32 0.5, %v222_v3  ;;  %v228_v24 = vmul.f32 0.5, %v153_v13 }
  0xf1   :  { %v233_v18 = vmul.f32 0.70710677, %v224_v15  ;;  %v230_v26 = vmul.f32 0.5, %v224_v15 }
  0xf2   :  { %597 = verf.f32 %v232_v16 }
  0xf3   :  { %599 = verf.f32 %v231_v17 }
  0xf4   :  { %601 = verf.f32 %v233_v18 }
  0xfc   :  { %v598_v19 = vpop.eup %597 }
  0xfd   :  { %v600_v20 = vpop.eup %599  ;;  %v238_v22 = vadd.f32 1.0, %v598_v19 }
  0xfe   :  { %v602_v23 = vpop.eup %601  ;;  %v237_v25 = vadd.f32 1.0, %v600_v20 }
  0xff   :  { %v239_v27 = vadd.f32 1.0, %v602_v23  ;;  %v241_v28 = vmul.f32 %v238_v22, %v229_v21 }
 0x100   :  { %v240_v29 = vmul.f32 %v237_v25, %v228_v24 }
 0x101   :  { %v242_v30 = vmul.f32 %v239_v27, %v230_v26  ;;  %356 = vmatprep.mubr.f32.mxu0 %v241_v28 }
 0x102   :  { %357 = vmatmul.mubr.f32.vlgmr.msra.gmra.mrb[2].mxu0 %v240_v29 }
 0x103   :  { %508 = vmatmul.mubr.msk.f32.vlgmr.msra.gmra.mrb[2].mxu1 %vm288_vm3, %v242_v30 }
 0x1d5   :  { %v479_v31 = vpop.f32.mrb[2].mxu0 }
 0x1d6   :  { %v428_v32 = vpop.f32.mrb[2].mxu1  ;;  %v480_v34 = vpop.f32.mrb[3].mxu0 }
 0x1d7   :  { %v481_v35 = vadd.f32 %v480_v34, %v479_v31  ;;  %v509_v36 = vpop.f32.mrb[3].mxu1 }
 0x1d9   :  { %v359_v37 = vadd.f32 %v481_v35, %v445_v33 }
 0x1db   :  { %v429_v38 = vadd.f32 %v428_v32, %v359_v37 }
 0x1dd   :  { %v432_v39 = vadd.f32 %v429_v38, %v774_v5 }
 0x1df   :  { %433 = vst.msk [vmem:[%s900_s3] sm:$0x3] %vm226_vm2, %v432_v39 }

</bundles_post_ra>
